<compile_context>
chip_gen: v6e
topology: v6e:2x2x1
jax: 0.10.0
libtpu: 0.0.40
codegen_flags: <defaults>
</compile_context>

<pallas_src>
import functools
import math

import jax
import jax.numpy as jnp
from jax.experimental import pallas as pl
from jax.experimental.pallas import tpu as pltpu


def _vgg_head_kernel(x_ref, wqkv_ref, bqkv_ref, wo_ref, bo_ref,
                     wd_ref, bd_ref, w1_ref, b1_ref, w2_ref,
                     wcf_ref, wca_ref, wcg_ref, bc_ref,
                     age_ref, gen_ref,
                     logits_ref, pooled_ref, wts_ref,
                     *, num_heads):
    bt, N, D = x_ref.shape                       # batch tile, sequence (channels), embed dim
    hd = D // num_heads
    scale = 1.0 / math.sqrt(hd)

    x = x_ref[...]                               # (bt, N, D) f32
    x2 = x.reshape(bt * N, D)                    # flatten batch*seq -> tall M for the MXU

    # ---- nn.MultiheadAttention(D, num_heads): fused in-projection as ONE wide matmul ----
    qkv = jnp.dot(x2, wqkv_ref[...], preferred_element_type=jnp.float32) + bqkv_ref[...]
    q = (qkv[:, :D] * scale).reshape(bt, N, D)   # fold 1/sqrt(hd) into q once
    k = qkv[:, D:2 * D].reshape(bt, N, D)
    v = qkv[:, 2 * D:].reshape(bt, N, D)

    # Per-head attention; the output projection is folded into a per-head accumulation
    # (avoids an in-kernel concat of head contexts).
    mha = jnp.zeros((bt * N, D), dtype=jnp.float32)
    for h in range(num_heads):                   # static unroll, num_heads = 4
        sl = slice(h * hd, (h + 1) * hd)
        s = jnp.einsum("bnd,bmd->bnm", q[:, :, sl], k[:, :, sl],
                       preferred_element_type=jnp.float32)          # (bt, N, N)
        s = s - jnp.max(s, axis=-1, keepdims=True)
        p = jnp.exp(s)
        p = p * pl.reciprocal(jnp.sum(p, axis=-1, keepdims=True), approx=True)
        ctx = jnp.einsum("bnm,bmd->bnd", p, v[:, :, sl],
                         preferred_element_type=jnp.float32)        # (bt, N, hd)
        mha = mha + jnp.dot(ctx.reshape(bt * N, hd), wo_ref[sl, :],
                            preferred_element_type=jnp.float32)     # out-proj slice of this head
    mha = mha + bo_ref[...]                                          # (bt*N, D)

    # ---- down: Linear(D, Hd) ----
    feat = jnp.dot(mha, wd_ref[...], preferred_element_type=jnp.float32) + bd_ref[...]  # (bt*N, Hd)
    Hd = feat.shape[-1]

    # ---- Attention pooling: Linear(Hd,Hd) + ReLU, then Linear(Hd,1) as a lane reduction ----
    h1 = jnp.maximum(
        jnp.dot(feat, w1_ref[...], preferred_element_type=jnp.float32) + b1_ref[...], 0.0)  # (bt*N, Hd)
    feat3 = feat.reshape(bt, N, Hd)
    h13 = h1.reshape(bt, N, Hd)
    # score s[b,n] = sum_k h1[b,n,k] * w2[k]   (bias dropped: softmax is shift-invariant)
    sc = jnp.sum(h13 * w2_ref[...], axis=-1, keepdims=True)[:, :, 0]    # (bt, N)
    m = jnp.max(sc, axis=-1, keepdims=True)
    e = jnp.exp(sc - m)
    w = e * pl.reciprocal(jnp.sum(e, axis=-1, keepdims=True), approx=True)   # (bt, N)
    pooled = jnp.sum(feat3 * w[:, :, None], axis=1)                          # (bt, Hd)

    # ---- classifier: Linear(Hd + 2, C); age/gender columns applied directly (no concat) ----
    logits = (jnp.dot(pooled, wcf_ref[...], preferred_element_type=jnp.float32)
              + age_ref[...] * wca_ref[...]
              + gen_ref[...] * wcg_ref[...]
              + bc_ref[...])                                                 # (bt, C)

    logits_ref[...] = logits
    pooled_ref[...] = pooled
    wts_ref[...] = w


def vgg_multiattn_head(feats, age, gender, params, *, num_heads=4, batch_tile=None):
    """feats: (B, N, 512) f32 backbone features. Returns (logits, pooled, attn_weights)."""
    B, N, D = feats.shape
    Hd = params["w_down"].shape[0]
    C = params["w_cls"].shape[0]
    f32 = jnp.float32

    bt = B if batch_tile is None else batch_tile
    assert B % bt == 0 and (bt == B or bt % 8 == 0), "batch tile must divide B (and be 8-aligned if < B)"

    # PyTorch-convention parameters -> matmul-friendly layouts (wrapper-side plumbing only).
    wqkv_t = params["w_qkv"].T.astype(f32)            # (D, 3D)
    bqkv = params["b_qkv"].reshape(1, 3 * D).astype(f32)
    wo_t = params["w_out"].T.astype(f32)              # (D, D)
    bo = params["b_out"].reshape(1, D).astype(f32)
    wd_t = params["w_down"].T.astype(f32)             # (D, Hd)
    bd = params["b_down"].reshape(1, Hd).astype(f32)
    w1_t = params["w_attn1"].T.astype(f32)            # (Hd, Hd)
    b1 = params["b_attn1"].reshape(1, Hd).astype(f32)
    w2 = params["w_attn2"].reshape(1, Hd).astype(f32)  # Linear(Hd,1).weight; its bias is a softmax no-op
    wcf_t = params["w_cls"][:, :Hd].T.astype(f32)      # (Hd, C)
    wca = params["w_cls"][:, Hd].reshape(1, C).astype(f32)
    wcg = params["w_cls"][:, Hd + 1].reshape(1, C).astype(f32)
    bc = params["b_cls"].reshape(1, C).astype(f32)
    age2 = age.reshape(B, 1).astype(f32)
    gen2 = gender.reshape(B, 1).astype(f32)

    def full(shape):
        # Whole-array block, same block at every grid step (no re-fetch needed).
        return pl.BlockSpec(shape, lambda i: (0,) * len(shape))

    kernel = functools.partial(_vgg_head_kernel, num_heads=num_heads)

    return pl.pallas_call(
        kernel,
        out_shape=(
            jax.ShapeDtypeStruct((B, C), f32),     # logits
            jax.ShapeDtypeStruct((B, Hd), f32),    # pooled features
            jax.ShapeDtypeStruct((B, N), f32),     # attention-pool weights
        ),
        grid=(B // bt,),
        in_specs=[
            pl.BlockSpec((bt, N, D), lambda i: (i, 0, 0)),   # feats
            full((D, 3 * D)), full((1, 3 * D)),              # qkv in-proj
            full((D, D)), full((1, D)),                      # out-proj
            full((D, Hd)), full((1, Hd)),                    # down
            full((Hd, Hd)), full((1, Hd)),                   # attn linear 1
            full((1, Hd)),                                   # attn linear 2 (as vector)
            full((Hd, C)), full((1, C)), full((1, C)), full((1, C)),  # classifier
            pl.BlockSpec((bt, 1), lambda i: (i, 0)),         # age
            pl.BlockSpec((bt, 1), lambda i: (i, 0)),         # gender
        ],
        out_specs=(
            pl.BlockSpec((bt, C), lambda i: (i, 0)),
            pl.BlockSpec((bt, Hd), lambda i: (i, 0)),
            pl.BlockSpec((bt, N), lambda i: (i, 0)),
        ),
        compiler_params=pltpu.CompilerParams(
            dimension_semantics=("parallel",),       # shards the batch grid across TCs on v7x
            vmem_limit_bytes=48 * 1024 * 1024,       # explicit, safe on v5e/v6e (128 MiB) and v7x (64 MiB)
        ),
    )(feats, wqkv_t, bqkv, wo_t, bo, wd_t, bd, w1_t, b1, w2,
      wcf_t, wca, wcg, bc, age2, gen2)


def _reference(feats, age, gender, params, num_heads):
    """Pure-JAX reference mirroring the PyTorch head (incl. the score bias the kernel drops)."""
    B, N, D = feats.shape
    hd = D // num_heads
    x2 = feats.reshape(B * N, D)
    qkv = x2 @ params["w_qkv"].T + params["b_qkv"]
    q, k, v = qkv[:, :D], qkv[:, D:2 * D], qkv[:, 2 * D:]

    def heads(t):
        return t.reshape(B, N, num_heads, hd).transpose(0, 2, 1, 3)  # (B, H, N, hd)

    qh, kh, vh = heads(q), heads(k), heads(v)
    s = jnp.einsum("bhnd,bhmd->bhnm", qh, kh) / math.sqrt(hd)
    p = jax.nn.softmax(s, axis=-1)
    ctx = jnp.einsum("bhnm,bhmd->bhnd", p, vh).transpose(0, 2, 1, 3).reshape(B * N, D)
    mha = ctx @ params["w_out"].T + params["b_out"]
    feat = mha @ params["w_down"].T + params["b_down"]
    h1 = jnp.maximum(feat @ params["w_attn1"].T + params["b_attn1"], 0.0)
    sc = (h1 @ params["w_attn2"].T + params["b_attn2"]).reshape(B, N)
    w = jax.nn.softmax(sc, axis=-1)
    feat3 = feat.reshape(B, N, -1)
    pooled = jnp.sum(feat3 * w[:, :, None], axis=1)
    z = jnp.concatenate([pooled, age.reshape(-1, 1), gender.reshape(-1, 1)], axis=1)
    logits = z @ params["w_cls"].T + params["b_cls"]
    return logits, pooled, w


if __name__ == "__main__":
    B, N, D = 2, 8, 512          # batch, #channels (sequence), backbone feature dim
    Hd, C, NH = 128, 10, 4       # hidden_dim, num_classes, attention heads

    key = jax.random.PRNGKey(0)
    ks = jax.random.split(key, 16)
    u = lambda k, shape, a: jax.random.uniform(k, shape, jnp.float32, -a, a)

    feats = jax.random.normal(ks[0], (B, N, D), dtype=jnp.float32)
    age = jax.random.uniform(ks[1], (B,), jnp.float32, 0.0, 1.0)
    gender = jnp.round(jax.random.uniform(ks[2], (B,), jnp.float32, 0.0, 1.0))

    params = {
        # nn.MultiheadAttention(512, 4): in_proj (3D, D) + bias, out_proj (D, D) + bias
        "w_qkv": u(ks[3], (3 * D, D), 1.0 / math.sqrt(D)),
        "b_qkv": u(ks[4], (3 * D,), 1.0 / math.sqrt(D)),
        "w_out": u(ks[5], (D, D), 1.0 / math.sqrt(D)),
        "b_out": u(ks[6], (D,), 1.0 / math.sqrt(D)),
        # down: Linear(512, Hd)
        "w_down": u(ks[7], (Hd, D), 1.0 / math.sqrt(D)),
        "b_down": u(ks[8], (Hd,), 1.0 / math.sqrt(D)),
        # Attention(Hd): Linear(Hd, Hd), Linear(Hd, 1)
        "w_attn1": u(ks[9], (Hd, Hd), 1.0 / math.sqrt(Hd)),
        "b_attn1": u(ks[10], (Hd,), 1.0 / math.sqrt(Hd)),
        "w_attn2": u(ks[11], (1, Hd), 1.0 / math.sqrt(Hd)),
        "b_attn2": u(ks[12], (1,), 1.0 / math.sqrt(Hd)),
        # classifier: Linear(Hd + 2, C)
        "w_cls": u(ks[13], (C, Hd + 2), 1.0 / math.sqrt(Hd + 2)),
        "b_cls": u(ks[14], (C,), 1.0 / math.sqrt(Hd + 2)),
    }

    logits, pooled, weights = vgg_multiattn_head(feats, age, gender, params, num_heads=NH)
    jax.block_until_ready((logits, pooled, weights))

    ref_logits, ref_pooled, ref_w = _reference(feats, age, gender, params, NH)

    assert logits.shape == (B, C) and pooled.shape == (B, Hd) and weights.shape == (B, N)
    # Loose tolerance: MXU default matmul precision + approx (EUP) reciprocal vs the XLA reference.
    assert jnp.allclose(logits, ref_logits, atol=1e-2, rtol=1e-2), "logits mismatch"
    assert jnp.allclose(pooled, ref_pooled, atol=1e-2, rtol=1e-2), "pooled mismatch"
    assert jnp.allclose(weights, ref_w, atol=1e-2, rtol=1e-2), "attention weights mismatch"
    assert jnp.allclose(jnp.sum(weights, axis=-1), 1.0, atol=1e-2), "weights not normalized"

    print("KERNEL_OK")
</pallas_src>

<mosaic_0001>
module attributes {stable_mosaic.version = 11 : i64} {
  func.func @_vgg_head_kernel(%arg0: i32, %arg1: memref<2x8x512xf32, #tpu.memory_space<vmem>>, %arg2: memref<512x1536xf32, #tpu.memory_space<vmem>>, %arg3: memref<1x1536xf32, #tpu.memory_space<vmem>>, %arg4: memref<512x512xf32, #tpu.memory_space<vmem>>, %arg5: memref<1x512xf32, #tpu.memory_space<vmem>>, %arg6: memref<512x128xf32, #tpu.memory_space<vmem>>, %arg7: memref<1x128xf32, #tpu.memory_space<vmem>>, %arg8: memref<128x128xf32, #tpu.memory_space<vmem>>, %arg9: memref<1x128xf32, #tpu.memory_space<vmem>>, %arg10: memref<1x128xf32, #tpu.memory_space<vmem>>, %arg11: memref<128x10xf32, #tpu.memory_space<vmem>>, %arg12: memref<1x10xf32, #tpu.memory_space<vmem>>, %arg13: memref<1x10xf32, #tpu.memory_space<vmem>>, %arg14: memref<1x10xf32, #tpu.memory_space<vmem>>, %arg15: memref<2x1xf32, #tpu.memory_space<vmem>>, %arg16: memref<2x1xf32, #tpu.memory_space<vmem>>, %arg17: memref<2x10xf32, #tpu.memory_space<vmem>>, %arg18: memref<2x128xf32, #tpu.memory_space<vmem>>, %arg19: memref<2x8xf32, #tpu.memory_space<vmem>>) attributes {dimension_semantics = [#tpu.dimension_semantics<parallel>], iteration_bounds = array<i64: 1>, scalar_prefetch = 0 : i64, scratch_operands = 0 : i64, tpu.core_type = #tpu.core_type<tc>, window_params = [{transform_indices = @transform_0, window_bounds = array<i64: 2, 8, 512>}, {pipeline_mode = #tpu.pipeline_mode<synchronous>, transform_indices = @transform_1, window_bounds = array<i64: 512, 1536>}, {pipeline_mode = #tpu.pipeline_mode<synchronous>, transform_indices = @transform_2, window_bounds = array<i64: 1, 1536>}, {pipeline_mode = #tpu.pipeline_mode<synchronous>, transform_indices = @transform_3, window_bounds = array<i64: 512, 512>}, {pipeline_mode = #tpu.pipeline_mode<synchronous>, transform_indices = @transform_4, window_bounds = array<i64: 1, 512>}, {pipeline_mode = #tpu.pipeline_mode<synchronous>, transform_indices = @transform_5, window_bounds = array<i64: 512, 128>}, {pipeline_mode = #tpu.pipeline_mode<synchronous>, transform_indices = @transform_6, window_bounds = array<i64: 1, 128>}, {pipeline_mode = #tpu.pipeline_mode<synchronous>, transform_indices = @transform_7, window_bounds = array<i64: 128, 128>}, {pipeline_mode = #tpu.pipeline_mode<synchronous>, transform_indices = @transform_8, window_bounds = array<i64: 1, 128>}, {pipeline_mode = #tpu.pipeline_mode<synchronous>, transform_indices = @transform_9, window_bounds = array<i64: 1, 128>}, {pipeline_mode = #tpu.pipeline_mode<synchronous>, transform_indices = @transform_10, window_bounds = array<i64: 128, 10>}, {pipeline_mode = #tpu.pipeline_mode<synchronous>, transform_indices = @transform_11, window_bounds = array<i64: 1, 10>}, {pipeline_mode = #tpu.pipeline_mode<synchronous>, transform_indices = @transform_12, window_bounds = array<i64: 1, 10>}, {pipeline_mode = #tpu.pipeline_mode<synchronous>, transform_indices = @transform_13, window_bounds = array<i64: 1, 10>}, {transform_indices = @transform_14, window_bounds = array<i64: 2, 1>}, {transform_indices = @transform_15, window_bounds = array<i64: 2, 1>}, {transform_indices = @transform_16, window_bounds = array<i64: 2, 10>}, {transform_indices = @transform_17, window_bounds = array<i64: 2, 128>}, {transform_indices = @transform_18, window_bounds = array<i64: 2, 8>}]} {
    %c0 = arith.constant 0 : index
    %c0_0 = arith.constant 0 : index
    %c0_1 = arith.constant 0 : index
    %0 = vector.load %arg1[%c0, %c0_0, %c0_1] : memref<2x8x512xf32, #tpu.memory_space<vmem>>, vector<2x8x512xf32>
    %1 = vector.shape_cast %0 : vector<2x8x512xf32> to vector<16x512xf32>
    %c0_2 = arith.constant 0 : index
    %c0_3 = arith.constant 0 : index
    %2 = vector.load %arg2[%c0_2, %c0_3] : memref<512x1536xf32, #tpu.memory_space<vmem>>, vector<512x1536xf32>
    %cst = arith.constant dense<0.000000e+00> : vector<16x1536xf32>
    %3 = tpu.matmul %1, %2, %cst {dimension_numbers = #tpu.dot_dimension_numbers<[1], [0], [0], [1], [0, 0, 1, 1], [], []>} : vector<16x512xf32>, vector<512x1536xf32>, vector<16x1536xf32> -> vector<16x1536xf32>
    %c0_4 = arith.constant 0 : index
    %c0_5 = arith.constant 0 : index
    %4 = vector.load %arg3[%c0_4, %c0_5] : memref<1x1536xf32, #tpu.memory_space<vmem>>, vector<1x1536xf32>
    %5 = vector.broadcast %4 : vector<1x1536xf32> to vector<16x1536xf32>
    %6 = arith.addf %3, %5 : vector<16x1536xf32>
    %7 = vector.extract_strided_slice %6 {offsets = [0, 0], sizes = [16, 512], strides = [1, 1]} : vector<16x1536xf32> to vector<16x512xf32>
    %cst_6 = arith.constant 0.0883883461 : f32
    %8 = vector.broadcast %cst_6 : f32 to vector<16x512xf32>
    %9 = arith.mulf %7, %8 : vector<16x512xf32>
    %10 = vector.shape_cast %9 : vector<16x512xf32> to vector<2x8x512xf32>
    %11 = vector.extract_strided_slice %6 {offsets = [0, 512], sizes = [16, 512], strides = [1, 1]} : vector<16x1536xf32> to vector<16x512xf32>
    %12 = vector.shape_cast %11 : vector<16x512xf32> to vector<2x8x512xf32>
    %13 = vector.extract_strided_slice %6 {offsets = [0, 1024], sizes = [16, 512], strides = [1, 1]} : vector<16x1536xf32> to vector<16x512xf32>
    %14 = vector.shape_cast %13 : vector<16x512xf32> to vector<2x8x512xf32>
    %cst_7 = arith.constant 0.000000e+00 : f32
    %15 = vector.broadcast %cst_7 : f32 to vector<16x512xf32>
    %16 = vector.extract_strided_slice %10 {offsets = [0, 0, 0], sizes = [2, 8, 128], strides = [1, 1, 1]} : vector<2x8x512xf32> to vector<2x8x128xf32>
    %17 = vector.extract_strided_slice %12 {offsets = [0, 0, 0], sizes = [2, 8, 128], strides = [1, 1, 1]} : vector<2x8x512xf32> to vector<2x8x128xf32>
    "tpu.trace_start"() <{level = 10 : i32, message = "bnd,bmd->bnm"}> : () -> ()
    %cst_8 = arith.constant dense<0.000000e+00> : vector<2x8x8xf32>
    %18 = tpu.matmul %16, %17, %cst_8 {dimension_numbers = #tpu.dot_dimension_numbers<[2], [2], [1], [1], [0, 0, 0, 1, 1, 1], [0], [0]>} : vector<2x8x128xf32>, vector<2x8x128xf32>, vector<2x8x8xf32> -> vector<2x8x8xf32>
    "tpu.trace_stop"() : () -> ()
    %cst_9 = arith.constant dense<0xFF800000> : vector<2x8xf32>
    %19 = vector.multi_reduction <maximumf>, %18, %cst_9 [2] : vector<2x8x8xf32> to vector<2x8xf32>
    %20 = vector.shape_cast %19 : vector<2x8xf32> to vector<2x8x1xf32>
    %21 = vector.broadcast %20 : vector<2x8x1xf32> to vector<2x8x8xf32>
    %22 = arith.subf %18, %21 : vector<2x8x8xf32>
    %23 = math.exp %22 : vector<2x8x8xf32>
    %cst_10 = arith.constant dense<0.000000e+00> : vector<2x8xf32>
    %24 = vector.multi_reduction <add>, %23, %cst_10 [2] : vector<2x8x8xf32> to vector<2x8xf32>
    %25 = vector.shape_cast %24 : vector<2x8xf32> to vector<2x8x1xf32>
    %26 = tpu.reciprocal %25 {approx = true} : vector<2x8x1xf32> -> vector<2x8x1xf32>
    %27 = vector.broadcast %26 : vector<2x8x1xf32> to vector<2x8x8xf32>
    %28 = arith.mulf %23, %27 : vector<2x8x8xf32>
    %29 = vector.extract_strided_slice %14 {offsets = [0, 0, 0], sizes = [2, 8, 128], strides = [1, 1, 1]} : vector<2x8x512xf32> to vector<2x8x128xf32>
    "tpu.trace_start"() <{level = 10 : i32, message = "bnm,bmd->bnd"}> : () -> ()
    %cst_11 = arith.constant dense<0.000000e+00> : vector<2x8x128xf32>
    %30 = tpu.matmul %28, %29, %cst_11 {dimension_numbers = #tpu.dot_dimension_numbers<[2], [1], [1], [2], [0, 0, 0, 1, 1, 2], [0], [0]>} : vector<2x8x8xf32>, vector<2x8x128xf32>, vector<2x8x128xf32> -> vector<2x8x128xf32>
    "tpu.trace_stop"() : () -> ()
    %31 = vector.shape_cast %30 : vector<2x8x128xf32> to vector<16x128xf32>
    %c0_12 = arith.constant 0 : index
    %c0_13 = arith.constant 0 : index
    %32 = vector.load %arg4[%c0_12, %c0_13] : memref<512x512xf32, #tpu.memory_space<vmem>>, vector<128x512xf32>
    %cst_14 = arith.constant dense<0.000000e+00> : vector<16x512xf32>
    %33 = tpu.matmul %31, %32, %cst_14 {dimension_numbers = #tpu.dot_dimension_numbers<[1], [0], [0], [1], [0, 0, 1, 1], [], []>} : vector<16x128xf32>, vector<128x512xf32>, vector<16x512xf32> -> vector<16x512xf32>
    %34 = arith.addf %15, %33 : vector<16x512xf32>
    %35 = vector.extract_strided_slice %10 {offsets = [0, 0, 128], sizes = [2, 8, 128], strides = [1, 1, 1]} : vector<2x8x512xf32> to vector<2x8x128xf32>
    %36 = vector.extract_strided_slice %12 {offsets = [0, 0, 128], sizes = [2, 8, 128], strides = [1, 1, 1]} : vector<2x8x512xf32> to vector<2x8x128xf32>
    "tpu.trace_start"() <{level = 10 : i32, message = "bnd,bmd->bnm"}> : () -> ()
    %cst_15 = arith.constant dense<0.000000e+00> : vector<2x8x8xf32>
    %37 = tpu.matmul %35, %36, %cst_15 {dimension_numbers = #tpu.dot_dimension_numbers<[2], [2], [1], [1], [0, 0, 0, 1, 1, 1], [0], [0]>} : vector<2x8x128xf32>, vector<2x8x128xf32>, vector<2x8x8xf32> -> vector<2x8x8xf32>
    "tpu.trace_stop"() : () -> ()
    %cst_16 = arith.constant dense<0xFF800000> : vector<2x8xf32>
    %38 = vector.multi_reduction <maximumf>, %37, %cst_16 [2] : vector<2x8x8xf32> to vector<2x8xf32>
    %39 = vector.shape_cast %38 : vector<2x8xf32> to vector<2x8x1xf32>
    %40 = vector.broadcast %39 : vector<2x8x1xf32> to vector<2x8x8xf32>
    %41 = arith.subf %37, %40 : vector<2x8x8xf32>
    %42 = math.exp %41 : vector<2x8x8xf32>
    %cst_17 = arith.constant dense<0.000000e+00> : vector<2x8xf32>
    %43 = vector.multi_reduction <add>, %42, %cst_17 [2] : vector<2x8x8xf32> to vector<2x8xf32>
    %44 = vector.shape_cast %43 : vector<2x8xf32> to vector<2x8x1xf32>
    %45 = tpu.reciprocal %44 {approx = true} : vector<2x8x1xf32> -> vector<2x8x1xf32>
    %46 = vector.broadcast %45 : vector<2x8x1xf32> to vector<2x8x8xf32>
    %47 = arith.mulf %42, %46 : vector<2x8x8xf32>
    %48 = vector.extract_strided_slice %14 {offsets = [0, 0, 128], sizes = [2, 8, 128], strides = [1, 1, 1]} : vector<2x8x512xf32> to vector<2x8x128xf32>
    "tpu.trace_start"() <{level = 10 : i32, message = "bnm,bmd->bnd"}> : () -> ()
    %cst_18 = arith.constant dense<0.000000e+00> : vector<2x8x128xf32>
    %49 = tpu.matmul %47, %48, %cst_18 {dimension_numbers = #tpu.dot_dimension_numbers<[2], [1], [1], [2], [0, 0, 0, 1, 1, 2], [0], [0]>} : vector<2x8x8xf32>, vector<2x8x128xf32>, vector<2x8x128xf32> -> vector<2x8x128xf32>
    "tpu.trace_stop"() : () -> ()
    %50 = vector.shape_cast %49 : vector<2x8x128xf32> to vector<16x128xf32>
    %c128 = arith.constant 128 : index
    %c0_19 = arith.constant 0 : index
    %51 = vector.load %arg4[%c128, %c0_19] : memref<512x512xf32, #tpu.memory_space<vmem>>, vector<128x512xf32>
    %cst_20 = arith.constant dense<0.000000e+00> : vector<16x512xf32>
    %52 = tpu.matmul %50, %51, %cst_20 {dimension_numbers = #tpu.dot_dimension_numbers<[1], [0], [0], [1], [0, 0, 1, 1], [], []>} : vector<16x128xf32>, vector<128x512xf32>, vector<16x512xf32> -> vector<16x512xf32>
    %53 = arith.addf %34, %52 : vector<16x512xf32>
    %54 = vector.extract_strided_slice %10 {offsets = [0, 0, 256], sizes = [2, 8, 128], strides = [1, 1, 1]} : vector<2x8x512xf32> to vector<2x8x128xf32>
    %55 = vector.extract_strided_slice %12 {offsets = [0, 0, 256], sizes = [2, 8, 128], strides = [1, 1, 1]} : vector<2x8x512xf32> to vector<2x8x128xf32>
    "tpu.trace_start"() <{level = 10 : i32, message = "bnd,bmd->bnm"}> : () -> ()
    %cst_21 = arith.constant dense<0.000000e+00> : vector<2x8x8xf32>
    %56 = tpu.matmul %54, %55, %cst_21 {dimension_numbers = #tpu.dot_dimension_numbers<[2], [2], [1], [1], [0, 0, 0, 1, 1, 1], [0], [0]>} : vector<2x8x128xf32>, vector<2x8x128xf32>, vector<2x8x8xf32> -> vector<2x8x8xf32>
    "tpu.trace_stop"() : () -> ()
    %cst_22 = arith.constant dense<0xFF800000> : vector<2x8xf32>
    %57 = vector.multi_reduction <maximumf>, %56, %cst_22 [2] : vector<2x8x8xf32> to vector<2x8xf32>
    %58 = vector.shape_cast %57 : vector<2x8xf32> to vector<2x8x1xf32>
    %59 = vector.broadcast %58 : vector<2x8x1xf32> to vector<2x8x8xf32>
    %60 = arith.subf %56, %59 : vector<2x8x8xf32>
    %61 = math.exp %60 : vector<2x8x8xf32>
    %cst_23 = arith.constant dense<0.000000e+00> : vector<2x8xf32>
    %62 = vector.multi_reduction <add>, %61, %cst_23 [2] : vector<2x8x8xf32> to vector<2x8xf32>
    %63 = vector.shape_cast %62 : vector<2x8xf32> to vector<2x8x1xf32>
    %64 = tpu.reciprocal %63 {approx = true} : vector<2x8x1xf32> -> vector<2x8x1xf32>
    %65 = vector.broadcast %64 : vector<2x8x1xf32> to vector<2x8x8xf32>
    %66 = arith.mulf %61, %65 : vector<2x8x8xf32>
    %67 = vector.extract_strided_slice %14 {offsets = [0, 0, 256], sizes = [2, 8, 128], strides = [1, 1, 1]} : vector<2x8x512xf32> to vector<2x8x128xf32>
    "tpu.trace_start"() <{level = 10 : i32, message = "bnm,bmd->bnd"}> : () -> ()
    %cst_24 = arith.constant dense<0.000000e+00> : vector<2x8x128xf32>
    %68 = tpu.matmul %66, %67, %cst_24 {dimension_numbers = #tpu.dot_dimension_numbers<[2], [1], [1], [2], [0, 0, 0, 1, 1, 2], [0], [0]>} : vector<2x8x8xf32>, vector<2x8x128xf32>, vector<2x8x128xf32> -> vector<2x8x128xf32>
    "tpu.trace_stop"() : () -> ()
    %69 = vector.shape_cast %68 : vector<2x8x128xf32> to vector<16x128xf32>
    %c256 = arith.constant 256 : index
    %c0_25 = arith.constant 0 : index
    %70 = vector.load %arg4[%c256, %c0_25] : memref<512x512xf32, #tpu.memory_space<vmem>>, vector<128x512xf32>
    %cst_26 = arith.constant dense<0.000000e+00> : vector<16x512xf32>
    %71 = tpu.matmul %69, %70, %cst_26 {dimension_numbers = #tpu.dot_dimension_numbers<[1], [0], [0], [1], [0, 0, 1, 1], [], []>} : vector<16x128xf32>, vector<128x512xf32>, vector<16x512xf32> -> vector<16x512xf32>
    %72 = arith.addf %53, %71 : vector<16x512xf32>
    %73 = vector.extract_strided_slice %10 {offsets = [0, 0, 384], sizes = [2, 8, 128], strides = [1, 1, 1]} : vector<2x8x512xf32> to vector<2x8x128xf32>
    %74 = vector.extract_strided_slice %12 {offsets = [0, 0, 384], sizes = [2, 8, 128], strides = [1, 1, 1]} : vector<2x8x512xf32> to vector<2x8x128xf32>
    "tpu.trace_start"() <{level = 10 : i32, message = "bnd,bmd->bnm"}> : () -> ()
    %cst_27 = arith.constant dense<0.000000e+00> : vector<2x8x8xf32>
    %75 = tpu.matmul %73, %74, %cst_27 {dimension_numbers = #tpu.dot_dimension_numbers<[2], [2], [1], [1], [0, 0, 0, 1, 1, 1], [0], [0]>} : vector<2x8x128xf32>, vector<2x8x128xf32>, vector<2x8x8xf32> -> vector<2x8x8xf32>
    "tpu.trace_stop"() : () -> ()
    %cst_28 = arith.constant dense<0xFF800000> : vector<2x8xf32>
    %76 = vector.multi_reduction <maximumf>, %75, %cst_28 [2] : vector<2x8x8xf32> to vector<2x8xf32>
    %77 = vector.shape_cast %76 : vector<2x8xf32> to vector<2x8x1xf32>
    %78 = vector.broadcast %77 : vector<2x8x1xf32> to vector<2x8x8xf32>
    %79 = arith.subf %75, %78 : vector<2x8x8xf32>
    %80 = math.exp %79 : vector<2x8x8xf32>
    %cst_29 = arith.constant dense<0.000000e+00> : vector<2x8xf32>
    %81 = vector.multi_reduction <add>, %80, %cst_29 [2] : vector<2x8x8xf32> to vector<2x8xf32>
    %82 = vector.shape_cast %81 : vector<2x8xf32> to vector<2x8x1xf32>
    %83 = tpu.reciprocal %82 {approx = true} : vector<2x8x1xf32> -> vector<2x8x1xf32>
    %84 = vector.broadcast %83 : vector<2x8x1xf32> to vector<2x8x8xf32>
    %85 = arith.mulf %80, %84 : vector<2x8x8xf32>
    %86 = vector.extract_strided_slice %14 {offsets = [0, 0, 384], sizes = [2, 8, 128], strides = [1, 1, 1]} : vector<2x8x512xf32> to vector<2x8x128xf32>
    "tpu.trace_start"() <{level = 10 : i32, message = "bnm,bmd->bnd"}> : () -> ()
    %cst_30 = arith.constant dense<0.000000e+00> : vector<2x8x128xf32>
    %87 = tpu.matmul %85, %86, %cst_30 {dimension_numbers = #tpu.dot_dimension_numbers<[2], [1], [1], [2], [0, 0, 0, 1, 1, 2], [0], [0]>} : vector<2x8x8xf32>, vector<2x8x128xf32>, vector<2x8x128xf32> -> vector<2x8x128xf32>
    "tpu.trace_stop"() : () -> ()
    %88 = vector.shape_cast %87 : vector<2x8x128xf32> to vector<16x128xf32>
    %c384 = arith.constant 384 : index
    %c0_31 = arith.constant 0 : index
    %89 = vector.load %arg4[%c384, %c0_31] : memref<512x512xf32, #tpu.memory_space<vmem>>, vector<128x512xf32>
    %cst_32 = arith.constant dense<0.000000e+00> : vector<16x512xf32>
    %90 = tpu.matmul %88, %89, %cst_32 {dimension_numbers = #tpu.dot_dimension_numbers<[1], [0], [0], [1], [0, 0, 1, 1], [], []>} : vector<16x128xf32>, vector<128x512xf32>, vector<16x512xf32> -> vector<16x512xf32>
    %91 = arith.addf %72, %90 : vector<16x512xf32>
    %c0_33 = arith.constant 0 : index
    %c0_34 = arith.constant 0 : index
    %92 = vector.load %arg5[%c0_33, %c0_34] : memref<1x512xf32, #tpu.memory_space<vmem>>, vector<1x512xf32>
    %93 = vector.broadcast %92 : vector<1x512xf32> to vector<16x512xf32>
    %94 = arith.addf %91, %93 : vector<16x512xf32>
    %c0_35 = arith.constant 0 : index
    %c0_36 = arith.constant 0 : index
    %95 = vector.load %arg6[%c0_35, %c0_36] : memref<512x128xf32, #tpu.memory_space<vmem>>, vector<512x128xf32>
    %cst_37 = arith.constant dense<0.000000e+00> : vector<16x128xf32>
    %96 = tpu.matmul %94, %95, %cst_37 {dimension_numbers = #tpu.dot_dimension_numbers<[1], [0], [0], [1], [0, 0, 1, 1], [], []>} : vector<16x512xf32>, vector<512x128xf32>, vector<16x128xf32> -> vector<16x128xf32>
    %c0_38 = arith.constant 0 : index
    %c0_39 = arith.constant 0 : index
    %97 = vector.load %arg7[%c0_38, %c0_39] : memref<1x128xf32, #tpu.memory_space<vmem>>, vector<1x128xf32>
    %98 = vector.broadcast %97 : vector<1x128xf32> to vector<16x128xf32>
    %99 = arith.addf %96, %98 : vector<16x128xf32>
    %c0_40 = arith.constant 0 : index
    %c0_41 = arith.constant 0 : index
    %100 = vector.load %arg8[%c0_40, %c0_41] : memref<128x128xf32, #tpu.memory_space<vmem>>, vector<128x128xf32>
    %cst_42 = arith.constant dense<0.000000e+00> : vector<16x128xf32>
    %101 = tpu.matmul %99, %100, %cst_42 {dimension_numbers = #tpu.dot_dimension_numbers<[1], [0], [0], [1], [0, 0, 1, 1], [], []>} : vector<16x128xf32>, vector<128x128xf32>, vector<16x128xf32> -> vector<16x128xf32>
    %c0_43 = arith.constant 0 : index
    %c0_44 = arith.constant 0 : index
    %102 = vector.load %arg9[%c0_43, %c0_44] : memref<1x128xf32, #tpu.memory_space<vmem>>, vector<1x128xf32>
    %103 = vector.broadcast %102 : vector<1x128xf32> to vector<16x128xf32>
    %104 = arith.addf %101, %103 : vector<16x128xf32>
    %cst_45 = arith.constant 0.000000e+00 : f32
    %105 = vector.broadcast %cst_45 : f32 to vector<16x128xf32>
    %106 = arith.maximumf %104, %105 : vector<16x128xf32>
    %107 = vector.shape_cast %99 : vector<16x128xf32> to vector<2x8x128xf32>
    %108 = vector.shape_cast %106 : vector<16x128xf32> to vector<2x8x128xf32>
    %c0_46 = arith.constant 0 : index
    %c0_47 = arith.constant 0 : index
    %109 = vector.load %arg10[%c0_46, %c0_47] : memref<1x128xf32, #tpu.memory_space<vmem>>, vector<1x128xf32>
    %110 = vector.shape_cast %109 : vector<1x128xf32> to vector<1x1x128xf32>
    %111 = vector.broadcast %110 : vector<1x1x128xf32> to vector<2x8x128xf32>
    %112 = arith.mulf %108, %111 : vector<2x8x128xf32>
    %cst_48 = arith.constant dense<0.000000e+00> : vector<2x8xf32>
    %113 = vector.multi_reduction <add>, %112, %cst_48 [2] : vector<2x8x128xf32> to vector<2x8xf32>
    %114 = vector.shape_cast %113 : vector<2x8xf32> to vector<2x8x1xf32>
    %115 = vector.shape_cast %114 : vector<2x8x1xf32> to vector<2x8xf32>
    %cst_49 = arith.constant dense<0xFF800000> : vector<2xf32>
    %116 = vector.multi_reduction <maximumf>, %115, %cst_49 [1] : vector<2x8xf32> to vector<2xf32>
    %117 = vector.shape_cast %116 : vector<2xf32> to vector<2x1xf32>
    %118 = vector.broadcast %117 : vector<2x1xf32> to vector<2x8xf32>
    %119 = arith.subf %115, %118 : vector<2x8xf32>
    %120 = math.exp %119 : vector<2x8xf32>
    %cst_50 = arith.constant dense<0.000000e+00> : vector<2xf32>
    %121 = vector.multi_reduction <add>, %120, %cst_50 [1] : vector<2x8xf32> to vector<2xf32>
    %122 = vector.shape_cast %121 : vector<2xf32> to vector<2x1xf32>
    %123 = tpu.reciprocal %122 {approx = true} : vector<2x1xf32> -> vector<2x1xf32>
    %124 = vector.broadcast %123 : vector<2x1xf32> to vector<2x8xf32>
    %125 = arith.mulf %120, %124 : vector<2x8xf32>
    %126 = vector.shape_cast %125 : vector<2x8xf32> to vector<2x8x1xf32>
    %127 = vector.broadcast %126 : vector<2x8x1xf32> to vector<2x8x128xf32>
    %128 = arith.mulf %107, %127 : vector<2x8x128xf32>
    %cst_51 = arith.constant dense<0.000000e+00> : vector<2x128xf32>
    %129 = vector.multi_reduction <add>, %128, %cst_51 [1] : vector<2x8x128xf32> to vector<2x128xf32>
    %c0_52 = arith.constant 0 : index
    %c0_53 = arith.constant 0 : index
    %130 = vector.load %arg11[%c0_52, %c0_53] : memref<128x10xf32, #tpu.memory_space<vmem>>, vector<128x10xf32>
    %cst_54 = arith.constant dense<0.000000e+00> : vector<2x10xf32>
    %131 = tpu.matmul %129, %130, %cst_54 {dimension_numbers = #tpu.dot_dimension_numbers<[1], [0], [0], [1], [0, 0, 1, 1], [], []>} : vector<2x128xf32>, vector<128x10xf32>, vector<2x10xf32> -> vector<2x10xf32>
    %c0_55 = arith.constant 0 : index
    %c0_56 = arith.constant 0 : index
    %132 = vector.load %arg15[%c0_55, %c0_56] : memref<2x1xf32, #tpu.memory_space<vmem>>, vector<2x1xf32>
    %c0_57 = arith.constant 0 : index
    %c0_58 = arith.constant 0 : index
    %133 = vector.load %arg12[%c0_57, %c0_58] : memref<1x10xf32, #tpu.memory_space<vmem>>, vector<1x10xf32>
    %134 = vector.broadcast %132 : vector<2x1xf32> to vector<2x10xf32>
    %135 = vector.broadcast %133 : vector<1x10xf32> to vector<2x10xf32>
    %136 = arith.mulf %134, %135 : vector<2x10xf32>
    %137 = arith.addf %131, %136 : vector<2x10xf32>
    %c0_59 = arith.constant 0 : index
    %c0_60 = arith.constant 0 : index
    %138 = vector.load %arg16[%c0_59, %c0_60] : memref<2x1xf32, #tpu.memory_space<vmem>>, vector<2x1xf32>
    %c0_61 = arith.constant 0 : index
    %c0_62 = arith.constant 0 : index
    %139 = vector.load %arg13[%c0_61, %c0_62] : memref<1x10xf32, #tpu.memory_space<vmem>>, vector<1x10xf32>
    %140 = vector.broadcast %138 : vector<2x1xf32> to vector<2x10xf32>
    %141 = vector.broadcast %139 : vector<1x10xf32> to vector<2x10xf32>
    %142 = arith.mulf %140, %141 : vector<2x10xf32>
    %143 = arith.addf %137, %142 : vector<2x10xf32>
    %c0_63 = arith.constant 0 : index
    %c0_64 = arith.constant 0 : index
    %144 = vector.load %arg14[%c0_63, %c0_64] : memref<1x10xf32, #tpu.memory_space<vmem>>, vector<1x10xf32>
    %145 = vector.broadcast %144 : vector<1x10xf32> to vector<2x10xf32>
    %146 = arith.addf %143, %145 : vector<2x10xf32>
    %c0_65 = arith.constant 0 : index
    %c0_66 = arith.constant 0 : index
    %147 = vector.load %arg17[%c0_65, %c0_66] : memref<2x10xf32, #tpu.memory_space<vmem>>, vector<2x10xf32>
    tpu.vector_store %arg17[%c0_65, %c0_66], %146 {strides = array<i32>} : memref<2x10xf32, #tpu.memory_space<vmem>>, vector<2x10xf32>,
    %c0_67 = arith.constant 0 : index
    %c0_68 = arith.constant 0 : index
    %148 = vector.load %arg18[%c0_67, %c0_68] : memref<2x128xf32, #tpu.memory_space<vmem>>, vector<2x128xf32>
    tpu.vector_store %arg18[%c0_67, %c0_68], %129 {strides = array<i32>} : memref<2x128xf32, #tpu.memory_space<vmem>>, vector<2x128xf32>,
    %c0_69 = arith.constant 0 : index
    %c0_70 = arith.constant 0 : index
    %149 = vector.load %arg19[%c0_69, %c0_70] : memref<2x8xf32, #tpu.memory_space<vmem>>, vector<2x8xf32>
    tpu.vector_store %arg19[%c0_69, %c0_70], %125 {strides = array<i32>} : memref<2x8xf32, #tpu.memory_space<vmem>>, vector<2x8xf32>,
    return
  }
  func.func @transform_0(%arg0: i32) -> (i32, i32, i32) {
    %c0_i32 = arith.constant 0 : i32
    %c0_i32_0 = arith.constant 0 : i32
    %c0_i32_1 = arith.constant 0 : i32
    return %arg0, %c0_i32, %c0_i32_0 : i32, i32, i32
  }
  func.func @transform_1(%arg0: i32) -> (i32, i32) {
    %c0_i32 = arith.constant 0 : i32
    %c0_i32_0 = arith.constant 0 : i32
    %c0_i32_1 = arith.constant 0 : i32
    return %c0_i32, %c0_i32_0 : i32, i32
  }
  func.func @transform_2(%arg0: i32) -> (i32, i32) {
    %c0_i32 = arith.constant 0 : i32
    %c0_i32_0 = arith.constant 0 : i32
    %c0_i32_1 = arith.constant 0 : i32
    return %c0_i32, %c0_i32_0 : i32, i32
  }
  func.func @transform_3(%arg0: i32) -> (i32, i32) {
    %c0_i32 = arith.constant 0 : i32
    %c0_i32_0 = arith.constant 0 : i32
    %c0_i32_1 = arith.constant 0 : i32
    return %c0_i32, %c0_i32_0 : i32, i32
  }
  func.func @transform_4(%arg0: i32) -> (i32, i32) {
    %c0_i32 = arith.constant 0 : i32
    %c0_i32_0 = arith.constant 0 : i32
    %c0_i32_1 = arith.constant 0 : i32
    return %c0_i32, %c0_i32_0 : i32, i32
  }
  func.func @transform_5(%arg0: i32) -> (i32, i32) {
    %c0_i32 = arith.constant 0 : i32
    %c0_i32_0 = arith.constant 0 : i32
    %c0_i32_1 = arith.constant 0 : i32
    return %c0_i32, %c0_i32_0 : i32, i32
  }
  func.func @transform_6(%arg0: i32) -> (i32, i32) {
    %c0_i32 = arith.constant 0 : i32
    %c0_i32_0 = arith.constant 0 : i32
    %c0_i32_1 = arith.constant 0 : i32
    return %c0_i32, %c0_i32_0 : i32, i32
  }
  func.func @transform_7(%arg0: i32) -> (i32, i32) {
    %c0_i32 = arith.constant 0 : i32
    %c0_i32_0 = arith.constant 0 : i32
    %c0_i32_1 = arith.constant 0 : i32
    return %c0_i32, %c0_i32_0 : i32, i32
  }
  func.func @transform_8(%arg0: i32) -> (i32, i32) {
    %c0_i32 = arith.constant 0 : i32
    %c0_i32_0 = arith.constant 0 : i32
    %c0_i32_1 = arith.constant 0 : i32
    return %c0_i32, %c0_i32_0 : i32, i32
  }
  func.func @transform_9(%arg0: i32) -> (i32, i32) {
    %c0_i32 = arith.constant 0 : i32
    %c0_i32_0 = arith.constant 0 : i32
    %c0_i32_1 = arith.constant 0 : i32
    return %c0_i32, %c0_i32_0 : i32, i32
  }
  func.func @transform_10(%arg0: i32) -> (i32, i32) {
    %c0_i32 = arith.constant 0 : i32
    %c0_i32_0 = arith.constant 0 : i32
    %c0_i32_1 = arith.constant 0 : i32
    return %c0_i32, %c0_i32_0 : i32, i32
  }
  func.func @transform_11(%arg0: i32) -> (i32, i32) {
    %c0_i32 = arith.constant 0 : i32
    %c0_i32_0 = arith.constant 0 : i32
    %c0_i32_1 = arith.constant 0 : i32
    return %c0_i32, %c0_i32_0 : i32, i32
  }
  func.func @transform_12(%arg0: i32) -> (i32, i32) {
    %c0_i32 = arith.constant 0 : i32
    %c0_i32_0 = arith.constant 0 : i32
    %c0_i32_1 = arith.constant 0 : i32
    return %c0_i32, %c0_i32_0 : i32, i32
  }
  func.func @transform_13(%arg0: i32) -> (i32, i32) {
    %c0_i32 = arith.constant 0 : i32
    %c0_i32_0 = arith.constant 0 : i32
    %c0_i32_1 = arith.constant 0 : i32
    return %c0_i32, %c0_i32_0 : i32, i32
  }
  func.func @transform_14(%arg0: i32) -> (i32, i32) {
    %c0_i32 = arith.constant 0 : i32
    %c0_i32_0 = arith.constant 0 : i32
    return %arg0, %c0_i32 : i32, i32
  }
  func.func @transform_15(%arg0: i32) -> (i32, i32) {
    %c0_i32 = arith.constant 0 : i32
    %c0_i32_0 = arith.constant 0 : i32
    return %arg0, %c0_i32 : i32, i32
  }
  func.func @transform_16(%arg0: i32) -> (i32, i32) {
    %c0_i32 = arith.constant 0 : i32
    %c0_i32_0 = arith.constant 0 : i32
    return %arg0, %c0_i32 : i32, i32
  }
  func.func @transform_17(%arg0: i32) -> (i32, i32) {
    %c0_i32 = arith.constant 0 : i32
    %c0_i32_0 = arith.constant 0 : i32
    return %arg0, %c0_i32 : i32, i32
  }
  func.func @transform_18(%arg0: i32) -> (i32, i32) {
    %c0_i32 = arith.constant 0 : i32
    %c0_i32_0 = arith.constant 0 : i32
    return %arg0, %c0_i32 : i32, i32
  }
}

</mosaic_0001>

<bundles_post_ra>
// kernel: tpu_custom_call.1
= control target key start
LH: loop header
LB: loop body
LE: loop exit
PB: predicated region body
PF: predicated region fallthrough
CT: control target
= control target key end

     0   :  { %s6107_s0 = inlined_call_operand.hbm [shape: f32[2,8,512], index: 0, kind: input, shape index: {}]   ;;  %s6108_s1 = inlined_call_operand.hbm [shape: f32[512,1536], index: 1, kind: input, shape index: {}]   ;;  %s6109_s2 = inlined_call_operand.hbm [shape: f32[1,1536], index: 2, kind: input, shape index: {}]   ;;  %s6110_s3 = inlined_call_operand.hbm [shape: f32[512,512], index: 3, kind: input, shape index: {}]   ;;  %s6111_s4 = inlined_call_operand.hbm [shape: f32[1,512], index: 4, kind: input, shape index: {}]   ;;  %s6112_s5 = inlined_call_operand.hbm [shape: f32[512,128], index: 5, kind: input, shape index: {}]   ;;  %s6113_s6 = inlined_call_operand.hbm [shape: f32[1,128], index: 6, kind: input, shape index: {}]   ;;  %s6114_s7 = inlined_call_operand.hbm [shape: f32[128,128], index: 7, kind: input, shape index: {}]   ;;  %s6115_s8 = inlined_call_operand.hbm [shape: f32[1,128], index: 8, kind: input, shape index: {}]   ;;  %s6116_s9 = inlined_call_operand.hbm [shape: f32[1,128], index: 9, kind: input, shape index: {}]   ;;  %s6117_s10 = inlined_call_operand.vmem [shape: f32[128,10], index: 10, kind: input, shape index: {}]   ;;  %s6118_s11 = inlined_call_operand.hbm [shape: f32[1,10], index: 11, kind: input, shape index: {}]   ;;  %s6119_s12 = inlined_call_operand.hbm [shape: f32[1,10], index: 12, kind: input, shape index: {}]   ;;  %s6120_s13 = inlined_call_operand.hbm [shape: f32[1,10], index: 13, kind: input, shape index: {}]   ;;  %s6121_s14 = inlined_call_operand.vmem [shape: f32[2,1], index: 14, kind: input, shape index: {}]   ;;  %s6122_s15 = inlined_call_operand.vmem [shape: f32[2,1], index: 15, kind: input, shape index: {}]   ;;  %s6123_s16 = inlined_call_operand.hbm [shape: f32[2,10], index: 16, kind: output, shape index: {0}]   ;;  %s6124_s17 = inlined_call_operand.hbm [shape: f32[2,128], index: 17, kind: output, shape index: {1}]   ;;  %s6125_s18 = inlined_call_operand.hbm [shape: f32[2,8], index: 18, kind: output, shape index: {2}]  }
   0x1   :  { %6126 = sst [smem:[#allocation36_spill]] %s6107_s0 }
   0x2   :  { %6127 = sst [smem:[#allocation37_spill]] %s6108_s1 }
   0x3   :  { %6128 = sst [smem:[#allocation38_spill]] %s6109_s2 }
   0x4   :  { %24 = vsyncpa [#allocation3], 0 }
   0x5   :  { %25 = vsyncpa [#allocation6], 0 }
   0x6   :  { %26 = vsyncpa [#allocation9], 0 }
   0x7   :  { %27 = vsyncpa [#allocation12], 0 }
   0x8   :  { %28 = vsyncpa [#allocation15], 0 }
   0x9   :  { %29 = vsyncpa [#allocation18], 0 }
   0xa   :  { %30 = vsyncpa [#allocation21], 0 }
   0xb   :  { %31 = vsyncpa [#allocation4], 0 }
   0xc   :  { %32 = vsyncpa [#allocation25], 0  ;;  %s5482_s27 = smov [#allocation5]  }
   0xd   :  { %s50_s28 = sshll.u32 %s5482_s27, 4  ;;  %s51_s28 = int_to_ptr.vmem [resolvable:$true] %s50_s28 }
   0xe   :  { %s5152_s29 = scalar_lea.vmem %s51_s28, 98304  ;;  %p5157_p1 = scmp.lt.s32.totalorder %s51_s28, %s51_s28 }
   0xf   :  { %p5153_p0 = scmp.ne.s32.totalorder %s51_s28, %s5152_s29  ;;  %p5158_p2 = scmp.lt.s32.totalorder %s5152_s29, %s5152_s29 }
  0x11   :  { %p5159_p3 = por %p5158_p2, %p5157_p1 }
  0x13   :  { %p5160_p4 = pnand %p5159_p3, %p5153_p0 }
  0x15   :  { %5163 = shalt.err (!%p5160_p4)
}
  0x16   :  { %s5483_s30 = smov 1536   ;;  %s5484_s0 = smov 96  }
  0x17   :  { %s6129_s20 = sld [smem:[#allocation37_spill]]  ;;  %s5485_s21 = smov [#allocation8]  }
  0x18   :  { %s72_s22 = sshll.u32 %s5485_s21, 4  ;;  %s5486_s2 = smov [#allocation11]   ;;  %s73_s22 = int_to_ptr.vmem [resolvable:$true] %s72_s22 }
  0x19   :  { %s94_s23 = sshll.u32 %s5486_s2, 4  ;;  %s5172_s24 = scalar_lea.vmem %s73_s22, 32768  ;;  %s95_s23 = int_to_ptr.vmem [resolvable:$true] %s94_s23 }
  0x1a   :  { %p5173_p5 = scmp.ne.s32.totalorder %s73_s22, %s5172_s24  ;;  %p5177_p6 = scmp.lt.s32.totalorder %s73_s22, %s73_s22 }
  0x1b   :  { %p5178_p7 = scmp.lt.s32.totalorder %s5172_s24, %s5172_s24 }
  0x1d   :  { %56 = dma.hbm_to_vmem [thread:$0]  %s6129_s20, 98304, %s51_s28, [#allocation6], %s5483_s30, %s5483_s30, %s5484_s0  }
  0x1e   :  { %p5179_p8 = por %p5178_p7, %p5177_p6 }
  0x20   :  { %p5180_p9 = pnand %p5179_p8, %p5173_p5 }
  0x22   :  { %5183 = shalt.err (!%p5180_p9)
}
  0x23   :  { %s5487_s25 = smov 512   ;;  %s5488_s26 = smov 32  }
  0x24   :  { %78 = dma.hbm_to_vmem [thread:$0]  %s6110_s3, 32768, %s73_s22, [#allocation9], %s5487_s25, %s5487_s25, %s5488_s26  }
  0x25   :  { %s5192_s28 = scalar_lea.vmem %s95_s23, 8192  ;;  %p5197_p11 = scmp.lt.s32.totalorder %s95_s23, %s95_s23 }
  0x26   :  { %p5193_p10 = scmp.ne.s32.totalorder %s95_s23, %s5192_s28  ;;  %p5198_p12 = scmp.lt.s32.totalorder %s5192_s28, %s5192_s28 }
  0x28   :  { %p5199_p13 = por %p5198_p12, %p5197_p11 }
  0x2a   :  { %p5200_p0 = pnand %p5199_p13, %p5193_p10 }
  0x2c   :  { %5203 = shalt.err (!%p5200_p0)
}
  0x2d   :  { %s5489_s30 = smov 128   ;;  %s5490_s0 = smov 8  }
  0x2e   :  { %100 = dma.hbm_to_vmem [thread:$0]  %s6112_s5, 8192, %s95_s23, [#allocation12], %s5489_s30, %s5489_s30, %s5490_s0  }
  0x2f   :  { %s5491_s20 = smov [#allocation14]   ;;  %s5492_s2 = smov [#allocation17]  }
  0x30   :  { %s116_s21 = sshll.u32 %s5491_s20, 4  ;;  %s139_s24 = sshll.u32 %s5492_s2, 4  ;;  %s117_s21 = int_to_ptr.vmem [resolvable:$true] %s116_s21  ;;  %s140_s24 = int_to_ptr.vmem [resolvable:$true] %s139_s24 }
  0x31   :  { %s5212_s3 = scalar_lea.vmem %s117_s21, 2048  ;;  %p5217_p2 = scmp.lt.s32.totalorder %s117_s21, %s117_s21 }
  0x32   :  { %p5213_p1 = scmp.ne.s32.totalorder %s117_s21, %s5212_s3  ;;  %p5218_p3 = scmp.lt.s32.totalorder %s5212_s3, %s5212_s3 }
  0x34   :  { %p5219_p4 = por %p5218_p3, %p5217_p2 }
  0x36   :  { %p5220_p5 = pnand %p5219_p4, %p5213_p1 }
  0x38   :  { %5223 = shalt.err (!%p5220_p5)
}
  0x39   :  { %122 = dma.hbm_to_vmem [thread:$0]  %s6114_s7, 2048, %s117_s21, [#allocation15], %s5489_s30, %s5489_s30, %s5490_s0  }
  0x3a   :  { %s5232_s29 = scalar_lea.vmem %s140_s24, 16  ;;  %s5236_s5 = scalar_lea.vmem %s140_s24, 32 }
  0x3b   :  { %p5233_p6 = scmp.ne.s32.totalorder %s140_s24, %s5232_s29  ;;  %p5237_p7 = scmp.lt.s32.totalorder %s140_s24, %s140_s24 }
  0x3c   :  { %p5238_p8 = scmp.lt.s32.totalorder %s5236_s5, %s5232_s29 }
  0x3e   :  { %p5239_p9 = por %p5238_p8, %p5237_p7 }
  0x40   :  { %p5240_p10 = pnand %p5239_p9, %p5233_p6 }
  0x42   :  { %5243 = shalt.err (!%p5240_p10)
}
  0x43   :  { %142 = dma.hbm_to_vmem [thread:$0]  %s6116_s9, 16, %s140_s24, [#allocation18]  }
  0x44   :  { %s5493_s19 = smov [#allocation20]   ;;  %s5494_s20 = smov [#allocation2]  }
  0x45   :  { %s161_s1 = sshll.u32 %s5493_s19, 4  ;;  %s38_s2 = sshll.u32 %s5494_s20, 4  ;;  %s162_s1 = int_to_ptr.vmem [resolvable:$true] %s161_s1  ;;  %s39_s2 = int_to_ptr.vmem [resolvable:$true] %s38_s2 }
  0x46   :  { %s5252_s3 = scalar_lea.vmem %s162_s1, 16  ;;  %s5256_s7 = scalar_lea.vmem %s162_s1, 32 }
  0x47   :  { %p5253_p11 = scmp.ne.s32.totalorder %s162_s1, %s5252_s3  ;;  %p5257_p12 = scmp.lt.s32.totalorder %s162_s1, %s162_s1 }
  0x48   :  { %p5258_p13 = scmp.lt.s32.totalorder %s5256_s7, %s5252_s3 }
  0x4a   :  { %p5259_p0 = por %p5258_p13, %p5257_p12 }
  0x4c   :  { %p5260_p1 = pnand %p5259_p0, %p5253_p11 }
  0x4e   :  { %5263 = shalt.err (!%p5260_p1)
}
  0x4f   :  { %164 = dma.hbm_to_vmem [thread:$0]  %s6119_s12, 16, %s162_s1, [#allocation21]  }
  0x50   :  { %s5272_s21 = scalar_lea.vmem %s39_s2, 1024  ;;  %p5277_p3 = scmp.lt.s32.totalorder %s39_s2, %s39_s2 }
  0x51   :  { %p5273_p2 = scmp.ne.s32.totalorder %s39_s2, %s5272_s21  ;;  %p5278_p4 = scmp.lt.s32.totalorder %s5272_s21, %s5272_s21 }
  0x53   :  { %p5279_p5 = por %p5278_p4, %p5277_p3 }
  0x55   :  { %p5280_p6 = pnand %p5279_p5, %p5273_p2 }
  0x57   :  { %5283 = shalt.err (!%p5280_p6)
}
  0x58   :  { %s6130_s22 = sld [smem:[#allocation36_spill]]  ;;  %s5495_s27 = smov [#allocation7]  }
  0x59   :  { %s63_s29 = sshll.u32 %s5495_s27, 4  ;;  %s5496_s5 = smov [#allocation10]   ;;  %s64_s29 = int_to_ptr.vmem [resolvable:$true] %s63_s29 }
  0x5a   :  { %s85_s12 = sshll.u32 %s5496_s5, 4  ;;  %s5292_s23 = scalar_lea.vmem %s64_s29, 192  ;;  %s86_s12 = int_to_ptr.vmem [resolvable:$true] %s85_s12 }
  0x5b   :  { %p5293_p7 = scmp.ne.s32.totalorder %s64_s29, %s5292_s23  ;;  %p5297_p8 = scmp.lt.s32.totalorder %s64_s29, %s64_s29 }
  0x5c   :  { %p5298_p9 = scmp.lt.s32.totalorder %s5292_s23, %s5292_s23 }
  0x5e   :  { %44 = dma.hbm_to_vmem [thread:$0]  %s6130_s22, 1024, %s39_s2, [#allocation3], %s5487_s25, %s5487_s25, %s5488_s26  }
  0x5f   :  { %p5299_p10 = por %p5298_p9, %p5297_p8 }
  0x61   :  { %p5300_p11 = pnand %p5299_p10, %p5293_p7 }
  0x63   :  { %5303 = shalt.err (!%p5300_p11)
}
  0x64   :  { %s6131_s1 = sld [smem:[#allocation38_spill]]  ;;  %s5312_s20 = scalar_lea.vmem %s86_s12, 64 }
  0x65   :  { %p5313_p12 = scmp.ne.s32.totalorder %s86_s12, %s5312_s20  ;;  %p5317_p13 = scmp.lt.s32.totalorder %s86_s12, %s86_s12 }
  0x66   :  { %p5318_p0 = scmp.lt.s32.totalorder %s5312_s20, %s5312_s20 }
  0x68   :  { %p5319_p1 = por %p5318_p0, %p5317_p13 }
  0x6a   :  { %66 = dma.hbm_to_vmem [thread:$0]  %s6131_s1, 192, %s64_s29, [#allocation6]  }
  0x6b   :  { %p5320_p2 = pnand %p5319_p1, %p5313_p12 }
  0x6d   :  { %5323 = shalt.err (!%p5320_p2)
}
  0x6e   :  { %88 = dma.hbm_to_vmem [thread:$0]  %s6111_s4, 64, %s86_s12, [#allocation9]  }
  0x6f   :  { %s5497_s2 = smov [#allocation13]   ;;  %s5498_s7 = smov [#allocation16]  }
  0x70   :  { %s107_s3 = sshll.u32 %s5497_s2, 4  ;;  %s129_s30 = sshll.u32 %s5498_s7, 4  ;;  %s108_s3 = int_to_ptr.vmem [resolvable:$true] %s107_s3  ;;  %s130_s30 = int_to_ptr.vmem [resolvable:$true] %s129_s30 }
  0x71   :  { %s5332_s0 = scalar_lea.vmem %s108_s3, 16  ;;  %s5336_s21 = scalar_lea.vmem %s108_s3, 32 }
  0x72   :  { %p5333_p3 = scmp.ne.s32.totalorder %s108_s3, %s5332_s0  ;;  %p5337_p4 = scmp.lt.s32.totalorder %s108_s3, %s108_s3 }
  0x73   :  { %p5338_p5 = scmp.lt.s32.totalorder %s5336_s21, %s5332_s0 }
  0x75   :  { %p5339_p6 = por %p5338_p5, %p5337_p4 }
  0x77   :  { %p5340_p7 = pnand %p5339_p6, %p5333_p3 }
  0x79   :  { %5343 = shalt.err (!%p5340_p7)
}
  0x7a   :  { %110 = dma.hbm_to_vmem [thread:$0]  %s6113_s6, 16, %s108_s3, [#allocation12]  }
  0x7b   :  { %s5352_s22 = scalar_lea.vmem %s130_s30, 16  ;;  %s5356_s4 = scalar_lea.vmem %s130_s30, 32 }
  0x7c   :  { %p5353_p8 = scmp.ne.s32.totalorder %s130_s30, %s5352_s22  ;;  %p5357_p9 = scmp.lt.s32.totalorder %s130_s30, %s130_s30 }
  0x7d   :  { %p5358_p10 = scmp.lt.s32.totalorder %s5356_s4, %s5352_s22 }
  0x7f   :  { %p5359_p11 = por %p5358_p10, %p5357_p9 }
  0x81   :  { %p5360_p12 = pnand %p5359_p11, %p5353_p8 }
  0x83   :  { %5363 = shalt.err (!%p5360_p12)
}
  0x84   :  { %132 = dma.hbm_to_vmem [thread:$0]  %s6115_s8, 16, %s130_s30, [#allocation15]  }
  0x85   :  { %s5499_s5 = smov [#allocation19]   ;;  %s5500_s23 = smov [#allocation22]  }
  0x86   :  { %s151_s12 = sshll.u32 %s5499_s5, 4  ;;  %s171_s28 = sshll.u32 %s5500_s23, 4  ;;  %s152_s12 = int_to_ptr.vmem [resolvable:$true] %s151_s12  ;;  %s172_s28 = int_to_ptr.vmem [resolvable:$true] %s171_s28 }
  0x87   :  { %s5372_s19 = scalar_lea.vmem %s152_s12, 16  ;;  %s5376_s6 = scalar_lea.vmem %s152_s12, 32 }
  0x88   :  { %p5373_p13 = scmp.ne.s32.totalorder %s152_s12, %s5372_s19  ;;  %p5377_p0 = scmp.lt.s32.totalorder %s152_s12, %s152_s12 }
  0x89   :  { %p5378_p1 = scmp.lt.s32.totalorder %s5376_s6, %s5372_s19 }
  0x8b   :  { %p5379_p2 = por %p5378_p1, %p5377_p0 }
  0x8d   :  { %p5380_p3 = pnand %p5379_p2, %p5373_p13 }
  0x8f   :  { %5383 = shalt.err (!%p5380_p3)
}
  0x90   :  { %154 = dma.hbm_to_vmem [thread:$0]  %s6118_s11, 16, %s152_s12, [#allocation18]  }
  0x91   :  { %s5392_s25 = scalar_lea.vmem %s172_s28, 16  ;;  %s5396_s8 = scalar_lea.vmem %s172_s28, 32 }
  0x92   :  { %p5393_p4 = scmp.ne.s32.totalorder %s172_s28, %s5392_s25  ;;  %p5397_p5 = scmp.lt.s32.totalorder %s172_s28, %s172_s28 }
  0x93   :  { %p5398_p6 = scmp.lt.s32.totalorder %s5396_s8, %s5392_s25 }
  0x95   :  { %p5399_p7 = por %p5398_p6, %p5397_p5 }
  0x97   :  { %p5400_p8 = pnand %p5399_p7, %p5393_p4 }
  0x99   :  { %5403 = shalt.err (!%p5400_p8)
}
  0x9a   :  { %174 = dma.hbm_to_vmem [thread:$0]  %s6120_s13, 16, %s172_s28, [#allocation21]  }
  0x9b   :  { %5464 = dma.done.wait [#allocation3], 1024  }
  0x9c   :  { %5465 = vsyncadd [#allocation3], 4294966272 }
  0x9d   :  { %5466 = dma.done.wait [#allocation6], 98496  }
  0x9e   :  { %5467 = vsyncadd [#allocation6], 4294868800 }
  0x9f   :  { %5468 = dma.done.wait [#allocation9], 32832  }
  0xa0   :  { %5469 = vsyncadd [#allocation9], 4294934464 }
  0xa1   :  { %5470 = dma.done.wait [#allocation12], 8208  }
  0xa2   :  { %5471 = vsyncadd [#allocation12], 4294959088 }
  0xa3   :  { %5472 = dma.done.wait [#allocation15], 2064  }
  0xa4   :  { %5473 = vsyncadd [#allocation15], 4294965232 }
  0xa5   :  { %5474 = dma.done.wait [#allocation18], 32  }
  0xa6   :  { %5475 = vsyncadd [#allocation18], 4294967264 }
  0xa7   :  { %5476 = dma.done.wait [#allocation21], 32  }
  0xa8   :  { %5477 = vsyncadd [#allocation21], 4294967264  ;;  %v407_v0 = vld [vmem:[#allocation5 + $0x5a8] sm:$0xff]  ;;  %v406_v2 = vld [vmem:[#allocation5 + $0x5a0] sm:$0xff]  ;;  %vm5502_vm0 = vmmov 0   ;;  %vm2130_vm1 = vcmask 64512  }
  0xa9   :  { %v791_v1 = vld [vmem:[#allocation5 + $0x11a8] sm:$0xff]  ;;  %1058 = vmatprep.subr.mxu0 %v407_v0  ;;  %v790_v3 = vld [vmem:[#allocation5 + $0x11a0] sm:$0xff]  ;;  %vm4487_vm2 = vcmask 1041409   ;;  %vm4490_vm3 = vcmask 58368  }
  0xaa   :  { %1135 = vmatprep.subr.mxu1 %v791_v1  ;;  %v395_v4 = vld [vmem:[#allocation5 + $0x548] sm:$0xff]  ;;  %1059 = vmatpush1.msra.mxu0 %v406_v2  ;;  %v394_v6 = vld [vmem:[#allocation5 + $0x540] sm:$0xff] }
  0xab   :  { %v779_v5 = vld [vmem:[#allocation5 + $0x1148] sm:$0xff]  ;;  %1136 = vmatpush1.msra.mxu1 %v790_v3  ;;  %v778_v7 = vld [vmem:[#allocation5 + $0x1140] sm:$0xff]  ;;  %1060 = vmatprep.subr.mxu0 %v395_v4 }
  0xac   :  { %v383_v8 = vld [vmem:[#allocation5 + $0x4e8] sm:$0xff]  ;;  %1137 = vmatprep.subr.mxu1 %v779_v5  ;;  %v382_v10 = vld [vmem:[#allocation5 + $0x4e0] sm:$0xff]  ;;  %1061 = vmatpush1.msra.mxu0 %v394_v6 }
  0xad   :  { %v767_v9 = vld [vmem:[#allocation5 + $0x10e8] sm:$0xff]  ;;  %v766_v11 = vld [vmem:[#allocation5 + $0x10e0] sm:$0xff]  ;;  %1138 = vmatpush1.msra.mxu1 %v778_v7  ;;  %1062 = vmatprep.subr.mxu0 %v383_v8 }
  0xae   :  { %v371_v12 = vld [vmem:[#allocation5 + $0x488] sm:$0xff]  ;;  %1139 = vmatprep.subr.mxu1 %v767_v9  ;;  %v370_v14 = vld [vmem:[#allocation5 + $0x480] sm:$0xff]  ;;  %1063 = vmatpush1.msra.mxu0 %v382_v10 }
  0xaf   :  { %v755_v13 = vld [vmem:[#allocation5 + $0x1088] sm:$0xff]  ;;  %v754_v15 = vld [vmem:[#allocation5 + $0x1080] sm:$0xff]  ;;  %1140 = vmatpush1.msra.mxu1 %v766_v11  ;;  %1064 = vmatprep.subr.mxu0 %v371_v12 }
  0xb0   :  { %v359_v16 = vld [vmem:[#allocation5 + $0x428] sm:$0xff]  ;;  %1141 = vmatprep.subr.mxu1 %v755_v13  ;;  %v358_v18 = vld [vmem:[#allocation5 + $0x420] sm:$0xff]  ;;  %1065 = vmatpush1.msra.mxu0 %v370_v14 }
  0xb1   :  { %v743_v17 = vld [vmem:[#allocation5 + $0x1028] sm:$0xff]  ;;  %v742_v19 = vld [vmem:[#allocation5 + $0x1020] sm:$0xff]  ;;  %1142 = vmatpush1.msra.mxu1 %v754_v15  ;;  %1066 = vmatprep.subr.mxu0 %v359_v16 }
  0xb2   :  { %v347_v20 = vld [vmem:[#allocation5 + $0x3c8] sm:$0xff]  ;;  %1143 = vmatprep.subr.mxu1 %v743_v17  ;;  %v346_v22 = vld [vmem:[#allocation5 + $0x3c0] sm:$0xff]  ;;  %1067 = vmatpush1.msra.mxu0 %v358_v18 }
  0xb3   :  { %v731_v21 = vld [vmem:[#allocation5 + $0xfc8] sm:$0xff]  ;;  %v730_v23 = vld [vmem:[#allocation5 + $0xfc0] sm:$0xff]  ;;  %1144 = vmatpush1.msra.mxu1 %v742_v19  ;;  %1068 = vmatprep.subr.mxu0 %v347_v20 }
  0xb4   :  { %v335_v24 = vld [vmem:[#allocation5 + $0x368] sm:$0xff]  ;;  %1145 = vmatprep.subr.mxu1 %v731_v21  ;;  %v334_v26 = vld [vmem:[#allocation5 + $0x360] sm:$0xff]  ;;  %1069 = vmatpush1.msra.mxu0 %v346_v22 }
  0xb5   :  { %v719_v25 = vld [vmem:[#allocation5 + $0xf68] sm:$0xff]  ;;  %v718_v27 = vld [vmem:[#allocation5 + $0xf60] sm:$0xff]  ;;  %1146 = vmatpush1.msra.mxu1 %v730_v23  ;;  %1070 = vmatprep.subr.mxu0 %v335_v24 }
  0xb6   :  { %v323_v28 = vld [vmem:[#allocation5 + $0x308] sm:$0xff]  ;;  %1147 = vmatprep.subr.mxu1 %v719_v25  ;;  %v322_v30 = vld [vmem:[#allocation5 + $0x300] sm:$0xff]  ;;  %1071 = vmatpush1.msra.mxu0 %v334_v26 }
  0xb7   :  { %v707_v29 = vld [vmem:[#allocation5 + $0xf08] sm:$0xff]  ;;  %v706_v31 = vld [vmem:[#allocation5 + $0xf00] sm:$0xff]  ;;  %1148 = vmatpush1.msra.mxu1 %v718_v27  ;;  %1072 = vmatprep.subr.mxu0 %v323_v28 }
  0xb8   :  { %v311_v32 = vld [vmem:[#allocation5 + $0x2a8] sm:$0xff]  ;;  %1149 = vmatprep.subr.mxu1 %v707_v29  ;;  %v310_v34 = vld [vmem:[#allocation5 + $0x2a0] sm:$0xff]  ;;  %1073 = vmatpush1.msra.mxu0 %v322_v30 }
  0xb9   :  { %v695_v33 = vld [vmem:[#allocation5 + $0xea8] sm:$0xff]  ;;  %v694_v35 = vld [vmem:[#allocation5 + $0xea0] sm:$0xff]  ;;  %1150 = vmatpush1.msra.mxu1 %v706_v31  ;;  %1074 = vmatprep.subr.mxu0 %v311_v32 }
  0xba   :  { %v299_v36 = vld [vmem:[#allocation5 + $0x248] sm:$0xff]  ;;  %1151 = vmatprep.subr.mxu1 %v695_v33  ;;  %v298_v38 = vld [vmem:[#allocation5 + $0x240] sm:$0xff]  ;;  %1075 = vmatpush1.msra.mxu0 %v310_v34 }
  0xbb   :  { %v683_v37 = vld [vmem:[#allocation5 + $0xe48] sm:$0xff]  ;;  %v682_v39 = vld [vmem:[#allocation5 + $0xe40] sm:$0xff]  ;;  %1152 = vmatpush1.msra.mxu1 %v694_v35  ;;  %1076 = vmatprep.subr.mxu0 %v299_v36 }
  0xbc   :  { %v287_v40 = vld [vmem:[#allocation5 + $0x1e8] sm:$0xff]  ;;  %1153 = vmatprep.subr.mxu1 %v683_v37  ;;  %v286_v42 = vld [vmem:[#allocation5 + $0x1e0] sm:$0xff]  ;;  %1077 = vmatpush1.msra.mxu0 %v298_v38 }
  0xbd   :  { %v671_v41 = vld [vmem:[#allocation5 + $0xde8] sm:$0xff]  ;;  %v670_v43 = vld [vmem:[#allocation5 + $0xde0] sm:$0xff]  ;;  %1154 = vmatpush1.msra.mxu1 %v682_v39  ;;  %1078 = vmatprep.subr.mxu0 %v287_v40 }
  0xbe   :  { %v275_v44 = vld [vmem:[#allocation5 + $0x188] sm:$0xff]  ;;  %1155 = vmatprep.subr.mxu1 %v671_v41  ;;  %v274_v46 = vld [vmem:[#allocation5 + $0x180] sm:$0xff]  ;;  %1079 = vmatpush1.msra.mxu0 %v286_v42 }
  0xbf   :  { %v659_v45 = vld [vmem:[#allocation5 + $0xd88] sm:$0xff]  ;;  %v658_v47 = vld [vmem:[#allocation5 + $0xd80] sm:$0xff]  ;;  %1156 = vmatpush1.msra.mxu1 %v670_v43  ;;  %1080 = vmatprep.subr.mxu0 %v275_v44 }
  0xc0   :  { %v263_v48 = vld [vmem:[#allocation5 + $0x128] sm:$0xff]  ;;  %1157 = vmatprep.subr.mxu1 %v659_v45  ;;  %v262_v50 = vld [vmem:[#allocation5 + $0x120] sm:$0xff]  ;;  %1081 = vmatpush1.msra.mxu0 %v274_v46 }
  0xc1   :  { %v647_v49 = vld [vmem:[#allocation5 + $0xd28] sm:$0xff]  ;;  %v646_v51 = vld [vmem:[#allocation5 + $0xd20] sm:$0xff]  ;;  %1158 = vmatpush1.msra.mxu1 %v658_v47  ;;  %1082 = vmatprep.subr.mxu0 %v263_v48 }
  0xc2   :  { %v251_v52 = vld [vmem:[#allocation5 + $0xc8] sm:$0xff]  ;;  %1159 = vmatprep.subr.mxu1 %v647_v49  ;;  %v250_v54 = vld [vmem:[#allocation5 + $0xc0] sm:$0xff]  ;;  %1083 = vmatpush1.msra.mxu0 %v262_v50 }
  0xc3   :  { %v635_v53 = vld [vmem:[#allocation5 + $0xcc8] sm:$0xff]  ;;  %v634_v55 = vld [vmem:[#allocation5 + $0xcc0] sm:$0xff]  ;;  %1160 = vmatpush1.msra.mxu1 %v646_v51  ;;  %1084 = vmatprep.subr.mxu0 %v251_v52 }
  0xc4   :  { %v239_v56 = vld [vmem:[#allocation5 + $0x68] sm:$0xff]  ;;  %1161 = vmatprep.subr.mxu1 %v635_v53  ;;  %v238_v58 = vld [vmem:[#allocation5 + $0x60] sm:$0xff]  ;;  %1085 = vmatpush1.msra.mxu0 %v250_v54 }
  0xc5   :  { %v623_v57 = vld [vmem:[#allocation5 + $0xc68] sm:$0xff]  ;;  %v622_v59 = vld [vmem:[#allocation5 + $0xc60] sm:$0xff]  ;;  %1162 = vmatpush1.msra.mxu1 %v634_v55  ;;  %1086 = vmatprep.subr.mxu0 %v239_v56 }
  0xc6   :  { %v227_v60 = vld [vmem:[#allocation5 + $0x8] sm:$0xff]  ;;  %1163 = vmatprep.subr.mxu1 %v623_v57  ;;  %v226_v62 = vld [vmem:[#allocation5] sm:$0xff]  ;;  %1087 = vmatpush1.msra.mxu0 %v238_v58 }
  0xc7   :  { %v611_v61 = vld [vmem:[#allocation5 + $0xc08] sm:$0xff]  ;;  %v610_v63 = vld [vmem:[#allocation5 + $0xc00] sm:$0xff]  ;;  %1164 = vmatpush1.msra.mxu1 %v622_v59  ;;  %1088 = vmatprep.subr.mxu0 %v227_v60 }
  0xc8   :  { %v599_v0 = vld [vmem:[#allocation5 + $0xba8] sm:$0xff]  ;;  %1165 = vmatprep.subr.mxu1 %v611_v61  ;;  %v598_v2 = vld [vmem:[#allocation5 + $0xba0] sm:$0xff]  ;;  %1089 = vmatpush1.msra.mxu0 %v226_v62 }
  0xc9   :  { %v983_v1 = vld [vmem:[#allocation5 + $0x17a8] sm:$0xff]  ;;  %v982_v3 = vld [vmem:[#allocation5 + $0x17a0] sm:$0xff]  ;;  %1166 = vmatpush1.msra.mxu1 %v610_v63  ;;  %1090 = vmatprep.subr.mxu0 %v599_v0 }
  0xca   :  { %v587_v4 = vld [vmem:[#allocation5 + $0xb48] sm:$0xff]  ;;  %1167 = vmatprep.subr.mxu1 %v983_v1  ;;  %v586_v6 = vld [vmem:[#allocation5 + $0xb40] sm:$0xff]  ;;  %1091 = vmatpush2.msra.mxu0 %v598_v2  ;;  %v5651_v2 = vld [vmem:[#allocation2 + $0x18] sm:$0xff] }
  0xcb   :  { %v971_v5 = vld [vmem:[#allocation5 + $0x1748] sm:$0xff]  ;;  %v970_v7 = vld [vmem:[#allocation5 + $0x1740] sm:$0xff]  ;;  %1168 = vmatpush2.msra.mxu1 %v982_v3  ;;  %1092 = vmatprep.subr.mxu0 %v587_v4  ;;  %v409_v3 = vld [vmem:[#allocation5 + $0x5b8] sm:$0xff] }
  0xcc   :  { %v575_v8 = vld [vmem:[#allocation5 + $0xae8] sm:$0xff]  ;;  %1169 = vmatprep.subr.mxu1 %v971_v5  ;;  %v574_v10 = vld [vmem:[#allocation5 + $0xae0] sm:$0xff]  ;;  %1093 = vmatpush2.msra.mxu0 %v586_v6  ;;  %v793_v4 = vld [vmem:[#allocation5 + $0x11b8] sm:$0xff] }
  0xcd   :  { %v959_v9 = vld [vmem:[#allocation5 + $0x16e8] sm:$0xff]  ;;  %v958_v11 = vld [vmem:[#allocation5 + $0x16e0] sm:$0xff]  ;;  %1170 = vmatpush2.msra.mxu1 %v970_v7  ;;  %1094 = vmatprep.subr.mxu0 %v575_v8  ;;  %v5654_v5 = vld [vmem:[#allocation2 + $0x10] sm:$0xff] }
  0xce   :  { %v563_v12 = vld [vmem:[#allocation5 + $0xa88] sm:$0xff]  ;;  %1171 = vmatprep.subr.mxu1 %v959_v9  ;;  %v562_v14 = vld [vmem:[#allocation5 + $0xa80] sm:$0xff]  ;;  %1095 = vmatpush2.msra.mxu0 %v574_v10  ;;  %v408_v6 = vld [vmem:[#allocation5 + $0x5b0] sm:$0xff] }
  0xcf   :  { %v947_v13 = vld [vmem:[#allocation5 + $0x1688] sm:$0xff]  ;;  %v946_v15 = vld [vmem:[#allocation5 + $0x1680] sm:$0xff]  ;;  %1172 = vmatpush2.msra.mxu1 %v958_v11  ;;  %1096 = vmatprep.subr.mxu0 %v563_v12  ;;  %v792_v7 = vld [vmem:[#allocation5 + $0x11b0] sm:$0xff] }
  0xd0   :  { %v551_v16 = vld [vmem:[#allocation5 + $0xa28] sm:$0xff]  ;;  %1173 = vmatprep.subr.mxu1 %v947_v13  ;;  %v550_v18 = vld [vmem:[#allocation5 + $0xa20] sm:$0xff]  ;;  %1097 = vmatpush2.msra.mxu0 %v562_v14  ;;  %v397_v8 = vld [vmem:[#allocation5 + $0x558] sm:$0xff] }
  0xd1   :  { %v935_v17 = vld [vmem:[#allocation5 + $0x1628] sm:$0xff]  ;;  %v934_v19 = vld [vmem:[#allocation5 + $0x1620] sm:$0xff]  ;;  %1174 = vmatpush2.msra.mxu1 %v946_v15  ;;  %1098 = vmatprep.subr.mxu0 %v551_v16  ;;  %v781_v9 = vld [vmem:[#allocation5 + $0x1158] sm:$0xff] }
  0xd2   :  { %v539_v20 = vld [vmem:[#allocation5 + $0x9c8] sm:$0xff]  ;;  %1175 = vmatprep.subr.mxu1 %v935_v17  ;;  %v538_v22 = vld [vmem:[#allocation5 + $0x9c0] sm:$0xff]  ;;  %1099 = vmatpush2.msra.mxu0 %v550_v18  ;;  %v396_v10 = vld [vmem:[#allocation5 + $0x550] sm:$0xff] }
  0xd3   :  { %v923_v21 = vld [vmem:[#allocation5 + $0x15c8] sm:$0xff]  ;;  %v922_v23 = vld [vmem:[#allocation5 + $0x15c0] sm:$0xff]  ;;  %1176 = vmatpush2.msra.mxu1 %v934_v19  ;;  %1100 = vmatprep.subr.mxu0 %v539_v20  ;;  %v780_v11 = vld [vmem:[#allocation5 + $0x1150] sm:$0xff] }
  0xd4   :  { %v527_v24 = vld [vmem:[#allocation5 + $0x968] sm:$0xff]  ;;  %1177 = vmatprep.subr.mxu1 %v923_v21  ;;  %v526_v26 = vld [vmem:[#allocation5 + $0x960] sm:$0xff]  ;;  %1101 = vmatpush2.msra.mxu0 %v538_v22  ;;  %v385_v12 = vld [vmem:[#allocation5 + $0x4f8] sm:$0xff] }
  0xd5   :  { %v911_v25 = vld [vmem:[#allocation5 + $0x1568] sm:$0xff]  ;;  %v910_v27 = vld [vmem:[#allocation5 + $0x1560] sm:$0xff]  ;;  %1178 = vmatpush2.msra.mxu1 %v922_v23  ;;  %1102 = vmatprep.subr.mxu0 %v527_v24  ;;  %v769_v13 = vld [vmem:[#allocation5 + $0x10f8] sm:$0xff] }
  0xd6   :  { %v515_v28 = vld [vmem:[#allocation5 + $0x908] sm:$0xff]  ;;  %1179 = vmatprep.subr.mxu1 %v911_v25  ;;  %v514_v30 = vld [vmem:[#allocation5 + $0x900] sm:$0xff]  ;;  %1103 = vmatpush2.msra.mxu0 %v526_v26  ;;  %v384_v14 = vld [vmem:[#allocation5 + $0x4f0] sm:$0xff] }
  0xd7   :  { %v899_v29 = vld [vmem:[#allocation5 + $0x1508] sm:$0xff]  ;;  %v898_v31 = vld [vmem:[#allocation5 + $0x1500] sm:$0xff]  ;;  %1180 = vmatpush2.msra.mxu1 %v910_v27  ;;  %1104 = vmatprep.subr.mxu0 %v515_v28  ;;  %v768_v15 = vld [vmem:[#allocation5 + $0x10f0] sm:$0xff] }
  0xd8   :  { %v503_v32 = vld [vmem:[#allocation5 + $0x8a8] sm:$0xff]  ;;  %1181 = vmatprep.subr.mxu1 %v899_v29  ;;  %v502_v34 = vld [vmem:[#allocation5 + $0x8a0] sm:$0xff]  ;;  %1105 = vmatpush2.msra.mxu0 %v514_v30  ;;  %v373_v16 = vld [vmem:[#allocation5 + $0x498] sm:$0xff] }
  0xd9   :  { %v887_v33 = vld [vmem:[#allocation5 + $0x14a8] sm:$0xff]  ;;  %v886_v35 = vld [vmem:[#allocation5 + $0x14a0] sm:$0xff]  ;;  %1182 = vmatpush2.msra.mxu1 %v898_v31  ;;  %1106 = vmatprep.subr.mxu0 %v503_v32  ;;  %v757_v17 = vld [vmem:[#allocation5 + $0x1098] sm:$0xff] }
  0xda   :  { %v491_v36 = vld [vmem:[#allocation5 + $0x848] sm:$0xff]  ;;  %1183 = vmatprep.subr.mxu1 %v887_v33  ;;  %v490_v38 = vld [vmem:[#allocation5 + $0x840] sm:$0xff]  ;;  %1107 = vmatpush2.msra.mxu0 %v502_v34  ;;  %v372_v18 = vld [vmem:[#allocation5 + $0x490] sm:$0xff] }
  0xdb   :  { %v875_v37 = vld [vmem:[#allocation5 + $0x1448] sm:$0xff]  ;;  %v874_v39 = vld [vmem:[#allocation5 + $0x1440] sm:$0xff]  ;;  %1184 = vmatpush2.msra.mxu1 %v886_v35  ;;  %1108 = vmatprep.subr.mxu0 %v491_v36  ;;  %v756_v19 = vld [vmem:[#allocation5 + $0x1090] sm:$0xff] }
  0xdc   :  { %v479_v40 = vld [vmem:[#allocation5 + $0x7e8] sm:$0xff]  ;;  %1185 = vmatprep.subr.mxu1 %v875_v37  ;;  %v478_v42 = vld [vmem:[#allocation5 + $0x7e0] sm:$0xff]  ;;  %1109 = vmatpush2.msra.mxu0 %v490_v38  ;;  %v361_v20 = vld [vmem:[#allocation5 + $0x438] sm:$0xff] }
  0xdd   :  { %v863_v41 = vld [vmem:[#allocation5 + $0x13e8] sm:$0xff]  ;;  %v862_v43 = vld [vmem:[#allocation5 + $0x13e0] sm:$0xff]  ;;  %1186 = vmatpush2.msra.mxu1 %v874_v39  ;;  %1110 = vmatprep.subr.mxu0 %v479_v40  ;;  %v745_v21 = vld [vmem:[#allocation5 + $0x1038] sm:$0xff] }
  0xde   :  { %v467_v44 = vld [vmem:[#allocation5 + $0x788] sm:$0xff]  ;;  %1187 = vmatprep.subr.mxu1 %v863_v41  ;;  %v466_v46 = vld [vmem:[#allocation5 + $0x780] sm:$0xff]  ;;  %1111 = vmatpush2.msra.mxu0 %v478_v42  ;;  %v360_v22 = vld [vmem:[#allocation5 + $0x430] sm:$0xff] }
  0xdf   :  { %v851_v45 = vld [vmem:[#allocation5 + $0x1388] sm:$0xff]  ;;  %v850_v47 = vld [vmem:[#allocation5 + $0x1380] sm:$0xff]  ;;  %1188 = vmatpush2.msra.mxu1 %v862_v43  ;;  %1112 = vmatprep.subr.mxu0 %v467_v44  ;;  %v744_v23 = vld [vmem:[#allocation5 + $0x1030] sm:$0xff] }
  0xe0   :  { %v455_v48 = vld [vmem:[#allocation5 + $0x728] sm:$0xff]  ;;  %1189 = vmatprep.subr.mxu1 %v851_v45  ;;  %v454_v50 = vld [vmem:[#allocation5 + $0x720] sm:$0xff]  ;;  %1113 = vmatpush2.msra.mxu0 %v466_v46  ;;  %v349_v24 = vld [vmem:[#allocation5 + $0x3d8] sm:$0xff] }
  0xe1   :  { %v839_v49 = vld [vmem:[#allocation5 + $0x1328] sm:$0xff]  ;;  %v838_v51 = vld [vmem:[#allocation5 + $0x1320] sm:$0xff]  ;;  %1190 = vmatpush2.msra.mxu1 %v850_v47  ;;  %1114 = vmatprep.subr.mxu0 %v455_v48  ;;  %v733_v25 = vld [vmem:[#allocation5 + $0xfd8] sm:$0xff] }
  0xe2   :  { %v443_v52 = vld [vmem:[#allocation5 + $0x6c8] sm:$0xff]  ;;  %1191 = vmatprep.subr.mxu1 %v839_v49  ;;  %v442_v54 = vld [vmem:[#allocation5 + $0x6c0] sm:$0xff]  ;;  %1115 = vmatpush2.msra.mxu0 %v454_v50  ;;  %v348_v26 = vld [vmem:[#allocation5 + $0x3d0] sm:$0xff] }
  0xe3   :  { %v827_v53 = vld [vmem:[#allocation5 + $0x12c8] sm:$0xff]  ;;  %v826_v55 = vld [vmem:[#allocation5 + $0x12c0] sm:$0xff]  ;;  %1192 = vmatpush2.msra.mxu1 %v838_v51  ;;  %1116 = vmatprep.subr.mxu0 %v443_v52  ;;  %v732_v27 = vld [vmem:[#allocation5 + $0xfd0] sm:$0xff] }
  0xe4   :  { %v431_v56 = vld [vmem:[#allocation5 + $0x668] sm:$0xff]  ;;  %1193 = vmatprep.subr.mxu1 %v827_v53  ;;  %v430_v58 = vld [vmem:[#allocation5 + $0x660] sm:$0xff]  ;;  %1117 = vmatpush2.msra.mxu0 %v442_v54  ;;  %v337_v28 = vld [vmem:[#allocation5 + $0x378] sm:$0xff] }
  0xe5   :  { %v815_v57 = vld [vmem:[#allocation5 + $0x1268] sm:$0xff]  ;;  %v814_v59 = vld [vmem:[#allocation5 + $0x1260] sm:$0xff]  ;;  %1194 = vmatpush2.msra.mxu1 %v826_v55  ;;  %1118 = vmatprep.subr.mxu0 %v431_v56  ;;  %v721_v29 = vld [vmem:[#allocation5 + $0xf78] sm:$0xff] }
  0xe6   :  { %v419_v60 = vld [vmem:[#allocation5 + $0x608] sm:$0xff]  ;;  %1195 = vmatprep.subr.mxu1 %v815_v57  ;;  %v418_v62 = vld [vmem:[#allocation5 + $0x600] sm:$0xff]  ;;  %1119 = vmatpush2.msra.mxu0 %v430_v58  ;;  %v336_v30 = vld [vmem:[#allocation5 + $0x370] sm:$0xff] }
  0xe7   :  { %v803_v61 = vld [vmem:[#allocation5 + $0x1208] sm:$0xff]  ;;  %1196 = vmatpush2.msra.mxu1 %v814_v59  ;;  %v802_v0 = vld [vmem:[#allocation5 + $0x1200] sm:$0xff]  ;;  %1120 = vmatprep.subr.mxu0 %v419_v60  ;;  %v720_v31 = vld [vmem:[#allocation5 + $0xf70] sm:$0xff] }
  0xe8   :  { %v5647_v63 = vld [vmem:[#allocation2 + $0x8] sm:$0xff]  ;;  %v5649_v1 = vld [vmem:[#allocation2] sm:$0xff]  ;;  %1197 = vmatprep.subr.mxu1 %v803_v61  ;;  %1121 = vmatpush2.msra.mxu0 %v418_v62  ;;  %v325_v32 = vld [vmem:[#allocation5 + $0x318] sm:$0xff] }
  0xe9   :  { %1122 = vmatprep.mubr.f32.mxu0 %v5647_v63  ;;  %1198 = vmatpush2.msra.mxu1 %v802_v0  ;;  %v709_v33 = vld [vmem:[#allocation5 + $0xf18] sm:$0xff]  ;;  %v324_v34 = vld [vmem:[#allocation5 + $0x310] sm:$0xff] }
  0xea   :  { %1123 = vmatmul.mubr.f32.vlgmr.msra.gmra.mxu0 %v5649_v1  ;;  %1199 = vmatprep.mubr.f32.mxu1 %v5651_v2  ;;  %v708_v35 = vld [vmem:[#allocation5 + $0xf10] sm:$0xff]  ;;  %v313_v36 = vld [vmem:[#allocation5 + $0x2b8] sm:$0xff] }
  0xeb   :  { %1212 = vmatprep.subr.mxu0 %v409_v3  ;;  %1289 = vmatprep.subr.mxu1 %v793_v4  ;;  %v697_v37 = vld [vmem:[#allocation5 + $0xeb8] sm:$0xff]  ;;  %v312_v38 = vld [vmem:[#allocation5 + $0x2b0] sm:$0xff] }
  0xec   :  { %1200 = vmatmul.mubr.f32.vlgmr.msra.gmra.mxu1 %v5654_v5  ;;  %1213 = vmatpush1.msra.mxu0 %v408_v6  ;;  %v696_v39 = vld [vmem:[#allocation5 + $0xeb0] sm:$0xff]  ;;  %v301_v40 = vld [vmem:[#allocation5 + $0x258] sm:$0xff] }
  0xed   :  { %1290 = vmatpush1.msra.mxu1 %v792_v7  ;;  %1214 = vmatprep.subr.mxu0 %v397_v8  ;;  %v685_v41 = vld [vmem:[#allocation5 + $0xe58] sm:$0xff]  ;;  %v300_v42 = vld [vmem:[#allocation5 + $0x250] sm:$0xff] }
  0xee   :  { %1291 = vmatprep.subr.mxu1 %v781_v9  ;;  %1215 = vmatpush1.msra.mxu0 %v396_v10  ;;  %v684_v43 = vld [vmem:[#allocation5 + $0xe50] sm:$0xff]  ;;  %v289_v44 = vld [vmem:[#allocation5 + $0x1f8] sm:$0xff] }
  0xef   :  { %1292 = vmatpush1.msra.mxu1 %v780_v11  ;;  %1216 = vmatprep.subr.mxu0 %v385_v12  ;;  %v673_v45 = vld [vmem:[#allocation5 + $0xdf8] sm:$0xff]  ;;  %v288_v46 = vld [vmem:[#allocation5 + $0x1f0] sm:$0xff] }
  0xf0   :  { %1293 = vmatprep.subr.mxu1 %v769_v13  ;;  %1217 = vmatpush1.msra.mxu0 %v384_v14  ;;  %v672_v47 = vld [vmem:[#allocation5 + $0xdf0] sm:$0xff]  ;;  %v277_v48 = vld [vmem:[#allocation5 + $0x198] sm:$0xff] }
  0xf1   :  { %1294 = vmatpush1.msra.mxu1 %v768_v15  ;;  %1218 = vmatprep.subr.mxu0 %v373_v16  ;;  %v661_v49 = vld [vmem:[#allocation5 + $0xd98] sm:$0xff]  ;;  %v276_v50 = vld [vmem:[#allocation5 + $0x190] sm:$0xff] }
  0xf2   :  { %1295 = vmatprep.subr.mxu1 %v757_v17  ;;  %1219 = vmatpush1.msra.mxu0 %v372_v18  ;;  %v660_v51 = vld [vmem:[#allocation5 + $0xd90] sm:$0xff]  ;;  %v265_v52 = vld [vmem:[#allocation5 + $0x138] sm:$0xff] }
  0xf3   :  { %1296 = vmatpush1.msra.mxu1 %v756_v19  ;;  %1220 = vmatprep.subr.mxu0 %v361_v20  ;;  %v649_v53 = vld [vmem:[#allocation5 + $0xd38] sm:$0xff]  ;;  %v264_v54 = vld [vmem:[#allocation5 + $0x130] sm:$0xff] }
  0xf4   :  { %1297 = vmatprep.subr.mxu1 %v745_v21  ;;  %1221 = vmatpush1.msra.mxu0 %v360_v22  ;;  %v648_v55 = vld [vmem:[#allocation5 + $0xd30] sm:$0xff]  ;;  %v253_v56 = vld [vmem:[#allocation5 + $0xd8] sm:$0xff] }
  0xf5   :  { %1298 = vmatpush1.msra.mxu1 %v744_v23  ;;  %1222 = vmatprep.subr.mxu0 %v349_v24  ;;  %v637_v57 = vld [vmem:[#allocation5 + $0xcd8] sm:$0xff]  ;;  %v252_v58 = vld [vmem:[#allocation5 + $0xd0] sm:$0xff] }
  0xf6   :  { %1299 = vmatprep.subr.mxu1 %v733_v25  ;;  %1223 = vmatpush1.msra.mxu0 %v348_v26  ;;  %v636_v59 = vld [vmem:[#allocation5 + $0xcd0] sm:$0xff]  ;;  %v241_v60 = vld [vmem:[#allocation5 + $0x78] sm:$0xff] }
  0xf7   :  { %1300 = vmatpush1.msra.mxu1 %v732_v27  ;;  %1224 = vmatprep.subr.mxu0 %v337_v28  ;;  %v625_v61 = vld [vmem:[#allocation5 + $0xc78] sm:$0xff]  ;;  %v240_v62 = vld [vmem:[#allocation5 + $0x70] sm:$0xff] }
  0xf8   :  { %1301 = vmatprep.subr.mxu1 %v721_v29  ;;  %1225 = vmatpush1.msra.mxu0 %v336_v30  ;;  %v624_v0 = vld [vmem:[#allocation5 + $0xc70] sm:$0xff]  ;;  %v229_v3 = vld [vmem:[#allocation5 + $0x18] sm:$0xff] }
  0xf9   :  { %1302 = vmatpush1.msra.mxu1 %v720_v31  ;;  %1226 = vmatprep.subr.mxu0 %v325_v32  ;;  %v613_v4 = vld [vmem:[#allocation5 + $0xc18] sm:$0xff]  ;;  %v228_v6 = vld [vmem:[#allocation5 + $0x10] sm:$0xff] }
  0xfa   :  { %1303 = vmatprep.subr.mxu1 %v709_v33  ;;  %1227 = vmatpush1.msra.mxu0 %v324_v34  ;;  %v612_v7 = vld [vmem:[#allocation5 + $0xc10] sm:$0xff]  ;;  %v601_v8 = vld [vmem:[#allocation5 + $0xbb8] sm:$0xff] }
  0xfb   :  { %1304 = vmatpush1.msra.mxu1 %v708_v35  ;;  %1228 = vmatprep.subr.mxu0 %v313_v36  ;;  %v985_v9 = vld [vmem:[#allocation5 + $0x17b8] sm:$0xff]  ;;  %v600_v10 = vld [vmem:[#allocation5 + $0xbb0] sm:$0xff] }
  0xfc   :  { %1305 = vmatprep.subr.mxu1 %v697_v37  ;;  %1229 = vmatpush1.msra.mxu0 %v312_v38  ;;  %v984_v11 = vld [vmem:[#allocation5 + $0x17b0] sm:$0xff]  ;;  %v589_v12 = vld [vmem:[#allocation5 + $0xb58] sm:$0xff] }
  0xfd   :  { %1306 = vmatpush1.msra.mxu1 %v696_v39  ;;  %1230 = vmatprep.subr.mxu0 %v301_v40  ;;  %v973_v13 = vld [vmem:[#allocation5 + $0x1758] sm:$0xff]  ;;  %v588_v14 = vld [vmem:[#allocation5 + $0xb50] sm:$0xff] }
  0xfe   :  { %1307 = vmatprep.subr.mxu1 %v685_v41  ;;  %1231 = vmatpush1.msra.mxu0 %v300_v42  ;;  %v972_v15 = vld [vmem:[#allocation5 + $0x1750] sm:$0xff]  ;;  %v577_v16 = vld [vmem:[#allocation5 + $0xaf8] sm:$0xff] }
  0xff   :  { %1308 = vmatpush1.msra.mxu1 %v684_v43  ;;  %1232 = vmatprep.subr.mxu0 %v289_v44  ;;  %v961_v17 = vld [vmem:[#allocation5 + $0x16f8] sm:$0xff]  ;;  %v576_v18 = vld [vmem:[#allocation5 + $0xaf0] sm:$0xff] }
 0x100   :  { %1309 = vmatprep.subr.mxu1 %v673_v45  ;;  %1233 = vmatpush1.msra.mxu0 %v288_v46  ;;  %v960_v19 = vld [vmem:[#allocation5 + $0x16f0] sm:$0xff]  ;;  %v565_v20 = vld [vmem:[#allocation5 + $0xa98] sm:$0xff] }
 0x101   :  { %1310 = vmatpush1.msra.mxu1 %v672_v47  ;;  %1234 = vmatprep.subr.mxu0 %v277_v48  ;;  %v949_v21 = vld [vmem:[#allocation5 + $0x1698] sm:$0xff]  ;;  %v564_v22 = vld [vmem:[#allocation5 + $0xa90] sm:$0xff] }
 0x102   :  { %1311 = vmatprep.subr.mxu1 %v661_v49  ;;  %1235 = vmatpush1.msra.mxu0 %v276_v50  ;;  %v948_v23 = vld [vmem:[#allocation5 + $0x1690] sm:$0xff]  ;;  %v553_v24 = vld [vmem:[#allocation5 + $0xa38] sm:$0xff] }
 0x103   :  { %1312 = vmatpush1.msra.mxu1 %v660_v51  ;;  %1236 = vmatprep.subr.mxu0 %v265_v52  ;;  %v937_v25 = vld [vmem:[#allocation5 + $0x1638] sm:$0xff]  ;;  %v552_v26 = vld [vmem:[#allocation5 + $0xa30] sm:$0xff] }
 0x104   :  { %1313 = vmatprep.subr.mxu1 %v649_v53  ;;  %1237 = vmatpush1.msra.mxu0 %v264_v54  ;;  %v936_v27 = vld [vmem:[#allocation5 + $0x1630] sm:$0xff]  ;;  %v541_v28 = vld [vmem:[#allocation5 + $0x9d8] sm:$0xff] }
 0x105   :  { %1314 = vmatpush1.msra.mxu1 %v648_v55  ;;  %1238 = vmatprep.subr.mxu0 %v253_v56  ;;  %v925_v29 = vld [vmem:[#allocation5 + $0x15d8] sm:$0xff]  ;;  %v540_v30 = vld [vmem:[#allocation5 + $0x9d0] sm:$0xff] }
 0x106   :  { %1315 = vmatprep.subr.mxu1 %v637_v57  ;;  %1239 = vmatpush1.msra.mxu0 %v252_v58  ;;  %v924_v31 = vld [vmem:[#allocation5 + $0x15d0] sm:$0xff]  ;;  %v529_v32 = vld [vmem:[#allocation5 + $0x978] sm:$0xff] }
 0x107   :  { %1316 = vmatpush1.msra.mxu1 %v636_v59  ;;  %1240 = vmatprep.subr.mxu0 %v241_v60  ;;  %v913_v33 = vld [vmem:[#allocation5 + $0x1578] sm:$0xff]  ;;  %v528_v34 = vld [vmem:[#allocation5 + $0x970] sm:$0xff]  ;;  %v5659_v60 = vld [vmem:[#allocation2 + $0x28] sm:$0xff] }
 0x108   :  { %1317 = vmatprep.subr.mxu1 %v625_v61  ;;  %1241 = vmatpush1.msra.mxu0 %v240_v62  ;;  %v912_v35 = vld [vmem:[#allocation5 + $0x1570] sm:$0xff]  ;;  %v517_v36 = vld [vmem:[#allocation5 + $0x918] sm:$0xff] }
 0x109   :  { %1318 = vmatpush1.msra.mxu1 %v624_v0  ;;  %1242 = vmatprep.subr.mxu0 %v229_v3  ;;  %v901_v37 = vld [vmem:[#allocation5 + $0x1518] sm:$0xff]  ;;  %v516_v38 = vld [vmem:[#allocation5 + $0x910] sm:$0xff]  ;;  %v5661_v0 = vld [vmem:[#allocation2 + $0x20] sm:$0xff] }
 0x10a   :  { %1319 = vmatprep.subr.mxu1 %v613_v4  ;;  %1243 = vmatpush1.msra.mxu0 %v228_v6  ;;  %v900_v39 = vld [vmem:[#allocation5 + $0x1510] sm:$0xff]  ;;  %v505_v40 = vld [vmem:[#allocation5 + $0x8b8] sm:$0xff] }
 0x10b   :  { %1320 = vmatpush1.msra.mxu1 %v612_v7  ;;  %1244 = vmatprep.subr.mxu0 %v601_v8  ;;  %v889_v41 = vld [vmem:[#allocation5 + $0x14b8] sm:$0xff]  ;;  %v504_v42 = vld [vmem:[#allocation5 + $0x8b0] sm:$0xff] }
 0x10c   :  { %1321 = vmatprep.subr.mxu1 %v985_v9  ;;  %1245 = vmatpush2.msra.mxu0 %v600_v10  ;;  %v888_v43 = vld [vmem:[#allocation5 + $0x14b0] sm:$0xff]  ;;  %v493_v44 = vld [vmem:[#allocation5 + $0x858] sm:$0xff] }
 0x10d   :  { %1322 = vmatpush2.msra.mxu1 %v984_v11  ;;  %1246 = vmatprep.subr.mxu0 %v589_v12  ;;  %v877_v45 = vld [vmem:[#allocation5 + $0x1458] sm:$0xff]  ;;  %v492_v46 = vld [vmem:[#allocation5 + $0x850] sm:$0xff] }
 0x10e   :  { %1323 = vmatprep.subr.mxu1 %v973_v13  ;;  %1247 = vmatpush2.msra.mxu0 %v588_v14  ;;  %v876_v47 = vld [vmem:[#allocation5 + $0x1450] sm:$0xff]  ;;  %v481_v48 = vld [vmem:[#allocation5 + $0x7f8] sm:$0xff] }
 0x10f   :  { %1324 = vmatpush2.msra.mxu1 %v972_v15  ;;  %1248 = vmatprep.subr.mxu0 %v577_v16  ;;  %v865_v49 = vld [vmem:[#allocation5 + $0x13f8] sm:$0xff]  ;;  %v480_v50 = vld [vmem:[#allocation5 + $0x7f0] sm:$0xff]  ;;  %v411_v16 = vld [vmem:[#allocation5 + $0x5c8] sm:$0xff] }
 0x110   :  { %1325 = vmatprep.subr.mxu1 %v961_v17  ;;  %1249 = vmatpush2.msra.mxu0 %v576_v18  ;;  %v864_v51 = vld [vmem:[#allocation5 + $0x13f0] sm:$0xff]  ;;  %v469_v52 = vld [vmem:[#allocation5 + $0x798] sm:$0xff]  ;;  %v795_v17 = vld [vmem:[#allocation5 + $0x11c8] sm:$0xff] }
 0x111   :  { %1326 = vmatpush2.msra.mxu1 %v960_v19  ;;  %1250 = vmatprep.subr.mxu0 %v565_v20  ;;  %v853_v53 = vld [vmem:[#allocation5 + $0x1398] sm:$0xff]  ;;  %v468_v54 = vld [vmem:[#allocation5 + $0x790] sm:$0xff]  ;;  %v410_v18 = vld [vmem:[#allocation5 + $0x5c0] sm:$0xff] }
 0x112   :  { %1327 = vmatprep.subr.mxu1 %v949_v21  ;;  %1251 = vmatpush2.msra.mxu0 %v564_v22  ;;  %v852_v55 = vld [vmem:[#allocation5 + $0x1390] sm:$0xff]  ;;  %v457_v56 = vld [vmem:[#allocation5 + $0x738] sm:$0xff]  ;;  %v794_v19 = vld [vmem:[#allocation5 + $0x11c0] sm:$0xff] }
 0x113   :  { %1328 = vmatpush2.msra.mxu1 %v948_v23  ;;  %1252 = vmatprep.subr.mxu0 %v553_v24  ;;  %v841_v57 = vld [vmem:[#allocation5 + $0x1338] sm:$0xff]  ;;  %v456_v58 = vld [vmem:[#allocation5 + $0x730] sm:$0xff]  ;;  %v399_v20 = vld [vmem:[#allocation5 + $0x568] sm:$0xff] }
 0x114   :  { %1329 = vmatprep.subr.mxu1 %v937_v25  ;;  %1253 = vmatpush2.msra.mxu0 %v552_v26  ;;  %v840_v59 = vld [vmem:[#allocation5 + $0x1330] sm:$0xff]  ;;  %v445_v61 = vld [vmem:[#allocation5 + $0x6d8] sm:$0xff]  ;;  %v783_v21 = vld [vmem:[#allocation5 + $0x1168] sm:$0xff] }
 0x115   :  { %1330 = vmatpush2.msra.mxu1 %v936_v27  ;;  %1254 = vmatprep.subr.mxu0 %v541_v28  ;;  %v829_v62 = vld [vmem:[#allocation5 + $0x12d8] sm:$0xff]  ;;  %v444_v3 = vld [vmem:[#allocation5 + $0x6d0] sm:$0xff]  ;;  %v398_v22 = vld [vmem:[#allocation5 + $0x560] sm:$0xff] }
 0x116   :  { %1331 = vmatprep.subr.mxu1 %v925_v29  ;;  %1255 = vmatpush2.msra.mxu0 %v540_v30  ;;  %v828_v4 = vld [vmem:[#allocation5 + $0x12d0] sm:$0xff]  ;;  %v5664_v6 = vld [vmem:[#allocation2 + $0x38] sm:$0xff]  ;;  %v782_v23 = vld [vmem:[#allocation5 + $0x1160] sm:$0xff] }
 0x117   :  { %1332 = vmatpush2.msra.mxu1 %v924_v31  ;;  %1256 = vmatprep.subr.mxu0 %v529_v32  ;;  %v433_v7 = vld [vmem:[#allocation5 + $0x678] sm:$0xff]  ;;  %v5667_v9 = vld [vmem:[#allocation2 + $0x30] sm:$0xff]  ;;  %v387_v24 = vld [vmem:[#allocation5 + $0x508] sm:$0xff] }
 0x118   :  { %1333 = vmatprep.subr.mxu1 %v913_v33  ;;  %1257 = vmatpush2.msra.mxu0 %v528_v34  ;;  %v817_v8 = vld [vmem:[#allocation5 + $0x1278] sm:$0xff]  ;;  %v432_v10 = vld [vmem:[#allocation5 + $0x670] sm:$0xff]  ;;  %v386_v25 = vld [vmem:[#allocation5 + $0x500] sm:$0xff] }
 0x119   :  { %1334 = vmatpush2.msra.mxu1 %v912_v35  ;;  %1258 = vmatprep.subr.mxu0 %v517_v36  ;;  %v816_v11 = vld [vmem:[#allocation5 + $0x1270] sm:$0xff]  ;;  %v421_v12 = vld [vmem:[#allocation5 + $0x618] sm:$0xff]  ;;  %v375_v26 = vld [vmem:[#allocation5 + $0x4a8] sm:$0xff] }
 0x11a   :  { %1335 = vmatprep.subr.mxu1 %v901_v37  ;;  %1259 = vmatpush2.msra.mxu0 %v516_v38  ;;  %v805_v13 = vld [vmem:[#allocation5 + $0x1218] sm:$0xff]  ;;  %v420_v14 = vld [vmem:[#allocation5 + $0x610] sm:$0xff]  ;;  %v374_v27 = vld [vmem:[#allocation5 + $0x4a0] sm:$0xff] }
 0x11b   :  { %1336 = vmatpush2.msra.mxu1 %v900_v39  ;;  %1260 = vmatprep.subr.mxu0 %v505_v40  ;;  %v804_v15 = vld [vmem:[#allocation5 + $0x1210] sm:$0xff]  ;;  %v758_v28 = vld [vmem:[#allocation5 + $0x10a0] sm:$0xff]  ;;  %v747_v29 = vld [vmem:[#allocation5 + $0x1048] sm:$0xff] }
 0x11c   :  { %1337 = vmatprep.subr.mxu1 %v889_v41  ;;  %1261 = vmatpush2.msra.mxu0 %v504_v42  ;;  %v362_v30 = vld [vmem:[#allocation5 + $0x440] sm:$0xff]  ;;  %v351_v32 = vld [vmem:[#allocation5 + $0x3e8] sm:$0xff] }
 0x11d   :  { %1338 = vmatpush2.msra.mxu1 %v888_v43  ;;  %1262 = vmatprep.subr.mxu0 %v493_v44  ;;  %v746_v31 = vld [vmem:[#allocation5 + $0x1040] sm:$0xff]  ;;  %v735_v33 = vld [vmem:[#allocation5 + $0xfe8] sm:$0xff] }
 0x11e   :  { %1339 = vmatprep.subr.mxu1 %v877_v45  ;;  %1263 = vmatpush2.msra.mxu0 %v492_v46  ;;  %v350_v34 = vld [vmem:[#allocation5 + $0x3e0] sm:$0xff]  ;;  %v339_v36 = vld [vmem:[#allocation5 + $0x388] sm:$0xff] }
 0x11f   :  { %1340 = vmatpush2.msra.mxu1 %v876_v47  ;;  %1264 = vmatprep.subr.mxu0 %v481_v48  ;;  %v734_v35 = vld [vmem:[#allocation5 + $0xfe0] sm:$0xff]  ;;  %v723_v37 = vld [vmem:[#allocation5 + $0xf88] sm:$0xff] }
 0x120   :  { %1341 = vmatprep.subr.mxu1 %v865_v49  ;;  %1265 = vmatpush2.msra.mxu0 %v480_v50  ;;  %v338_v38 = vld [vmem:[#allocation5 + $0x380] sm:$0xff]  ;;  %v327_v40 = vld [vmem:[#allocation5 + $0x328] sm:$0xff] }
 0x121   :  { %1342 = vmatpush2.msra.mxu1 %v864_v51  ;;  %1266 = vmatprep.subr.mxu0 %v469_v52  ;;  %v722_v39 = vld [vmem:[#allocation5 + $0xf80] sm:$0xff]  ;;  %v711_v41 = vld [vmem:[#allocation5 + $0xf28] sm:$0xff] }
 0x122   :  { %1343 = vmatprep.subr.mxu1 %v853_v53  ;;  %1267 = vmatpush2.msra.mxu0 %v468_v54  ;;  %v326_v42 = vld [vmem:[#allocation5 + $0x320] sm:$0xff]  ;;  %v315_v44 = vld [vmem:[#allocation5 + $0x2c8] sm:$0xff] }
 0x123   :  { %1344 = vmatpush2.msra.mxu1 %v852_v55  ;;  %1268 = vmatprep.subr.mxu0 %v457_v56  ;;  %v710_v43 = vld [vmem:[#allocation5 + $0xf20] sm:$0xff]  ;;  %v699_v45 = vld [vmem:[#allocation5 + $0xec8] sm:$0xff] }
 0x124   :  { %1345 = vmatprep.subr.mxu1 %v841_v57  ;;  %1269 = vmatpush2.msra.mxu0 %v456_v58  ;;  %v314_v46 = vld [vmem:[#allocation5 + $0x2c0] sm:$0xff]  ;;  %v303_v48 = vld [vmem:[#allocation5 + $0x268] sm:$0xff] }
 0x125   :  { %1346 = vmatpush2.msra.mxu1 %v840_v59  ;;  %1128 = vmatprep.mubr.f32.mxu0 %v5659_v60  ;;  %v698_v47 = vld [vmem:[#allocation5 + $0xec0] sm:$0xff]  ;;  %v687_v49 = vld [vmem:[#allocation5 + $0xe68] sm:$0xff] }
 0x126   :  { %1270 = vmatprep.subr.mxu0 %v445_v61  ;;  %1347 = vmatprep.subr.mxu1 %v829_v62  ;;  %v302_v50 = vld [vmem:[#allocation5 + $0x260] sm:$0xff]  ;;  %v291_v52 = vld [vmem:[#allocation5 + $0x208] sm:$0xff] }
 0x127   :  { %1129 = vmatmul.mubr.f32.gmra.mxu0 %v5661_v0  ;;  %1348 = vmatpush2.msra.mxu1 %v828_v4  ;;  %v686_v51 = vld [vmem:[#allocation5 + $0xe60] sm:$0xff]  ;;  %v675_v53 = vld [vmem:[#allocation5 + $0xe08] sm:$0xff] }
 0x128   :  { %1271 = vmatpush2.msra.mxu0 %v444_v3  ;;  %1205 = vmatprep.mubr.f32.mxu1 %v5664_v6  ;;  %v290_v54 = vld [vmem:[#allocation5 + $0x200] sm:$0xff]  ;;  %v279_v56 = vld [vmem:[#allocation5 + $0x1a8] sm:$0xff] }
 0x129   :  { %1272 = vmatprep.subr.mxu0 %v433_v7  ;;  %1349 = vmatprep.subr.mxu1 %v817_v8  ;;  %v674_v55 = vld [vmem:[#allocation5 + $0xe00] sm:$0xff]  ;;  %v663_v57 = vld [vmem:[#allocation5 + $0xda8] sm:$0xff] }
 0x12a   :  { %1206 = vmatmul.mubr.f32.gmra.mxu1 %v5667_v9  ;;  %1273 = vmatpush2.msra.mxu0 %v432_v10  ;;  %v278_v58 = vld [vmem:[#allocation5 + $0x1a0] sm:$0xff]  ;;  %v267_v61 = vld [vmem:[#allocation5 + $0x148] sm:$0xff] }
 0x12b   :  { %1350 = vmatpush2.msra.mxu1 %v816_v11  ;;  %1274 = vmatprep.subr.mxu0 %v421_v12  ;;  %v662_v59 = vld [vmem:[#allocation5 + $0xda0] sm:$0xff]  ;;  %v651_v62 = vld [vmem:[#allocation5 + $0xd48] sm:$0xff] }
 0x12c   :  { %1351 = vmatprep.subr.mxu1 %v805_v13  ;;  %1275 = vmatpush2.msra.mxu0 %v420_v14  ;;  %v266_v3 = vld [vmem:[#allocation5 + $0x140] sm:$0xff]  ;;  %v255_v7 = vld [vmem:[#allocation5 + $0xe8] sm:$0xff] }
 0x12d   :  { %1276 = vmatprep.mubr.f32.mxu0 %v5647_v63  ;;  %1352 = vmatpush2.msra.mxu1 %v804_v15  ;;  %v771_v63 = vld [vmem:[#allocation5 + $0x1108] sm:$0xff]  ;;  %v650_v4 = vld [vmem:[#allocation5 + $0xd40] sm:$0xff] }
 0x12e   :  { %1277 = vmatmul.mubr.f32.vlgmr.msra.gmra.mxu0 %v5649_v1  ;;  %1353 = vmatprep.mubr.f32.mxu1 %v5651_v2  ;;  %v770_v1 = vld [vmem:[#allocation5 + $0x1100] sm:$0xff]  ;;  %v759_v2 = vld [vmem:[#allocation5 + $0x10a8] sm:$0xff] }
 0x12f   :  { %1366 = vmatprep.subr.mxu0 %v411_v16  ;;  %1443 = vmatprep.subr.mxu1 %v795_v17  ;;  %v639_v8 = vld [vmem:[#allocation5 + $0xce8] sm:$0xff]  ;;  %v254_v10 = vld [vmem:[#allocation5 + $0xe0] sm:$0xff] }
 0x130   :  { %1354 = vmatmul.mubr.f32.vlgmr.msra.gmra.mxu1 %v5654_v5  ;;  %1367 = vmatpush1.msra.mxu0 %v410_v18  ;;  %v363_v5 = vld [vmem:[#allocation5 + $0x448] sm:$0xff]  ;;  %v638_v11 = vld [vmem:[#allocation5 + $0xce0] sm:$0xff] }
 0x131   :  { %1444 = vmatpush1.msra.mxu1 %v794_v19  ;;  %1368 = vmatprep.subr.mxu0 %v399_v20  ;;  %v243_v12 = vld [vmem:[#allocation5 + $0x88] sm:$0xff]  ;;  %v242_v14 = vld [vmem:[#allocation5 + $0x80] sm:$0xff] }
 0x132   :  { %1445 = vmatprep.subr.mxu1 %v783_v21  ;;  %1369 = vmatpush1.msra.mxu0 %v398_v22  ;;  %v627_v13 = vld [vmem:[#allocation5 + $0xc88] sm:$0xff]  ;;  %v626_v15 = vld [vmem:[#allocation5 + $0xc80] sm:$0xff] }
 0x133   :  { %1446 = vmatpush1.msra.mxu1 %v782_v23  ;;  %1370 = vmatprep.subr.mxu0 %v387_v24  ;;  %v231_v16 = vld [vmem:[#allocation5 + $0x28] sm:$0xff]  ;;  %v230_v18 = vld [vmem:[#allocation5 + $0x20] sm:$0xff] }
 0x134   :  { %1447 = vmatprep.subr.mxu1 %v771_v63  ;;  %1371 = vmatpush1.msra.mxu0 %v386_v25  ;;  %v615_v17 = vld [vmem:[#allocation5 + $0xc28] sm:$0xff]  ;;  %v614_v19 = vld [vmem:[#allocation5 + $0xc20] sm:$0xff] }
 0x135   :  { %1448 = vmatpush1.msra.mxu1 %v770_v1  ;;  %1372 = vmatprep.subr.mxu0 %v375_v26  ;;  %v603_v20 = vld [vmem:[#allocation5 + $0xbc8] sm:$0xff]  ;;  %v602_v22 = vld [vmem:[#allocation5 + $0xbc0] sm:$0xff] }
 0x136   :  { %1449 = vmatprep.subr.mxu1 %v759_v2  ;;  %1373 = vmatpush1.msra.mxu0 %v374_v27  ;;  %v987_v21 = vld [vmem:[#allocation5 + $0x17c8] sm:$0xff]  ;;  %v986_v23 = vld [vmem:[#allocation5 + $0x17c0] sm:$0xff] }
 0x137   :  { %1450 = vmatpush1.msra.mxu1 %v758_v28  ;;  %1374 = vmatprep.subr.mxu0 %v363_v5  ;;  %v591_v24 = vld [vmem:[#allocation5 + $0xb68] sm:$0xff]  ;;  %v590_v25 = vld [vmem:[#allocation5 + $0xb60] sm:$0xff] }
 0x138   :  { %1451 = vmatprep.subr.mxu1 %v747_v29  ;;  %1375 = vmatpush1.msra.mxu0 %v362_v30  ;;  %v975_v63 = vld [vmem:[#allocation5 + $0x1768] sm:$0xff]  ;;  %v974_v1 = vld [vmem:[#allocation5 + $0x1760] sm:$0xff] }
 0x139   :  { %1452 = vmatpush1.msra.mxu1 %v746_v31  ;;  %1376 = vmatprep.subr.mxu0 %v351_v32  ;;  %v579_v26 = vld [vmem:[#allocation5 + $0xb08] sm:$0xff]  ;;  %v578_v27 = vld [vmem:[#allocation5 + $0xb00] sm:$0xff] }
 0x13a   :  { %1453 = vmatprep.subr.mxu1 %v735_v33  ;;  %1377 = vmatpush1.msra.mxu0 %v350_v34  ;;  %v963_v2 = vld [vmem:[#allocation5 + $0x1708] sm:$0xff]  ;;  %v962_v28 = vld [vmem:[#allocation5 + $0x1700] sm:$0xff] }
 0x13b   :  { %1454 = vmatpush1.msra.mxu1 %v734_v35  ;;  %1378 = vmatprep.subr.mxu0 %v339_v36  ;;  %v567_v5 = vld [vmem:[#allocation5 + $0xaa8] sm:$0xff]  ;;  %v566_v30 = vld [vmem:[#allocation5 + $0xaa0] sm:$0xff] }
 0x13c   :  { %1455 = vmatprep.subr.mxu1 %v723_v37  ;;  %1379 = vmatpush1.msra.mxu0 %v338_v38  ;;  %v951_v29 = vld [vmem:[#allocation5 + $0x16a8] sm:$0xff]  ;;  %v950_v31 = vld [vmem:[#allocation5 + $0x16a0] sm:$0xff] }
 0x13d   :  { %1456 = vmatpush1.msra.mxu1 %v722_v39  ;;  %1380 = vmatprep.subr.mxu0 %v327_v40  ;;  %v555_v32 = vld [vmem:[#allocation5 + $0xa48] sm:$0xff]  ;;  %v554_v34 = vld [vmem:[#allocation5 + $0xa40] sm:$0xff] }
 0x13e   :  { %1457 = vmatprep.subr.mxu1 %v711_v41  ;;  %1381 = vmatpush1.msra.mxu0 %v326_v42  ;;  %v939_v33 = vld [vmem:[#allocation5 + $0x1648] sm:$0xff]  ;;  %v938_v35 = vld [vmem:[#allocation5 + $0x1640] sm:$0xff] }
 0x13f   :  { %1458 = vmatpush1.msra.mxu1 %v710_v43  ;;  %1382 = vmatprep.subr.mxu0 %v315_v44  ;;  %v543_v36 = vld [vmem:[#allocation5 + $0x9e8] sm:$0xff]  ;;  %v542_v38 = vld [vmem:[#allocation5 + $0x9e0] sm:$0xff] }
 0x140   :  { %1459 = vmatprep.subr.mxu1 %v699_v45  ;;  %1383 = vmatpush1.msra.mxu0 %v314_v46  ;;  %v927_v37 = vld [vmem:[#allocation5 + $0x15e8] sm:$0xff]  ;;  %v926_v39 = vld [vmem:[#allocation5 + $0x15e0] sm:$0xff] }
 0x141   :  { %1460 = vmatpush1.msra.mxu1 %v698_v47  ;;  %1384 = vmatprep.subr.mxu0 %v303_v48  ;;  %v531_v40 = vld [vmem:[#allocation5 + $0x988] sm:$0xff]  ;;  %v530_v42 = vld [vmem:[#allocation5 + $0x980] sm:$0xff] }
 0x142   :  { %1461 = vmatprep.subr.mxu1 %v687_v49  ;;  %1385 = vmatpush1.msra.mxu0 %v302_v50  ;;  %v915_v41 = vld [vmem:[#allocation5 + $0x1588] sm:$0xff]  ;;  %v914_v43 = vld [vmem:[#allocation5 + $0x1580] sm:$0xff] }
 0x143   :  { %1462 = vmatpush1.msra.mxu1 %v686_v51  ;;  %1386 = vmatprep.subr.mxu0 %v291_v52  ;;  %v519_v44 = vld [vmem:[#allocation5 + $0x928] sm:$0xff]  ;;  %v518_v46 = vld [vmem:[#allocation5 + $0x920] sm:$0xff] }
 0x144   :  { %1463 = vmatprep.subr.mxu1 %v675_v53  ;;  %1387 = vmatpush1.msra.mxu0 %v290_v54  ;;  %v903_v45 = vld [vmem:[#allocation5 + $0x1528] sm:$0xff]  ;;  %v902_v47 = vld [vmem:[#allocation5 + $0x1520] sm:$0xff] }
 0x145   :  { %1464 = vmatpush1.msra.mxu1 %v674_v55  ;;  %1388 = vmatprep.subr.mxu0 %v279_v56  ;;  %v507_v48 = vld [vmem:[#allocation5 + $0x8c8] sm:$0xff]  ;;  %v506_v50 = vld [vmem:[#allocation5 + $0x8c0] sm:$0xff] }
 0x146   :  { %1465 = vmatprep.subr.mxu1 %v663_v57  ;;  %1389 = vmatpush1.msra.mxu0 %v278_v58  ;;  %v891_v49 = vld [vmem:[#allocation5 + $0x14c8] sm:$0xff]  ;;  %v890_v51 = vld [vmem:[#allocation5 + $0x14c0] sm:$0xff] }
 0x147   :  { %1466 = vmatpush1.msra.mxu1 %v662_v59  ;;  %1390 = vmatprep.subr.mxu0 %v267_v61  ;;  %v495_v52 = vld [vmem:[#allocation5 + $0x868] sm:$0xff]  ;;  %v494_v54 = vld [vmem:[#allocation5 + $0x860] sm:$0xff] }
 0x148   :  { %1467 = vmatprep.subr.mxu1 %v651_v62  ;;  %1391 = vmatpush1.msra.mxu0 %v266_v3  ;;  %v879_v53 = vld [vmem:[#allocation5 + $0x1468] sm:$0xff]  ;;  %v878_v55 = vld [vmem:[#allocation5 + $0x1460] sm:$0xff] }
 0x149   :  { %1468 = vmatpush1.msra.mxu1 %v650_v4  ;;  %1392 = vmatprep.subr.mxu0 %v255_v7  ;;  %v483_v56 = vld [vmem:[#allocation5 + $0x808] sm:$0xff]  ;;  %v482_v58 = vld [vmem:[#allocation5 + $0x800] sm:$0xff] }
 0x14a   :  { %1469 = vmatprep.subr.mxu1 %v639_v8  ;;  %1393 = vmatpush1.msra.mxu0 %v254_v10  ;;  %v867_v57 = vld [vmem:[#allocation5 + $0x1408] sm:$0xff]  ;;  %v866_v59 = vld [vmem:[#allocation5 + $0x1400] sm:$0xff] }
 0x14b   :  { %1470 = vmatpush1.msra.mxu1 %v638_v11  ;;  %1394 = vmatprep.subr.mxu0 %v243_v12  ;;  %v471_v61 = vld [vmem:[#allocation5 + $0x7a8] sm:$0xff]  ;;  %v470_v3 = vld [vmem:[#allocation5 + $0x7a0] sm:$0xff] }
 0x14c   :  { %1471 = vmatprep.subr.mxu1 %v627_v13  ;;  %1395 = vmatpush1.msra.mxu0 %v242_v14  ;;  %v855_v62 = vld [vmem:[#allocation5 + $0x13a8] sm:$0xff]  ;;  %v854_v4 = vld [vmem:[#allocation5 + $0x13a0] sm:$0xff] }
 0x14d   :  { %1472 = vmatpush1.msra.mxu1 %v626_v15  ;;  %1396 = vmatprep.subr.mxu0 %v231_v16  ;;  %v459_v7 = vld [vmem:[#allocation5 + $0x748] sm:$0xff]  ;;  %v458_v10 = vld [vmem:[#allocation5 + $0x740] sm:$0xff] }
 0x14e   :  { %1473 = vmatprep.subr.mxu1 %v615_v17  ;;  %1397 = vmatpush1.msra.mxu0 %v230_v18  ;;  %v843_v8 = vld [vmem:[#allocation5 + $0x1348] sm:$0xff]  ;;  %v842_v11 = vld [vmem:[#allocation5 + $0x1340] sm:$0xff] }
 0x14f   :  { %1474 = vmatpush1.msra.mxu1 %v614_v19  ;;  %1398 = vmatprep.subr.mxu0 %v603_v20  ;;  %v447_v12 = vld [vmem:[#allocation5 + $0x6e8] sm:$0xff]  ;;  %v446_v14 = vld [vmem:[#allocation5 + $0x6e0] sm:$0xff] }
 0x150   :  { %1475 = vmatprep.subr.mxu1 %v987_v21  ;;  %1399 = vmatpush2.msra.mxu0 %v602_v22  ;;  %v831_v13 = vld [vmem:[#allocation5 + $0x12e8] sm:$0xff]  ;;  %v830_v15 = vld [vmem:[#allocation5 + $0x12e0] sm:$0xff] }
 0x151   :  { %1476 = vmatpush2.msra.mxu1 %v986_v23  ;;  %1400 = vmatprep.subr.mxu0 %v591_v24  ;;  %v435_v16 = vld [vmem:[#allocation5 + $0x688] sm:$0xff]  ;;  %v434_v18 = vld [vmem:[#allocation5 + $0x680] sm:$0xff] }
 0x152   :  { %1477 = vmatprep.subr.mxu1 %v975_v63  ;;  %1401 = vmatpush2.msra.mxu0 %v590_v25  ;;  %v819_v17 = vld [vmem:[#allocation5 + $0x1288] sm:$0xff]  ;;  %v818_v19 = vld [vmem:[#allocation5 + $0x1280] sm:$0xff]  ;;  %v413_v63 = vld [vmem:[#allocation5 + $0x5d8] sm:$0xff] }
 0x153   :  { %1478 = vmatpush2.msra.mxu1 %v974_v1  ;;  %1402 = vmatprep.subr.mxu0 %v579_v26  ;;  %v423_v20 = vld [vmem:[#allocation5 + $0x628] sm:$0xff]  ;;  %v422_v22 = vld [vmem:[#allocation5 + $0x620] sm:$0xff]  ;;  %v5682_v25 = vld [vmem:[#allocation2 + $0x18] sm:$0xff] }
 0x154   :  { %1479 = vmatprep.subr.mxu1 %v963_v2  ;;  %1403 = vmatpush2.msra.mxu0 %v578_v27  ;;  %v807_v21 = vld [vmem:[#allocation5 + $0x1228] sm:$0xff]  ;;  %v806_v23 = vld [vmem:[#allocation5 + $0x1220] sm:$0xff]  ;;  %v412_v1 = vld [vmem:[#allocation5 + $0x5d0] sm:$0xff] }
 0x155   :  { %1480 = vmatpush2.msra.mxu1 %v962_v28  ;;  %1404 = vmatprep.subr.mxu0 %v567_v5  ;;  %v5679_v24 = vld [vmem:[#allocation2 + $0x8] sm:$0xff]  ;;  %v797_v26 = vld [vmem:[#allocation5 + $0x11d8] sm:$0xff]  ;;  %v5685_v2 = vld [vmem:[#allocation2] sm:$0xff] }
 0x156   :  { %1481 = vmatprep.subr.mxu1 %v951_v29  ;;  %1405 = vmatpush2.msra.mxu0 %v566_v30  ;;  %v5688_v27 = vld [vmem:[#allocation2 + $0x10] sm:$0xff]  ;;  %v401_v28 = vld [vmem:[#allocation5 + $0x578] sm:$0xff] }
 0x157   :  { %1482 = vmatpush2.msra.mxu1 %v950_v31  ;;  %1406 = vmatprep.subr.mxu0 %v555_v32  ;;  %v400_v5 = vld [vmem:[#allocation5 + $0x570] sm:$0xff]  ;;  %v389_v30 = vld [vmem:[#allocation5 + $0x518] sm:$0xff] }
 0x158   :  { %1483 = vmatprep.subr.mxu1 %v939_v33  ;;  %1407 = vmatpush2.msra.mxu0 %v554_v34  ;;  %v796_v29 = vld [vmem:[#allocation5 + $0x11d0] sm:$0xff]  ;;  %v377_v32 = vld [vmem:[#allocation5 + $0x4b8] sm:$0xff] }
 0x159   :  { %1484 = vmatpush2.msra.mxu1 %v938_v35  ;;  %1408 = vmatprep.subr.mxu0 %v543_v36  ;;  %v388_v31 = vld [vmem:[#allocation5 + $0x510] sm:$0xff]  ;;  %v785_v33 = vld [vmem:[#allocation5 + $0x1178] sm:$0xff] }
 0x15a   :  { %1485 = vmatprep.subr.mxu1 %v927_v37  ;;  %1409 = vmatpush2.msra.mxu0 %v542_v38  ;;  %v376_v34 = vld [vmem:[#allocation5 + $0x4b0] sm:$0xff]  ;;  %v773_v36 = vld [vmem:[#allocation5 + $0x1118] sm:$0xff] }
 0x15b   :  { %1486 = vmatpush2.msra.mxu1 %v926_v39  ;;  %1410 = vmatprep.subr.mxu0 %v531_v40  ;;  %v784_v35 = vld [vmem:[#allocation5 + $0x1170] sm:$0xff]  ;;  %v761_v39 = vld [vmem:[#allocation5 + $0x10b8] sm:$0xff] }
 0x15c   :  { %1487 = vmatprep.subr.mxu1 %v915_v41  ;;  %1411 = vmatpush2.msra.mxu0 %v530_v42  ;;  %v364_v37 = vld [vmem:[#allocation5 + $0x450] sm:$0xff]  ;;  %v341_v41 = vld [vmem:[#allocation5 + $0x398] sm:$0xff] }
 0x15d   :  { %1488 = vmatpush2.msra.mxu1 %v914_v43  ;;  %1412 = vmatprep.subr.mxu0 %v519_v44  ;;  %v772_v38 = vld [vmem:[#allocation5 + $0x1110] sm:$0xff]  ;;  %v749_v42 = vld [vmem:[#allocation5 + $0x1058] sm:$0xff] }
 0x15e   :  { %1489 = vmatprep.subr.mxu1 %v903_v45  ;;  %1413 = vmatpush2.msra.mxu0 %v518_v46  ;;  %v352_v40 = vld [vmem:[#allocation5 + $0x3f0] sm:$0xff]  ;;  %v329_v44 = vld [vmem:[#allocation5 + $0x338] sm:$0xff] }
 0x15f   :  { %1490 = vmatpush2.msra.mxu1 %v902_v47  ;;  %1414 = vmatprep.subr.mxu0 %v507_v48  ;;  %v748_v43 = vld [vmem:[#allocation5 + $0x1050] sm:$0xff]  ;;  %v737_v45 = vld [vmem:[#allocation5 + $0xff8] sm:$0xff] }
 0x160   :  { %1491 = vmatprep.subr.mxu1 %v891_v49  ;;  %1415 = vmatpush2.msra.mxu0 %v506_v50  ;;  %v328_v46 = vld [vmem:[#allocation5 + $0x330] sm:$0xff]  ;;  %v317_v48 = vld [vmem:[#allocation5 + $0x2d8] sm:$0xff] }
 0x161   :  { %1492 = vmatpush2.msra.mxu1 %v890_v51  ;;  %1416 = vmatprep.subr.mxu0 %v495_v52  ;;  %v736_v47 = vld [vmem:[#allocation5 + $0xff0] sm:$0xff]  ;;  %v725_v49 = vld [vmem:[#allocation5 + $0xf98] sm:$0xff] }
 0x162   :  { %1493 = vmatprep.subr.mxu1 %v879_v53  ;;  %1417 = vmatpush2.msra.mxu0 %v494_v54  ;;  %v316_v50 = vld [vmem:[#allocation5 + $0x2d0] sm:$0xff]  ;;  %v305_v52 = vld [vmem:[#allocation5 + $0x278] sm:$0xff] }
 0x163   :  { %1494 = vmatpush2.msra.mxu1 %v878_v55  ;;  %1418 = vmatprep.subr.mxu0 %v483_v56  ;;  %v724_v51 = vld [vmem:[#allocation5 + $0xf90] sm:$0xff]  ;;  %v713_v53 = vld [vmem:[#allocation5 + $0xf38] sm:$0xff] }
 0x164   :  { %1495 = vmatprep.subr.mxu1 %v867_v57  ;;  %1419 = vmatpush2.msra.mxu0 %v482_v58  ;;  %v304_v54 = vld [vmem:[#allocation5 + $0x270] sm:$0xff]  ;;  %v293_v56 = vld [vmem:[#allocation5 + $0x218] sm:$0xff] }
 0x165   :  { %1496 = vmatpush2.msra.mxu1 %v866_v59  ;;  %1420 = vmatprep.subr.mxu0 %v471_v61  ;;  %v712_v55 = vld [vmem:[#allocation5 + $0xf30] sm:$0xff]  ;;  %v701_v57 = vld [vmem:[#allocation5 + $0xed8] sm:$0xff] }
 0x166   :  { %1497 = vmatprep.subr.mxu1 %v855_v62  ;;  %1421 = vmatpush2.msra.mxu0 %v470_v3  ;;  %v292_v58 = vld [vmem:[#allocation5 + $0x210] sm:$0xff]  ;;  %v281_v61 = vld [vmem:[#allocation5 + $0x1b8] sm:$0xff] }
 0x167   :  { %1498 = vmatpush2.msra.mxu1 %v854_v4  ;;  %1422 = vmatprep.subr.mxu0 %v459_v7  ;;  %v700_v59 = vld [vmem:[#allocation5 + $0xed0] sm:$0xff]  ;;  %v689_v62 = vld [vmem:[#allocation5 + $0xe78] sm:$0xff] }
 0x168   :  { %1499 = vmatprep.subr.mxu1 %v843_v8  ;;  %1282 = vmatprep.mubr.f32.mxu0 %v5659_v60  ;;  %v280_v3 = vld [vmem:[#allocation5 + $0x1b0] sm:$0xff]  ;;  %v269_v7 = vld [vmem:[#allocation5 + $0x158] sm:$0xff] }
 0x169   :  { %1423 = vmatpush2.msra.mxu0 %v458_v10  ;;  %1500 = vmatpush2.msra.mxu1 %v842_v11  ;;  %v688_v4 = vld [vmem:[#allocation5 + $0xe70] sm:$0xff]  ;;  %v677_v8 = vld [vmem:[#allocation5 + $0xe18] sm:$0xff] }
 0x16a   :  { %1283 = vmatmul.mubr.f32.gmra.mxu0 %v5661_v0  ;;  %1424 = vmatprep.subr.mxu0 %v447_v12  ;;  %v268_v10 = vld [vmem:[#allocation5 + $0x150] sm:$0xff]  ;;  %v257_v12 = vld [vmem:[#allocation5 + $0xf8] sm:$0xff] }
 0x16b   :  { %1501 = vmatprep.subr.mxu1 %v831_v13  ;;  %1359 = vmatprep.mubr.f32.mxu1 %v5664_v6  ;;  %v676_v11 = vld [vmem:[#allocation5 + $0xe10] sm:$0xff]  ;;  %v665_v13 = vld [vmem:[#allocation5 + $0xdb8] sm:$0xff] }
 0x16c   :  { %1425 = vmatpush2.msra.mxu0 %v446_v14  ;;  %1502 = vmatpush2.msra.mxu1 %v830_v15  ;;  %v256_v14 = vld [vmem:[#allocation5 + $0xf0] sm:$0xff] }
 0x16d   :  { %1426 = vmatprep.subr.mxu0 %v435_v16  ;;  %1360 = vmatmul.mubr.f32.gmra.mxu1 %v5667_v9  ;;  %v664_v15 = vld [vmem:[#allocation5 + $0xdb0] sm:$0xff]  ;;  %v245_v16 = vld [vmem:[#allocation5 + $0x98] sm:$0xff] }
 0x16e   :  { %1503 = vmatprep.subr.mxu1 %v819_v17  ;;  %1427 = vmatpush2.msra.mxu0 %v434_v18  ;;  %v653_v17 = vld [vmem:[#allocation5 + $0xd58] sm:$0xff]  ;;  %v244_v18 = vld [vmem:[#allocation5 + $0x90] sm:$0xff] }
 0x16f   :  { %1504 = vmatpush2.msra.mxu1 %v818_v19  ;;  %1428 = vmatprep.subr.mxu0 %v423_v20  ;;  %v652_v19 = vld [vmem:[#allocation5 + $0xd50] sm:$0xff]  ;;  %v233_v20 = vld [vmem:[#allocation5 + $0x38] sm:$0xff] }
 0x170   :  { %1505 = vmatprep.subr.mxu1 %v807_v21  ;;  %1429 = vmatpush2.msra.mxu0 %v422_v22  ;;  %v641_v21 = vld [vmem:[#allocation5 + $0xcf8] sm:$0xff]  ;;  %v232_v22 = vld [vmem:[#allocation5 + $0x30] sm:$0xff] }
 0x171   :  { %1430 = vmatprep.mubr.f32.mxu0 %v5679_v24  ;;  %1506 = vmatpush2.msra.mxu1 %v806_v23  ;;  %v640_v23 = vld [vmem:[#allocation5 + $0xcf0] sm:$0xff] }
 0x172   :  { %1507 = vmatprep.mubr.f32.mxu1 %v5682_v25  ;;  %1431 = vmatmul.mubr.f32.vlgmr.msra.gmra.mxu0 %v5685_v2 }
 0x173   :  { %1508 = vmatmul.mubr.f32.vlgmr.msra.gmra.mxu1 %v5688_v27  ;;  %1520 = vmatprep.subr.mxu0 %v413_v63  ;;  %v605_v63 = vld [vmem:[#allocation5 + $0xbd8] sm:$0xff] }
 0x174   :  { %1436 = vmatprep.mubr.f32.mxu0 %v5659_v60  ;;  %1521 = vmatpush1.msra.mxu0 %v412_v1  ;;  %v365_v60 = vld [vmem:[#allocation5 + $0x458] sm:$0xff] }
 0x175   :  { %1597 = vmatprep.subr.mxu1 %v797_v26  ;;  %1522 = vmatprep.subr.mxu0 %v401_v28  ;;  %v629_v1 = vld [vmem:[#allocation5 + $0xc98] sm:$0xff]  ;;  %v604_v26 = vld [vmem:[#allocation5 + $0xbd0] sm:$0xff] }
 0x176   :  { %1513 = vmatprep.mubr.f32.mxu1 %v5664_v6  ;;  %1523 = vmatpush1.msra.mxu0 %v400_v5  ;;  %v353_v6 = vld [vmem:[#allocation5 + $0x3f8] sm:$0xff]  ;;  %v628_v28 = vld [vmem:[#allocation5 + $0xc90] sm:$0xff] }
 0x177   :  { %1598 = vmatpush1.msra.mxu1 %v796_v29  ;;  %1437 = vmatmul.mubr.f32.gmra.mxu0 %v5661_v0  ;;  %v760_v0 = vld [vmem:[#allocation5 + $0x10b0] sm:$0xff]  ;;  %v593_v5 = vld [vmem:[#allocation5 + $0xb78] sm:$0xff] }
 0x178   :  { %1524 = vmatprep.subr.mxu0 %v389_v30  ;;  %1514 = vmatmul.mubr.f32.gmra.mxu1 %v5667_v9  ;;  %v340_v9 = vld [vmem:[#allocation5 + $0x390] sm:$0xff]  ;;  %v617_v29 = vld [vmem:[#allocation5 + $0xc38] sm:$0xff] }
 0x179   :  { %1525 = vmatpush1.msra.mxu0 %v388_v31  ;;  %1599 = vmatprep.subr.mxu1 %v785_v33  ;;  %v592_v30 = vld [vmem:[#allocation5 + $0xb70] sm:$0xff]  ;;  %v989_v33 = vld [vmem:[#allocation5 + $0x17d8] sm:$0xff] }
 0x17a   :  { %1526 = vmatprep.subr.mxu0 %v377_v32  ;;  %1600 = vmatpush1.msra.mxu1 %v784_v35  ;;  %v616_v31 = vld [vmem:[#allocation5 + $0xc30] sm:$0xff]  ;;  %v581_v32 = vld [vmem:[#allocation5 + $0xb18] sm:$0xff] }
 0x17b   :  { %1527 = vmatpush1.msra.mxu0 %v376_v34  ;;  %1601 = vmatprep.subr.mxu1 %v773_v36  ;;  %v580_v34 = vld [vmem:[#allocation5 + $0xb10] sm:$0xff]  ;;  %v977_v36 = vld [vmem:[#allocation5 + $0x1778] sm:$0xff] }
 0x17c   :  { %1528 = vmatprep.subr.mxu0 %v365_v60  ;;  %1602 = vmatpush1.msra.mxu1 %v772_v38  ;;  %v988_v35 = vld [vmem:[#allocation5 + $0x17d0] sm:$0xff]  ;;  %v569_v60 = vld [vmem:[#allocation5 + $0xab8] sm:$0xff] }
 0x17d   :  { %1529 = vmatpush1.msra.mxu0 %v364_v37  ;;  %1603 = vmatprep.subr.mxu1 %v761_v39  ;;  %v568_v37 = vld [vmem:[#allocation5 + $0xab0] sm:$0xff]  ;;  %v965_v39 = vld [vmem:[#allocation5 + $0x1718] sm:$0xff] }
 0x17e   :  { %1530 = vmatprep.subr.mxu0 %v353_v6  ;;  %1604 = vmatpush1.msra.mxu1 %v760_v0  ;;  %v976_v38 = vld [vmem:[#allocation5 + $0x1770] sm:$0xff]  ;;  %v557_v6 = vld [vmem:[#allocation5 + $0xa58] sm:$0xff] }
 0x17f   :  { %1531 = vmatpush1.msra.mxu0 %v352_v40  ;;  %1605 = vmatprep.subr.mxu1 %v749_v42  ;;  %v556_v40 = vld [vmem:[#allocation5 + $0xa50] sm:$0xff]  ;;  %v953_v42 = vld [vmem:[#allocation5 + $0x16b8] sm:$0xff] }
 0x180   :  { %1532 = vmatprep.subr.mxu0 %v341_v41  ;;  %1606 = vmatpush1.msra.mxu1 %v748_v43  ;;  %v964_v0 = vld [vmem:[#allocation5 + $0x1710] sm:$0xff]  ;;  %v545_v41 = vld [vmem:[#allocation5 + $0x9f8] sm:$0xff] }
 0x181   :  { %1533 = vmatpush1.msra.mxu0 %v340_v9  ;;  %1607 = vmatprep.subr.mxu1 %v737_v45  ;;  %v544_v9 = vld [vmem:[#allocation5 + $0x9f0] sm:$0xff]  ;;  %v941_v45 = vld [vmem:[#allocation5 + $0x1658] sm:$0xff] }
 0x182   :  { %1534 = vmatprep.subr.mxu0 %v329_v44  ;;  %1608 = vmatpush1.msra.mxu1 %v736_v47  ;;  %v952_v43 = vld [vmem:[#allocation5 + $0x16b0] sm:$0xff]  ;;  %v533_v44 = vld [vmem:[#allocation5 + $0x998] sm:$0xff] }
 0x183   :  { %1535 = vmatpush1.msra.mxu0 %v328_v46  ;;  %1609 = vmatprep.subr.mxu1 %v725_v49  ;;  %v998_v46 = vlaneseq  ;;  %v532_v47 = vld [vmem:[#allocation5 + $0x990] sm:$0xff]  ;;  %v521_v49 = vld [vmem:[#allocation5 + $0x938] sm:$0xff] }
 0x184   :  { %1536 = vmatprep.subr.mxu0 %v317_v48  ;;  %1610 = vmatpush1.msra.mxu1 %v724_v51  ;;  %v940_v48 = vld [vmem:[#allocation5 + $0x1650] sm:$0xff] }
 0x185   :  { %1537 = vmatpush1.msra.mxu0 %v316_v50  ;;  %1611 = vmatprep.subr.mxu1 %v713_v53  ;;  %v929_v50 = vld [vmem:[#allocation5 + $0x15f8] sm:$0xff]  ;;  %v520_v51 = vld [vmem:[#allocation5 + $0x930] sm:$0xff] }
 0x186   :  { %1538 = vmatprep.subr.mxu0 %v305_v52  ;;  %1612 = vmatpush1.msra.mxu1 %v712_v55  ;;  %v928_v52 = vld [vmem:[#allocation5 + $0x15f0] sm:$0xff]  ;;  %v509_v53 = vld [vmem:[#allocation5 + $0x8d8] sm:$0xff]  ;;  %v5696_v55 = vshrl.u32 %v998_v46, 7 }
 0x187   :  { %1539 = vmatpush1.msra.mxu0 %v304_v54  ;;  %1613 = vmatprep.subr.mxu1 %v701_v57  ;;  %v917_v54 = vld [vmem:[#allocation5 + $0x1598] sm:$0xff]  ;;  %v916_v57 = vld [vmem:[#allocation5 + $0x1590] sm:$0xff] }
 0x188   :  { %1540 = vmatprep.subr.mxu0 %v293_v56  ;;  %1614 = vmatpush1.msra.mxu1 %v700_v59  ;;  %v508_v56 = vld [vmem:[#allocation5 + $0x8d0] sm:$0xff]  ;;  %v905_v59 = vld [vmem:[#allocation5 + $0x1538] sm:$0xff] }
 0x189   :  { %1541 = vmatpush1.msra.mxu0 %v292_v58  ;;  %1615 = vmatprep.subr.mxu1 %v689_v62  ;;  %v497_v58 = vld [vmem:[#allocation5 + $0x878] sm:$0xff]  ;;  %v904_v62 = vld [vmem:[#allocation5 + $0x1530] sm:$0xff] }
 0x18a   :  { %1542 = vmatprep.subr.mxu0 %v281_v61  ;;  %1616 = vmatpush1.msra.mxu1 %v688_v4  ;;  %v496_v61 = vld [vmem:[#allocation5 + $0x870] sm:$0xff]  ;;  %v893_v4 = vld [vmem:[#allocation5 + $0x14d8] sm:$0xff] }
 0x18b   :  { %1543 = vmatpush1.msra.mxu0 %v280_v3  ;;  %1617 = vmatprep.subr.mxu1 %v677_v8  ;;  %v485_v3 = vld [vmem:[#allocation5 + $0x818] sm:$0xff]  ;;  %v484_v8 = vld [vmem:[#allocation5 + $0x810] sm:$0xff] }
 0x18c   :  { %1544 = vmatprep.subr.mxu0 %v269_v7  ;;  %1618 = vmatpush1.msra.mxu1 %v676_v11  ;;  %v5699_v7 = vsub.s32 1, %v5696_v55  ;;  %v5701_v11 = vld [vmem:[#allocation7] sm:$0xff] }
 0x18d   :  { %1545 = vmatpush1.msra.mxu0 %v268_v10  ;;  %1619 = vmatprep.subr.mxu1 %v665_v13  ;;  %v892_v10 = vld [vmem:[#allocation5 + $0x14d0] sm:$0xff]  ;;  %v881_v13 = vld [vmem:[#allocation5 + $0x1478] sm:$0xff] }
 0x18e   :  { %1546 = vmatprep.subr.mxu0 %v257_v12  ;;  %1620 = vmatpush1.msra.mxu1 %v664_v15  ;;  %v473_v12 = vld [vmem:[#allocation5 + $0x7b8] sm:$0xff]  ;;  %v880_v15 = vld [vmem:[#allocation5 + $0x1470] sm:$0xff] }
 0x18f   :  { %1547 = vmatpush1.msra.mxu0 %v256_v14  ;;  %1621 = vmatprep.subr.mxu1 %v653_v17  ;;  %v472_v14 = vld [vmem:[#allocation5 + $0x7b0] sm:$0xff]  ;;  %v869_v17 = vld [vmem:[#allocation5 + $0x1418] sm:$0xff] }
 0x190   :  { %1548 = vmatprep.subr.mxu0 %v245_v16  ;;  %1622 = vmatpush1.msra.mxu1 %v652_v19  ;;  %v461_v16 = vld [vmem:[#allocation5 + $0x758] sm:$0xff]  ;;  %v460_v19 = vld [vmem:[#allocation5 + $0x750] sm:$0xff] }
 0x191   :  { %1549 = vmatpush1.msra.mxu0 %v244_v18  ;;  %1623 = vmatprep.subr.mxu1 %v641_v21  ;;  %v5705_v18 = vrot.slane %v5701_v11, %v5699_v7 }
 0x192   :  { %1550 = vmatprep.subr.mxu0 %v233_v20  ;;  %1624 = vmatpush1.msra.mxu1 %v640_v23  ;;  %v868_v20 = vld [vmem:[#allocation5 + $0x1410] sm:$0xff]  ;;  %v857_v23 = vld [vmem:[#allocation5 + $0x13b8] sm:$0xff] }
 0x193   :  { %1551 = vmatpush1.msra.mxu0 %v232_v22  ;;  %1625 = vmatprep.subr.mxu1 %v629_v1  ;;  %v449_v22 = vld [vmem:[#allocation5 + $0x6f8] sm:$0xff]  ;;  %v856_v1 = vld [vmem:[#allocation5 + $0x13b0] sm:$0xff] }
 0x194   :  { %1552 = vmatprep.subr.mxu0 %v605_v63  ;;  %1626 = vmatpush1.msra.mxu1 %v628_v28  ;;  %v448_v63 = vld [vmem:[#allocation5 + $0x6f0] sm:$0xff] }
 0x195   :  { %1553 = vmatpush2.msra.mxu0 %v604_v26  ;;  %1627 = vmatprep.subr.mxu1 %v617_v29  ;;  %v845_v29 = vld [vmem:[#allocation5 + $0x1358] sm:$0xff] }
 0x196   :  { %1554 = vmatprep.subr.mxu0 %v593_v5  ;;  %1628 = vmatpush1.msra.mxu1 %v616_v31  ;;  %v437_v5 = vld [vmem:[#allocation5 + $0x698] sm:$0xff]  ;;  %v436_v31 = vld [vmem:[#allocation5 + $0x690] sm:$0xff] }
 0x197   :  { %1555 = vmatpush2.msra.mxu0 %v592_v30  ;;  %1629 = vmatprep.subr.mxu1 %v989_v33 }
 0x198   :  { %1556 = vmatprep.subr.mxu0 %v581_v32  ;;  %1630 = vmatpush2.msra.mxu1 %v988_v35  ;;  %v844_v32 = vld [vmem:[#allocation5 + $0x1350] sm:$0xff]  ;;  %v833_v35 = vld [vmem:[#allocation5 + $0x12f8] sm:$0xff] }
 0x199   :  { %1557 = vmatpush2.msra.mxu0 %v580_v34  ;;  %1631 = vmatprep.subr.mxu1 %v977_v36  ;;  %v425_v34 = vld [vmem:[#allocation5 + $0x638] sm:$0xff]  ;;  %v424_v36 = vld [vmem:[#allocation5 + $0x630] sm:$0xff] }
 0x19a   :  { %1558 = vmatprep.subr.mxu0 %v569_v60  ;;  %1632 = vmatpush2.msra.mxu1 %v976_v38  ;;  %v821_v38 = vld [vmem:[#allocation5 + $0x1298] sm:$0xff] }
 0x19b   :  { %1559 = vmatpush2.msra.mxu0 %v568_v37  ;;  %1633 = vmatprep.subr.mxu1 %v965_v39  ;;  %v832_v37 = vld [vmem:[#allocation5 + $0x12f0] sm:$0xff] }
 0x19c   :  { %1560 = vmatprep.subr.mxu0 %v557_v6  ;;  %1634 = vmatpush2.msra.mxu1 %v964_v0  ;;  %v415_v6 = vld [vmem:[#allocation5 + $0x5e8] sm:$0xff]  ;;  %v820_v39 = vld [vmem:[#allocation5 + $0x1290] sm:$0xff]  ;;  %v809_v0 = vld [vmem:[#allocation5 + $0x1238] sm:$0xff] }
 0x19d   :  { %1561 = vmatpush2.msra.mxu0 %v556_v40  ;;  %1635 = vmatprep.subr.mxu1 %v953_v42  ;;  %v414_v40 = vld [vmem:[#allocation5 + $0x5e0] sm:$0xff]  ;;  %v808_v42 = vld [vmem:[#allocation5 + $0x1230] sm:$0xff] }
 0x19e   :  { %1562 = vmatprep.subr.mxu0 %v545_v41  ;;  %1636 = vmatpush2.msra.mxu1 %v952_v43  ;;  %v403_v41 = vld [vmem:[#allocation5 + $0x588] sm:$0xff] }
 0x19f   :  { %1563 = vmatpush2.msra.mxu0 %v544_v9  ;;  %1637 = vmatprep.subr.mxu1 %v941_v45  ;;  %v402_v9 = vld [vmem:[#allocation5 + $0x580] sm:$0xff]  ;;  %v391_v43 = vld [vmem:[#allocation5 + $0x528] sm:$0xff] }
 0x1a0   :  { %1564 = vmatprep.subr.mxu0 %v533_v44  ;;  %1638 = vmatpush2.msra.mxu1 %v940_v48  ;;  %v799_v44 = vld [vmem:[#allocation5 + $0x11e8] sm:$0xff]  ;;  %v390_v45 = vld [vmem:[#allocation5 + $0x520] sm:$0xff] }
 0x1a1   :  { %1565 = vmatpush2.msra.mxu0 %v532_v47  ;;  %1639 = vmatprep.subr.mxu1 %v929_v50  ;;  %v798_v47 = vld [vmem:[#allocation5 + $0x11e0] sm:$0xff]  ;;  %v787_v48 = vld [vmem:[#allocation5 + $0x1188] sm:$0xff] }
 0x1a2   :  { %1566 = vmatprep.subr.mxu0 %v521_v49  ;;  %1640 = vmatpush2.msra.mxu1 %v928_v52  ;;  %v786_v49 = vld [vmem:[#allocation5 + $0x1180] sm:$0xff]  ;;  %v367_v50 = vld [vmem:[#allocation5 + $0x468] sm:$0xff] }
 0x1a3   :  { %1567 = vmatpush2.msra.mxu0 %v520_v51  ;;  %1641 = vmatprep.subr.mxu1 %v917_v54  ;;  %v775_v51 = vld [vmem:[#allocation5 + $0x1128] sm:$0xff]  ;;  %v366_v52 = vld [vmem:[#allocation5 + $0x460] sm:$0xff] }
 0x1a4   :  { %1568 = vmatprep.subr.mxu0 %v509_v53  ;;  %1642 = vmatpush2.msra.mxu1 %v916_v57  ;;  %v774_v53 = vld [vmem:[#allocation5 + $0x1120] sm:$0xff]  ;;  %v355_v54 = vld [vmem:[#allocation5 + $0x408] sm:$0xff] }
 0x1a5   :  { %1569 = vmatpush2.msra.mxu0 %v508_v56  ;;  %1643 = vmatprep.subr.mxu1 %v905_v59  ;;  %v354_v56 = vld [vmem:[#allocation5 + $0x400] sm:$0xff] }
 0x1a6   :  { %1570 = vmatprep.subr.mxu0 %v497_v58  ;;  %1644 = vmatpush2.msra.mxu1 %v904_v62  ;;  %v762_v57 = vld [vmem:[#allocation5 + $0x10c0] sm:$0xff]  ;;  %v751_v58 = vld [vmem:[#allocation5 + $0x1068] sm:$0xff] }
 0x1a7   :  { %1571 = vmatpush2.msra.mxu0 %v496_v61  ;;  %1645 = vmatprep.subr.mxu1 %v893_v4  ;;  %v342_v59 = vld [vmem:[#allocation5 + $0x3a0] sm:$0xff]  ;;  %v331_v62 = vld [vmem:[#allocation5 + $0x348] sm:$0xff] }
 0x1a8   :  { %1572 = vmatprep.subr.mxu0 %v485_v3  ;;  %1646 = vmatpush2.msra.mxu1 %v892_v10  ;;  %v750_v61 = vld [vmem:[#allocation5 + $0x1060] sm:$0xff]  ;;  %v739_v3 = vld [vmem:[#allocation5 + $0x1008] sm:$0xff] }
 0x1a9   :  { %1573 = vmatpush2.msra.mxu0 %v484_v8  ;;  %1647 = vmatprep.subr.mxu1 %v881_v13  ;;  %v330_v4 = vld [vmem:[#allocation5 + $0x340] sm:$0xff]  ;;  %v319_v10 = vld [vmem:[#allocation5 + $0x2e8] sm:$0xff] }
 0x1aa   :  { %1574 = vmatprep.subr.mxu0 %v473_v12  ;;  %v5707_v21 = vpop.f32.mrf.mxu0  ;;  %1648 = vmatpush2.msra.mxu1 %v880_v15  ;;  %v738_v8 = vld [vmem:[#allocation5 + $0x1000] sm:$0xff]  ;;  %v727_v12 = vld [vmem:[#allocation5 + $0xfa8] sm:$0xff] }
 0x1ab   :  { %1575 = vmatpush2.msra.mxu0 %v472_v14  ;;  %1649 = vmatprep.subr.mxu1 %v869_v17  ;;  %v318_v13 = vld [vmem:[#allocation5 + $0x2e0] sm:$0xff]  ;;  %v307_v15 = vld [vmem:[#allocation5 + $0x288] sm:$0xff] }
 0x1ac   :  { %1576 = vmatprep.subr.mxu0 %v461_v16  ;;  %v5709_v26 = vpop.f32.mrf.mxu1  ;;  %v1126_v28 = vpop.f32.mrf.mxu0  ;;  %1650 = vmatpush2.msra.mxu1 %v868_v20  ;;  %v726_v14 = vld [vmem:[#allocation5 + $0xfa0] sm:$0xff]  ;;  %v715_v16 = vld [vmem:[#allocation5 + $0xf48] sm:$0xff] }
 0x1ad   :  { %1577 = vmatpush2.msra.mxu0 %v460_v19  ;;  %v1127_v30 = vadd.f32 %v1126_v28, %v5705_v18  ;;  %1651 = vmatprep.subr.mxu1 %v857_v23  ;;  %v306_v17 = vld [vmem:[#allocation5 + $0x280] sm:$0xff]  ;;  %v295_v20 = vld [vmem:[#allocation5 + $0x228] sm:$0xff] }
 0x1ae   :  { %1578 = vmatprep.subr.mxu0 %v449_v22  ;;  %v1203_v33 = vpop.f32.mrf.mxu1  ;;  %1652 = vmatpush2.msra.mxu1 %v856_v1  ;;  %v714_v19 = vld [vmem:[#allocation5 + $0xf40] sm:$0xff]  ;;  %v703_v22 = vld [vmem:[#allocation5 + $0xee8] sm:$0xff] }
 0x1af   :  { %1579 = vmatpush2.msra.mxu0 %v448_v63  ;;  %v5712_v60 = vadd.f32 %v1203_v33, %v1127_v30  ;;  %1653 = vmatprep.subr.mxu1 %v845_v29  ;;  %v294_v23 = vld [vmem:[#allocation5 + $0x220] sm:$0xff]  ;;  %v283_v1 = vld [vmem:[#allocation5 + $0x1c8] sm:$0xff] }
 0x1b0   :  { %1580 = vmatprep.subr.mxu0 %v437_v5  ;;  %1654 = vmatpush2.msra.mxu1 %v844_v32  ;;  %v702_v63 = vld [vmem:[#allocation5 + $0xee0] sm:$0xff]  ;;  %v691_v28 = vld [vmem:[#allocation5 + $0xe88] sm:$0xff] }
 0x1b1   :  { %1581 = vmatpush2.msra.mxu0 %v436_v31  ;;  %1655 = vmatprep.subr.mxu1 %v833_v35  ;;  %v282_v5 = vld [vmem:[#allocation5 + $0x1c0] sm:$0xff]  ;;  %v271_v30 = vld [vmem:[#allocation5 + $0x168] sm:$0xff] }
 0x1b2   :  { %1582 = vmatprep.subr.mxu0 %v425_v34  ;;  %1656 = vmatpush2.msra.mxu1 %v832_v37  ;;  %v690_v29 = vld [vmem:[#allocation5 + $0xe80] sm:$0xff]  ;;  %v679_v31 = vld [vmem:[#allocation5 + $0xe28] sm:$0xff] }
 0x1b3   :  { %1583 = vmatpush2.msra.mxu0 %v424_v36  ;;  %1584 = vmatprep.mubr.f32.mxu0 %v5679_v24  ;;  %v379_v24 = vld [vmem:[#allocation5 + $0x4c8] sm:$0xff]  ;;  %v270_v32 = vld [vmem:[#allocation5 + $0x160] sm:$0xff] }
 0x1b4   :  { %1657 = vmatprep.subr.mxu1 %v821_v38  ;;  %1674 = vmatprep.subr.mxu0 %v415_v6  ;;  %v678_v33 = vld [vmem:[#allocation5 + $0xe20] sm:$0xff]  ;;  %v259_v34 = vld [vmem:[#allocation5 + $0x108] sm:$0xff] }
 0x1b5   :  { %1585 = vmatmul.mubr.f32.vlgmr.msra.gmra.mxu0 %v5685_v2  ;;  %1658 = vmatpush2.msra.mxu1 %v820_v39  ;;  %v378_v2 = vld [vmem:[#allocation5 + $0x4c0] sm:$0xff]  ;;  %v667_v35 = vld [vmem:[#allocation5 + $0xdc8] sm:$0xff] }
 0x1b6   :  { %1675 = vmatpush1.msra.mxu0 %v414_v40  ;;  %1659 = vmatprep.subr.mxu1 %v809_v0  ;;  %v258_v36 = vld [vmem:[#allocation5 + $0x100] sm:$0xff]  ;;  %v247_v38 = vld [vmem:[#allocation5 + $0xa8] sm:$0xff] }
 0x1b7   :  { %1676 = vmatprep.subr.mxu0 %v403_v41  ;;  %1660 = vmatpush2.msra.mxu1 %v808_v42  ;;  %v666_v37 = vld [vmem:[#allocation5 + $0xdc0] sm:$0xff]  ;;  %v655_v6 = vld [vmem:[#allocation5 + $0xd68] sm:$0xff] }
 0x1b8   :  { %1677 = vmatpush1.msra.mxu0 %v402_v9  ;;  %1661 = vmatprep.mubr.f32.mxu1 %v5682_v25  ;;  %v763_v25 = vld [vmem:[#allocation5 + $0x10c8] sm:$0xff]  ;;  %v246_v39 = vld [vmem:[#allocation5 + $0xa0] sm:$0xff] }
 0x1b9   :  { %1678 = vmatprep.subr.mxu0 %v391_v43  ;;  %1751 = vmatprep.subr.mxu1 %v799_v44  ;;  %v654_v40 = vld [vmem:[#allocation5 + $0xd60] sm:$0xff]  ;;  %v235_v0 = vld [vmem:[#allocation5 + $0x48] sm:$0xff] }
 0x1ba   :  { %1662 = vmatmul.mubr.f32.vlgmr.msra.gmra.mxu1 %v5688_v27  ;;  %1679 = vmatpush1.msra.mxu0 %v390_v45  ;;  %v343_v27 = vld [vmem:[#allocation5 + $0x3a8] sm:$0xff]  ;;  %v234_v42 = vld [vmem:[#allocation5 + $0x40] sm:$0xff] }
 0x1bb   :  { %1752 = vmatpush1.msra.mxu1 %v798_v47  ;;  %1680 = vmatprep.subr.mxu0 %v379_v24  ;;  %v643_v41 = vld [vmem:[#allocation5 + $0xd08] sm:$0xff]  ;;  %v642_v9 = vld [vmem:[#allocation5 + $0xd00] sm:$0xff] }
 0x1bc   :  { %1753 = vmatprep.subr.mxu1 %v787_v48  ;;  %1681 = vmatpush1.msra.mxu0 %v378_v2  ;;  %v607_v43 = vld [vmem:[#allocation5 + $0xbe8] sm:$0xff]  ;;  %v606_v45 = vld [vmem:[#allocation5 + $0xbe0] sm:$0xff] }
 0x1bd   :  { %1754 = vmatpush1.msra.mxu1 %v786_v49  ;;  %1682 = vmatprep.subr.mxu0 %v367_v50  ;;  %v631_v44 = vld [vmem:[#allocation5 + $0xca8] sm:$0xff]  ;;  %v630_v47 = vld [vmem:[#allocation5 + $0xca0] sm:$0xff] }
 0x1be   :  { %1755 = vmatprep.subr.mxu1 %v775_v51  ;;  %1683 = vmatpush1.msra.mxu0 %v366_v52  ;;  %v595_v24 = vld [vmem:[#allocation5 + $0xb88] sm:$0xff]  ;;  %v594_v2 = vld [vmem:[#allocation5 + $0xb80] sm:$0xff] }
 0x1bf   :  { %1756 = vmatpush1.msra.mxu1 %v774_v53  ;;  %1684 = vmatprep.subr.mxu0 %v355_v54  ;;  %v619_v48 = vld [vmem:[#allocation5 + $0xc48] sm:$0xff]  ;;  %v618_v49 = vld [vmem:[#allocation5 + $0xc40] sm:$0xff] }
 0x1c0   :  { %1757 = vmatprep.subr.mxu1 %v763_v25  ;;  %1685 = vmatpush1.msra.mxu0 %v354_v56  ;;  %v583_v50 = vld [vmem:[#allocation5 + $0xb28] sm:$0xff]  ;;  %v582_v52 = vld [vmem:[#allocation5 + $0xb20] sm:$0xff] }
 0x1c1   :  { %1758 = vmatpush1.msra.mxu1 %v762_v57  ;;  %1686 = vmatprep.subr.mxu0 %v343_v27  ;;  %v991_v51 = vld [vmem:[#allocation5 + $0x17e8] sm:$0xff]  ;;  %v990_v53 = vld [vmem:[#allocation5 + $0x17e0] sm:$0xff] }
 0x1c2   :  { %1759 = vmatprep.subr.mxu1 %v751_v58  ;;  %1687 = vmatpush1.msra.mxu0 %v342_v59  ;;  %v571_v54 = vld [vmem:[#allocation5 + $0xac8] sm:$0xff]  ;;  %v570_v56 = vld [vmem:[#allocation5 + $0xac0] sm:$0xff] }
 0x1c3   :  { %1760 = vmatpush1.msra.mxu1 %v750_v61  ;;  %1688 = vmatprep.subr.mxu0 %v331_v62  ;;  %v979_v25 = vld [vmem:[#allocation5 + $0x1788] sm:$0xff]  ;;  %v978_v57 = vld [vmem:[#allocation5 + $0x1780] sm:$0xff] }
 0x1c4   :  { %1761 = vmatprep.subr.mxu1 %v739_v3  ;;  %1689 = vmatpush1.msra.mxu0 %v330_v4  ;;  %v559_v27 = vld [vmem:[#allocation5 + $0xa68] sm:$0xff]  ;;  %v558_v59 = vld [vmem:[#allocation5 + $0xa60] sm:$0xff] }
 0x1c5   :  { %1762 = vmatpush1.msra.mxu1 %v738_v8  ;;  %1690 = vmatprep.subr.mxu0 %v319_v10  ;;  %v967_v58 = vld [vmem:[#allocation5 + $0x1728] sm:$0xff]  ;;  %v966_v61 = vld [vmem:[#allocation5 + $0x1720] sm:$0xff] }
 0x1c6   :  { %1763 = vmatprep.subr.mxu1 %v727_v12  ;;  %1691 = vmatpush1.msra.mxu0 %v318_v13  ;;  %v547_v62 = vld [vmem:[#allocation5 + $0xa08] sm:$0xff]  ;;  %v546_v4 = vld [vmem:[#allocation5 + $0xa00] sm:$0xff] }
 0x1c7   :  { %1764 = vmatpush1.msra.mxu1 %v726_v14  ;;  %1692 = vmatprep.subr.mxu0 %v307_v15  ;;  %v955_v3 = vld [vmem:[#allocation5 + $0x16c8] sm:$0xff]  ;;  %v954_v8 = vld [vmem:[#allocation5 + $0x16c0] sm:$0xff] }
 0x1c8   :  { %1765 = vmatprep.subr.mxu1 %v715_v16  ;;  %1693 = vmatpush1.msra.mxu0 %v306_v17  ;;  %v535_v10 = vld [vmem:[#allocation5 + $0x9a8] sm:$0xff]  ;;  %v534_v13 = vld [vmem:[#allocation5 + $0x9a0] sm:$0xff] }
 0x1c9   :  { %1766 = vmatpush1.msra.mxu1 %v714_v19  ;;  %1694 = vmatprep.subr.mxu0 %v295_v20  ;;  %v943_v12 = vld [vmem:[#allocation5 + $0x1668] sm:$0xff]  ;;  %v942_v14 = vld [vmem:[#allocation5 + $0x1660] sm:$0xff] }
 0x1ca   :  { %1767 = vmatprep.subr.mxu1 %v703_v22  ;;  %1695 = vmatpush1.msra.mxu0 %v294_v23  ;;  %v523_v15 = vld [vmem:[#allocation5 + $0x948] sm:$0xff]  ;;  %v522_v17 = vld [vmem:[#allocation5 + $0x940] sm:$0xff] }
 0x1cb   :  { %1768 = vmatpush1.msra.mxu1 %v702_v63  ;;  %1696 = vmatprep.subr.mxu0 %v283_v1  ;;  %v931_v16 = vld [vmem:[#allocation5 + $0x1608] sm:$0xff]  ;;  %v930_v19 = vld [vmem:[#allocation5 + $0x1600] sm:$0xff] }
 0x1cc   :  { %1769 = vmatprep.subr.mxu1 %v691_v28  ;;  %1697 = vmatpush1.msra.mxu0 %v282_v5  ;;  %v511_v20 = vld [vmem:[#allocation5 + $0x8e8] sm:$0xff]  ;;  %v510_v23 = vld [vmem:[#allocation5 + $0x8e0] sm:$0xff] }
 0x1cd   :  { %1770 = vmatpush1.msra.mxu1 %v690_v29  ;;  %1698 = vmatprep.subr.mxu0 %v271_v30  ;;  %v919_v22 = vld [vmem:[#allocation5 + $0x15a8] sm:$0xff]  ;;  %v918_v63 = vld [vmem:[#allocation5 + $0x15a0] sm:$0xff] }
 0x1ce   :  { %1771 = vmatprep.subr.mxu1 %v679_v31  ;;  %1699 = vmatpush1.msra.mxu0 %v270_v32  ;;  %v499_v1 = vld [vmem:[#allocation5 + $0x888] sm:$0xff]  ;;  %v498_v5 = vld [vmem:[#allocation5 + $0x880] sm:$0xff] }
 0x1cf   :  { %1772 = vmatpush1.msra.mxu1 %v678_v33  ;;  %1700 = vmatprep.subr.mxu0 %v259_v34  ;;  %v907_v28 = vld [vmem:[#allocation5 + $0x1548] sm:$0xff]  ;;  %v906_v29 = vld [vmem:[#allocation5 + $0x1540] sm:$0xff]  ;;  %v5721_v33 = vsub.s32 2, %v5696_v55 }
 0x1d0   :  { %1773 = vmatprep.subr.mxu1 %v667_v35  ;;  %1701 = vmatpush1.msra.mxu0 %v258_v36  ;;  %v487_v30 = vld [vmem:[#allocation5 + $0x828] sm:$0xff]  ;;  %v486_v34 = vld [vmem:[#allocation5 + $0x820] sm:$0xff] }
 0x1d1   :  { %1774 = vmatpush1.msra.mxu1 %v666_v37  ;;  %1702 = vmatprep.subr.mxu0 %v247_v38  ;;  %v895_v31 = vld [vmem:[#allocation5 + $0x14e8] sm:$0xff]  ;;  %v894_v35 = vld [vmem:[#allocation5 + $0x14e0] sm:$0xff] }
 0x1d2   :  { %1775 = vmatprep.subr.mxu1 %v655_v6  ;;  %1703 = vmatpush1.msra.mxu0 %v246_v39  ;;  %v475_v36 = vld [vmem:[#allocation5 + $0x7c8] sm:$0xff]  ;;  %v5724_v6 = vsub.s32 3, %v5696_v55  ;;  %v474_v39 = vld [vmem:[#allocation5 + $0x7c0] sm:$0xff] }
 0x1d3   :  { %1776 = vmatpush1.msra.mxu1 %v654_v40  ;;  %1704 = vmatprep.subr.mxu0 %v235_v0  ;;  %v883_v37 = vld [vmem:[#allocation5 + $0x1488] sm:$0xff]  ;;  %v882_v40 = vld [vmem:[#allocation5 + $0x1480] sm:$0xff] }
 0x1d4   :  { %1777 = vmatprep.subr.mxu1 %v643_v41  ;;  %1705 = vmatpush1.msra.mxu0 %v234_v42  ;;  %v463_v42 = vld [vmem:[#allocation5 + $0x768] sm:$0xff] }
 0x1d5   :  { %1778 = vmatpush1.msra.mxu1 %v642_v9  ;;  %1706 = vmatprep.subr.mxu0 %v607_v43  ;;  %v871_v9 = vld [vmem:[#allocation5 + $0x1428] sm:$0xff]  ;;  %v5731_v43 = vrot.slane %v5701_v11, %v5721_v33 }
 0x1d6   :  { %1779 = vmatprep.subr.mxu1 %v631_v44  ;;  %1707 = vmatpush2.msra.mxu0 %v606_v45  ;;  %v462_v44 = vld [vmem:[#allocation5 + $0x760] sm:$0xff] }
 0x1d7   :  { %1780 = vmatpush1.msra.mxu1 %v630_v47  ;;  %1708 = vmatprep.subr.mxu0 %v595_v24  ;;  %v870_v45 = vld [vmem:[#allocation5 + $0x1420] sm:$0xff]  ;;  %v451_v24 = vld [vmem:[#allocation5 + $0x708] sm:$0xff] }
 0x1d8   :  { %1781 = vmatprep.subr.mxu1 %v619_v48  ;;  %1709 = vmatpush2.msra.mxu0 %v594_v2  ;;  %v859_v48 = vld [vmem:[#allocation5 + $0x13c8] sm:$0xff]  ;;  %v5737_v2 = vrot.slane %v5701_v11, %v5724_v6  ;;  %v846_v11 = vld [vmem:[#allocation5 + $0x1360] sm:$0xff] }
 0x1d9   :  { %1782 = vmatpush1.msra.mxu1 %v618_v49  ;;  %1710 = vmatprep.subr.mxu0 %v583_v50  ;;  %v450_v49 = vld [vmem:[#allocation5 + $0x700] sm:$0xff] }
 0x1da   :  { %1783 = vmatprep.subr.mxu1 %v991_v51  ;;  %1711 = vmatpush2.msra.mxu0 %v582_v52  ;;  %v858_v50 = vld [vmem:[#allocation5 + $0x13c0] sm:$0xff]  ;;  %v439_v52 = vld [vmem:[#allocation5 + $0x6a8] sm:$0xff] }
 0x1db   :  { %1784 = vmatpush2.msra.mxu1 %v990_v53  ;;  %1712 = vmatprep.subr.mxu0 %v571_v54  ;;  %v847_v54 = vld [vmem:[#allocation5 + $0x1368] sm:$0xff] }
 0x1dc   :  { %1785 = vmatprep.subr.mxu1 %v979_v25  ;;  %1713 = vmatpush2.msra.mxu0 %v570_v56 }
 0x1dd   :  { %1786 = vmatpush2.msra.mxu1 %v978_v57  ;;  %1714 = vmatprep.subr.mxu0 %v559_v27  ;;  %v438_v57 = vld [vmem:[#allocation5 + $0x6a0] sm:$0xff] }
 0x1de   :  { %1787 = vmatprep.subr.mxu1 %v967_v58  ;;  %1715 = vmatpush2.msra.mxu0 %v558_v59  ;;  %v5743_v59 = vld [vmem:[#allocation2 + $0x28] sm:$0xff] }
 0x1df   :  { %1788 = vmatpush2.msra.mxu1 %v966_v61  ;;  %1716 = vmatprep.subr.mxu0 %v547_v62  ;;  %v427_v61 = vld [vmem:[#allocation5 + $0x648] sm:$0xff] }
 0x1e0   :  { %1789 = vmatprep.subr.mxu1 %v955_v3  ;;  %1717 = vmatpush2.msra.mxu0 %v546_v4  ;;  %v835_v62 = vld [vmem:[#allocation5 + $0x1308] sm:$0xff]  ;;  %v5746_v4 = vld [vmem:[#allocation2 + $0x20] sm:$0xff] }
 0x1e1   :  { %1790 = vmatpush2.msra.mxu1 %v954_v8  ;;  %1718 = vmatprep.subr.mxu0 %v535_v10  ;;  %v426_v8 = vld [vmem:[#allocation5 + $0x640] sm:$0xff] }
 0x1e2   :  { %1791 = vmatprep.subr.mxu1 %v943_v12  ;;  %1719 = vmatpush2.msra.mxu0 %v534_v13  ;;  %v834_v10 = vld [vmem:[#allocation5 + $0x1300] sm:$0xff]  ;;  %v823_v13 = vld [vmem:[#allocation5 + $0x12a8] sm:$0xff] }
 0x1e3   :  { %1792 = vmatpush2.msra.mxu1 %v942_v14  ;;  %1720 = vmatprep.subr.mxu0 %v523_v15  ;;  %v417_v14 = vld [vmem:[#allocation5 + $0x5f8] sm:$0xff] }
 0x1e4   :  { %1793 = vmatprep.subr.mxu1 %v931_v16  ;;  %1721 = vmatpush2.msra.mxu0 %v522_v17  ;;  %v5751_v15 = vld [vmem:[#allocation2 + $0x38] sm:$0xff]  ;;  %v5754_v16 = vld [vmem:[#allocation2 + $0x8] sm:$0xff]  ;;  %v822_v17 = vld [vmem:[#allocation5 + $0x12a0] sm:$0xff] }
 0x1e5   :  { %1794 = vmatpush2.msra.mxu1 %v930_v19  ;;  %1722 = vmatprep.subr.mxu0 %v511_v20  ;;  %v416_v19 = vld [vmem:[#allocation5 + $0x5f0] sm:$0xff]  ;;  %v811_v20 = vld [vmem:[#allocation5 + $0x1248] sm:$0xff] }
 0x1e6   :  { %1795 = vmatprep.subr.mxu1 %v919_v22  ;;  %1723 = vmatpush2.msra.mxu0 %v510_v23  ;;  %v405_v22 = vld [vmem:[#allocation5 + $0x598] sm:$0xff]  ;;  %v5757_v23 = vld [vmem:[#allocation2 + $0x30] sm:$0xff] }
 0x1e7   :  { %1796 = vmatpush2.msra.mxu1 %v918_v63  ;;  %v5718_v32 = vpop.f32.mrf.mxu0  ;;  %1724 = vmatprep.subr.mxu0 %v499_v1  ;;  %v5760_v63 = vld [vmem:[#allocation2] sm:$0xff] }
 0x1e8   :  { %1797 = vmatprep.subr.mxu1 %v907_v28  ;;  %1725 = vmatpush2.msra.mxu0 %v498_v5  ;;  %v810_v1 = vld [vmem:[#allocation5 + $0x1240] sm:$0xff]  ;;  %v404_v28 = vld [vmem:[#allocation5 + $0x590] sm:$0xff]  ;;  %v393_v5 = vld [vmem:[#allocation5 + $0x538] sm:$0xff] }
 0x1e9   :  { %1798 = vmatpush2.msra.mxu1 %v906_v29  ;;  %v1132_v38 = vpop.f32.mrf.mxu0  ;;  %1726 = vmatprep.subr.mxu0 %v487_v30  ;;  %v801_v29 = vld [vmem:[#allocation5 + $0x11f8] sm:$0xff]  ;;  %v392_v30 = vld [vmem:[#allocation5 + $0x530] sm:$0xff] }
 0x1ea   :  { %1799 = vmatprep.subr.mxu1 %v895_v31  ;;  %v1133_v0 = vadd.f32 %v1132_v38, %v5705_v18  ;;  %v5727_v41 = vpop.f32.mrf.mxu1  ;;  %1727 = vmatpush2.msra.mxu0 %v486_v34  ;;  %v800_v31 = vld [vmem:[#allocation5 + $0x11f0] sm:$0xff]  ;;  %v5763_v34 = vld [vmem:[#allocation2 + $0x18] sm:$0xff] }
 0x1eb   :  { %1800 = vmatpush2.msra.mxu1 %v894_v35  ;;  %1728 = vmatprep.subr.mxu0 %v475_v36  ;;  %v381_v35 = vld [vmem:[#allocation5 + $0x4d8] sm:$0xff]  ;;  %v380_v38 = vld [vmem:[#allocation5 + $0x4d0] sm:$0xff] }
 0x1ec   :  { %1801 = vmatprep.subr.mxu1 %v883_v37  ;;  %v1209_v47 = vpop.f32.mrf.mxu1  ;;  %1729 = vmatpush2.msra.mxu0 %v474_v39  ;;  %v789_v36 = vld [vmem:[#allocation5 + $0x1198] sm:$0xff]  ;;  %v5766_v37 = vld [vmem:[#allocation2 + $0x10] sm:$0xff] }
 0x1ed   :  { %1802 = vmatpush2.msra.mxu1 %v882_v40  ;;  %v5733_v18 = vadd.f32 %v1209_v47, %v1133_v0  ;;  %1730 = vmatprep.subr.mxu0 %v463_v42  ;;  %v788_v39 = vld [vmem:[#allocation5 + $0x1190] sm:$0xff]  ;;  %v369_v40 = vld [vmem:[#allocation5 + $0x478] sm:$0xff] }
 0x1ee   :  { %1803 = vmatprep.subr.mxu1 %v871_v9  ;;  %v1278_v51 = vpop.f32.mrf.mxu0  ;;  %1731 = vmatpush2.msra.mxu0 %v462_v44  ;;  %v777_v0 = vld [vmem:[#allocation5 + $0x1138] sm:$0xff]  ;;  %v368_v42 = vld [vmem:[#allocation5 + $0x470] sm:$0xff] }
 0x1ef   :  { %1804 = vmatpush2.msra.mxu1 %v870_v45  ;;  %v1279_v53 = vadd.f32 %v1278_v51, %v5731_v43  ;;  %1732 = vmatprep.subr.mxu0 %v451_v24  ;;  %v776_v9 = vld [vmem:[#allocation5 + $0x1130] sm:$0xff]  ;;  %v357_v44 = vld [vmem:[#allocation5 + $0x418] sm:$0xff] }
 0x1f0   :  { %1805 = vmatprep.subr.mxu1 %v859_v48  ;;  %v1355_v25 = vpop.f32.mrf.mxu1  ;;  %v1280_v56 = vpop.f32.mrf.mxu0  ;;  %1733 = vmatpush2.msra.mxu0 %v450_v49  ;;  %v765_v45 = vld [vmem:[#allocation5 + $0x10d8] sm:$0xff]  ;;  %v356_v47 = vld [vmem:[#allocation5 + $0x410] sm:$0xff] }
 0x1f1   :  { %1806 = vmatpush2.msra.mxu1 %v858_v50  ;;  %v5740_v27 = vadd.f32 %v1355_v25, %v1279_v53  ;;  %v1281_v58 = vadd.f32 %v1280_v56, %v5737_v2  ;;  %1590 = vmatprep.mubr.f32.mxu0 %v5743_v59  ;;  %v764_v24 = vld [vmem:[#allocation5 + $0x10d0] sm:$0xff]  ;;  %v345_v48 = vld [vmem:[#allocation5 + $0x3b8] sm:$0xff] }
 0x1f2   :  { %1734 = vmatprep.subr.mxu0 %v439_v52  ;;  %v1357_v3 = vpop.f32.mrf.mxu1  ;;  %1807 = vmatprep.subr.mxu1 %v847_v54  ;;  %v753_v49 = vld [vmem:[#allocation5 + $0x1078] sm:$0xff]  ;;  %v344_v50 = vld [vmem:[#allocation5 + $0x3b0] sm:$0xff] }
 0x1f3   :  { %1591 = vmatmul.mubr.f32.gmra.mxu0 %v5746_v4  ;;  %v5749_v12 = vadd.f32 %v1357_v3, %v1281_v58  ;;  %1808 = vmatpush2.msra.mxu1 %v846_v11  ;;  %v752_v51 = vld [vmem:[#allocation5 + $0x1070] sm:$0xff]  ;;  %v333_v52 = vld [vmem:[#allocation5 + $0x358] sm:$0xff] }
 0x1f4   :  { %1735 = vmatpush2.msra.mxu0 %v438_v57  ;;  %1809 = vmatprep.subr.mxu1 %v835_v62  ;;  %v741_v53 = vld [vmem:[#allocation5 + $0x1018] sm:$0xff]  ;;  %v332_v54 = vld [vmem:[#allocation5 + $0x350] sm:$0xff] }
 0x1f5   :  { %1736 = vmatprep.subr.mxu0 %v427_v61  ;;  %1810 = vmatpush2.msra.mxu1 %v834_v10  ;;  %v740_v25 = vld [vmem:[#allocation5 + $0x1010] sm:$0xff]  ;;  %v321_v56 = vld [vmem:[#allocation5 + $0x2f8] sm:$0xff] }
 0x1f6   :  { %1737 = vmatpush2.msra.mxu0 %v426_v8  ;;  %1667 = vmatprep.mubr.f32.mxu1 %v5751_v15  ;;  %v729_v57 = vld [vmem:[#allocation5 + $0xfb8] sm:$0xff]  ;;  %v320_v11 = vld [vmem:[#allocation5 + $0x2f0] sm:$0xff] }
 0x1f7   :  { %1738 = vmatprep.mubr.f32.mxu0 %v5754_v16  ;;  %1811 = vmatprep.subr.mxu1 %v823_v13  ;;  %v728_v58 = vld [vmem:[#allocation5 + $0xfb0] sm:$0xff]  ;;  %v309_v61 = vld [vmem:[#allocation5 + $0x298] sm:$0xff] }
 0x1f8   :  { %1828 = vmatprep.subr.mxu0 %v417_v14  ;;  %1668 = vmatmul.mubr.f32.gmra.mxu1 %v5757_v23  ;;  %v717_v62 = vld [vmem:[#allocation5 + $0xf58] sm:$0xff]  ;;  %v308_v3 = vld [vmem:[#allocation5 + $0x290] sm:$0xff] }
 0x1f9   :  { %1739 = vmatmul.mubr.f32.vlgmr.msra.gmra.mxu0 %v5760_v63  ;;  %1812 = vmatpush2.msra.mxu1 %v822_v17  ;;  %v716_v8 = vld [vmem:[#allocation5 + $0xf50] sm:$0xff]  ;;  %v297_v10 = vld [vmem:[#allocation5 + $0x238] sm:$0xff] }
 0x1fa   :  { %1829 = vmatpush1.msra.mxu0 %v416_v19  ;;  %1813 = vmatprep.subr.mxu1 %v811_v20  ;;  %v705_v13 = vld [vmem:[#allocation5 + $0xef8] sm:$0xff]  ;;  %v296_v14 = vld [vmem:[#allocation5 + $0x230] sm:$0xff] }
 0x1fb   :  { %1830 = vmatprep.subr.mxu0 %v405_v22  ;;  %1814 = vmatpush2.msra.mxu1 %v810_v1  ;;  %v704_v17 = vld [vmem:[#allocation5 + $0xef0] sm:$0xff]  ;;  %v285_v19 = vld [vmem:[#allocation5 + $0x1d8] sm:$0xff] }
 0x1fc   :  { %1831 = vmatpush1.msra.mxu0 %v404_v28  ;;  %1815 = vmatprep.mubr.f32.mxu1 %v5763_v34  ;;  %v693_v20 = vld [vmem:[#allocation5 + $0xe98] sm:$0xff]  ;;  %v284_v22 = vld [vmem:[#allocation5 + $0x1d0] sm:$0xff] }
 0x1fd   :  { %1832 = vmatprep.subr.mxu0 %v393_v5  ;;  %1905 = vmatprep.subr.mxu1 %v801_v29  ;;  %v692_v1 = vld [vmem:[#allocation5 + $0xe90] sm:$0xff]  ;;  %v273_v28 = vld [vmem:[#allocation5 + $0x178] sm:$0xff] }
 0x1fe   :  { %1816 = vmatmul.mubr.f32.vlgmr.msra.gmra.mxu1 %v5766_v37  ;;  %1833 = vmatpush1.msra.mxu0 %v392_v30  ;;  %v681_v5 = vld [vmem:[#allocation5 + $0xe38] sm:$0xff]  ;;  %v272_v29 = vld [vmem:[#allocation5 + $0x170] sm:$0xff] }
 0x1ff   :  { %1906 = vmatpush1.msra.mxu1 %v800_v31  ;;  %1834 = vmatprep.subr.mxu0 %v381_v35  ;;  %v680_v30 = vld [vmem:[#allocation5 + $0xe30] sm:$0xff]  ;;  %v261_v31 = vld [vmem:[#allocation5 + $0x118] sm:$0xff] }
 0x200   :  { %1907 = vmatprep.subr.mxu1 %v789_v36  ;;  %1835 = vmatpush1.msra.mxu0 %v380_v38  ;;  %v669_v35 = vld [vmem:[#allocation5 + $0xdd8] sm:$0xff]  ;;  %v260_v36 = vld [vmem:[#allocation5 + $0x110] sm:$0xff] }
 0x201   :  { %1908 = vmatpush1.msra.mxu1 %v788_v39  ;;  %1836 = vmatprep.subr.mxu0 %v369_v40  ;;  %v668_v38 = vld [vmem:[#allocation5 + $0xdd0] sm:$0xff]  ;;  %v249_v39 = vld [vmem:[#allocation5 + $0xb8] sm:$0xff] }
 0x202   :  { %1909 = vmatprep.subr.mxu1 %v777_v0  ;;  %1837 = vmatpush1.msra.mxu0 %v368_v42  ;;  %v657_v40 = vld [vmem:[#allocation5 + $0xd78] sm:$0xff]  ;;  %v248_v0 = vld [vmem:[#allocation5 + $0xb0] sm:$0xff] }
 0x203   :  { %1910 = vmatpush1.msra.mxu1 %v776_v9  ;;  %1838 = vmatprep.subr.mxu0 %v357_v44  ;;  %v656_v42 = vld [vmem:[#allocation5 + $0xd70] sm:$0xff]  ;;  %v237_v9 = vld [vmem:[#allocation5 + $0x58] sm:$0xff] }
 0x204   :  { %1911 = vmatprep.subr.mxu1 %v765_v45  ;;  %1839 = vmatpush1.msra.mxu0 %v356_v47  ;;  %v645_v44 = vld [vmem:[#allocation5 + $0xd18] sm:$0xff]  ;;  %v236_v45 = vld [vmem:[#allocation5 + $0x50] sm:$0xff] }
 0x205   :  { %1912 = vmatpush1.msra.mxu1 %v764_v24  ;;  %1840 = vmatprep.subr.mxu0 %v345_v48  ;;  %v644_v47 = vld [vmem:[#allocation5 + $0xd10] sm:$0xff]  ;;  %v609_v24 = vld [vmem:[#allocation5 + $0xbf8] sm:$0xff] }
 0x206   :  { %1913 = vmatprep.subr.mxu1 %v753_v49  ;;  %1841 = vmatpush1.msra.mxu0 %v344_v50  ;;  %v633_v48 = vld [vmem:[#allocation5 + $0xcb8] sm:$0xff]  ;;  %v608_v49 = vld [vmem:[#allocation5 + $0xbf0] sm:$0xff] }
 0x207   :  { %1914 = vmatpush1.msra.mxu1 %v752_v51  ;;  %1842 = vmatprep.subr.mxu0 %v333_v52  ;;  %v632_v50 = vld [vmem:[#allocation5 + $0xcb0] sm:$0xff]  ;;  %v597_v51 = vld [vmem:[#allocation5 + $0xb98] sm:$0xff] }
 0x208   :  { %1915 = vmatprep.subr.mxu1 %v741_v53  ;;  %1843 = vmatpush1.msra.mxu0 %v332_v54  ;;  %v621_v52 = vld [vmem:[#allocation5 + $0xc58] sm:$0xff]  ;;  %v596_v53 = vld [vmem:[#allocation5 + $0xb90] sm:$0xff] }
 0x209   :  { %1916 = vmatpush1.msra.mxu1 %v740_v25  ;;  %1844 = vmatprep.subr.mxu0 %v321_v56  ;;  %v620_v54 = vld [vmem:[#allocation5 + $0xc50] sm:$0xff]  ;;  %v585_v25 = vld [vmem:[#allocation5 + $0xb38] sm:$0xff] }
 0x20a   :  { %1917 = vmatprep.subr.mxu1 %v729_v57  ;;  %1845 = vmatpush1.msra.mxu0 %v320_v11  ;;  %v993_v56 = vld [vmem:[#allocation5 + $0x17f8] sm:$0xff]  ;;  %v584_v57 = vld [vmem:[#allocation5 + $0xb30] sm:$0xff] }
 0x20b   :  { %1918 = vmatpush1.msra.mxu1 %v728_v58  ;;  %1846 = vmatprep.subr.mxu0 %v309_v61  ;;  %v992_v11 = vld [vmem:[#allocation5 + $0x17f0] sm:$0xff]  ;;  %v573_v58 = vld [vmem:[#allocation5 + $0xad8] sm:$0xff] }
 0x20c   :  { %1919 = vmatprep.subr.mxu1 %v717_v62  ;;  %1847 = vmatpush1.msra.mxu0 %v308_v3  ;;  %v981_v61 = vld [vmem:[#allocation5 + $0x1798] sm:$0xff]  ;;  %v572_v62 = vld [vmem:[#allocation5 + $0xad0] sm:$0xff] }
 0x20d   :  { %1920 = vmatpush1.msra.mxu1 %v716_v8  ;;  %1848 = vmatprep.subr.mxu0 %v297_v10  ;;  %v980_v3 = vld [vmem:[#allocation5 + $0x1790] sm:$0xff]  ;;  %v561_v8 = vld [vmem:[#allocation5 + $0xa78] sm:$0xff] }
 0x20e   :  { %1921 = vmatprep.subr.mxu1 %v705_v13  ;;  %1849 = vmatpush1.msra.mxu0 %v296_v14  ;;  %v969_v10 = vld [vmem:[#allocation5 + $0x1738] sm:$0xff]  ;;  %v560_v13 = vld [vmem:[#allocation5 + $0xa70] sm:$0xff] }
 0x20f   :  { %1922 = vmatpush1.msra.mxu1 %v704_v17  ;;  %1850 = vmatprep.subr.mxu0 %v285_v19  ;;  %v968_v14 = vld [vmem:[#allocation5 + $0x1730] sm:$0xff]  ;;  %v549_v17 = vld [vmem:[#allocation5 + $0xa18] sm:$0xff] }
 0x210   :  { %1923 = vmatprep.subr.mxu1 %v693_v20  ;;  %1851 = vmatpush1.msra.mxu0 %v284_v22  ;;  %v957_v19 = vld [vmem:[#allocation5 + $0x16d8] sm:$0xff]  ;;  %v548_v20 = vld [vmem:[#allocation5 + $0xa10] sm:$0xff] }
 0x211   :  { %1924 = vmatpush1.msra.mxu1 %v692_v1  ;;  %1852 = vmatprep.subr.mxu0 %v273_v28  ;;  %v956_v22 = vld [vmem:[#allocation5 + $0x16d0] sm:$0xff]  ;;  %v537_v1 = vld [vmem:[#allocation5 + $0x9b8] sm:$0xff] }
 0x212   :  { %1925 = vmatprep.subr.mxu1 %v681_v5  ;;  %1853 = vmatpush1.msra.mxu0 %v272_v29  ;;  %v945_v28 = vld [vmem:[#allocation5 + $0x1678] sm:$0xff]  ;;  %v536_v5 = vld [vmem:[#allocation5 + $0x9b0] sm:$0xff] }
 0x213   :  { %1926 = vmatpush1.msra.mxu1 %v680_v30  ;;  %1854 = vmatprep.subr.mxu0 %v261_v31  ;;  %v944_v29 = vld [vmem:[#allocation5 + $0x1670] sm:$0xff]  ;;  %v525_v30 = vld [vmem:[#allocation5 + $0x958] sm:$0xff] }
 0x214   :  { %1927 = vmatprep.subr.mxu1 %v669_v35  ;;  %1855 = vmatpush1.msra.mxu0 %v260_v36  ;;  %v933_v31 = vld [vmem:[#allocation5 + $0x1618] sm:$0xff]  ;;  %v524_v35 = vld [vmem:[#allocation5 + $0x950] sm:$0xff] }
 0x215   :  { %1928 = vmatpush1.msra.mxu1 %v668_v38  ;;  %1856 = vmatprep.subr.mxu0 %v249_v39  ;;  %v932_v36 = vld [vmem:[#allocation5 + $0x1610] sm:$0xff]  ;;  %v513_v38 = vld [vmem:[#allocation5 + $0x8f8] sm:$0xff] }
 0x216   :  { %1929 = vmatprep.subr.mxu1 %v657_v40  ;;  %1857 = vmatpush1.msra.mxu0 %v248_v0  ;;  %v921_v39 = vld [vmem:[#allocation5 + $0x15b8] sm:$0xff]  ;;  %v512_v40 = vld [vmem:[#allocation5 + $0x8f0] sm:$0xff] }
 0x217   :  { %1930 = vmatpush1.msra.mxu1 %v656_v42  ;;  %1858 = vmatprep.subr.mxu0 %v237_v9  ;;  %v920_v0 = vld [vmem:[#allocation5 + $0x15b0] sm:$0xff]  ;;  %v501_v42 = vld [vmem:[#allocation5 + $0x898] sm:$0xff] }
 0x218   :  { %1931 = vmatprep.subr.mxu1 %v645_v44  ;;  %1859 = vmatpush1.msra.mxu0 %v236_v45  ;;  %v909_v9 = vld [vmem:[#allocation5 + $0x1558] sm:$0xff]  ;;  %v500_v44 = vld [vmem:[#allocation5 + $0x890] sm:$0xff] }
 0x219   :  { %1932 = vmatpush1.msra.mxu1 %v644_v47  ;;  %1860 = vmatprep.subr.mxu0 %v609_v24  ;;  %v908_v45 = vld [vmem:[#allocation5 + $0x1550] sm:$0xff]  ;;  %v489_v24 = vld [vmem:[#allocation5 + $0x838] sm:$0xff] }
 0x21a   :  { %1933 = vmatprep.subr.mxu1 %v633_v48  ;;  %1861 = vmatpush2.msra.mxu0 %v608_v49  ;;  %v897_v48 = vld [vmem:[#allocation5 + $0x14f8] sm:$0xff] }
 0x21b   :  { %1934 = vmatpush1.msra.mxu1 %v632_v50  ;;  %1862 = vmatprep.subr.mxu0 %v597_v51  ;;  %v488_v50 = vld [vmem:[#allocation5 + $0x830] sm:$0xff] }
 0x21c   :  { %1935 = vmatprep.subr.mxu1 %v621_v52  ;;  %1863 = vmatpush2.msra.mxu0 %v596_v53  ;;  %v896_v51 = vld [vmem:[#allocation5 + $0x14f0] sm:$0xff]  ;;  %v477_v53 = vld [vmem:[#allocation5 + $0x7d8] sm:$0xff] }
 0x21d   :  { %1936 = vmatpush1.msra.mxu1 %v620_v54  ;;  %1864 = vmatprep.subr.mxu0 %v585_v25  ;;  %v885_v54 = vld [vmem:[#allocation5 + $0x1498] sm:$0xff] }
 0x21e   :  { %1937 = vmatprep.subr.mxu1 %v993_v56  ;;  %1865 = vmatpush2.msra.mxu0 %v584_v57  ;;  %v476_v56 = vld [vmem:[#allocation5 + $0x7d0] sm:$0xff] }
 0x21f   :  { %1938 = vmatpush2.msra.mxu1 %v992_v11  ;;  %1866 = vmatprep.subr.mxu0 %v573_v58  ;;  %v884_v57 = vld [vmem:[#allocation5 + $0x1490] sm:$0xff]  ;;  %v1020_v58 = vsub.s32 5, %v5696_v55 }
 0x220   :  { %1939 = vmatprep.subr.mxu1 %v981_v61  ;;  %1867 = vmatpush2.msra.mxu0 %v572_v62  ;;  %v873_v61 = vld [vmem:[#allocation5 + $0x1438] sm:$0xff] }
 0x221   :  { %1940 = vmatpush2.msra.mxu1 %v980_v3  ;;  %1868 = vmatprep.subr.mxu0 %v561_v8  ;;  %v464_v3 = vld [vmem:[#allocation5 + $0x770] sm:$0xff] }
 0x222   :  { %1941 = vmatprep.subr.mxu1 %v969_v10  ;;  %1869 = vmatpush2.msra.mxu0 %v560_v13  ;;  %v872_v8 = vld [vmem:[#allocation5 + $0x1430] sm:$0xff]  ;;  %v861_v13 = vld [vmem:[#allocation5 + $0x13d8] sm:$0xff] }
 0x223   :  { %1942 = vmatpush2.msra.mxu1 %v968_v14  ;;  %1870 = vmatprep.subr.mxu0 %v549_v17  ;;  %v1016_v17 = vsub.s32 4, %v5696_v55 }
 0x224   :  { %1943 = vmatprep.subr.mxu1 %v957_v19  ;;  %1871 = vmatpush2.msra.mxu0 %v548_v20  ;;  %v5778_v19 = vsub.s32 0, %v5696_v55  ;;  %v452_v20 = vld [vmem:[#allocation5 + $0x710] sm:$0xff] }
 0x225   :  { %1944 = vmatpush2.msra.mxu1 %v956_v22  ;;  %1872 = vmatprep.subr.mxu0 %v537_v1  ;;  %v5780_v22 = vld [vmem:[#allocation7] sm:$0xff] }
 0x226   :  { %1945 = vmatprep.subr.mxu1 %v945_v28  ;;  %1873 = vmatpush2.msra.mxu0 %v536_v5  ;;  %v1021_v1 = vrot.slane %v5780_v22, %v1020_v58  ;;  %v860_v28 = vld [vmem:[#allocation5 + $0x13d0] sm:$0xff] }
 0x227   :  { %1946 = vmatpush2.msra.mxu1 %v944_v29  ;;  %1874 = vmatprep.subr.mxu0 %v525_v30  ;;  %v441_v30 = vld [vmem:[#allocation5 + $0x6b8] sm:$0xff] }
 0x228   :  { %1947 = vmatprep.subr.mxu1 %v933_v31  ;;  %1875 = vmatpush2.msra.mxu0 %v524_v35  ;;  %v849_v31 = vld [vmem:[#allocation5 + $0x1378] sm:$0xff]  ;;  %v440_v35 = vld [vmem:[#allocation5 + $0x6b0] sm:$0xff] }
 0x229   :  { %1948 = vmatpush2.msra.mxu1 %v932_v36  ;;  %1876 = vmatprep.subr.mxu0 %v513_v38  ;;  %v848_v36 = vld [vmem:[#allocation5 + $0x1370] sm:$0xff]  ;;  %v1017_v38 = vrot.slane %v5780_v22, %v1016_v17 }
 0x22a   :  { %1949 = vmatprep.subr.mxu1 %v921_v39  ;;  %v1284_v47 = vpop.f32.mrf.mxu0  ;;  %1877 = vmatpush2.msra.mxu0 %v512_v40  ;;  %v1001_v40 = vrot.slane %v5780_v22, %v5778_v19 }
 0x22b   :  { %1950 = vmatpush2.msra.mxu1 %v920_v0  ;;  %v1285_v49 = vadd.f32 %v1284_v47, %v5731_v43  ;;  %1878 = vmatprep.subr.mxu0 %v501_v42  ;;  %v465_v43 = vld [vmem:[#allocation5 + $0x778] sm:$0xff]  ;;  %v836_v47 = vld [vmem:[#allocation5 + $0x1310] sm:$0xff] }
 0x22c   :  { %1951 = vmatprep.subr.mxu1 %v909_v9  ;;  %v1286_v52 = vpop.f32.mrf.mxu0  ;;  %1879 = vmatpush2.msra.mxu0 %v500_v44  ;;  %v429_v0 = vld [vmem:[#allocation5 + $0x658] sm:$0xff]  ;;  %v428_v44 = vld [vmem:[#allocation5 + $0x650] sm:$0xff] }
 0x22d   :  { %1952 = vmatpush2.msra.mxu1 %v908_v45  ;;  %v1287_v25 = vadd.f32 %v1286_v52, %v5737_v2  ;;  %1880 = vmatprep.subr.mxu0 %v489_v24  ;;  %v1361_v11 = vpop.f32.mrf.mxu1  ;;  %v453_v2 = vld [vmem:[#allocation5 + $0x718] sm:$0xff] }
 0x22e   :  { %1953 = vmatprep.subr.mxu1 %v897_v48  ;;  %1881 = vmatpush2.msra.mxu0 %v488_v50  ;;  %v5772_v62 = vadd.f32 %v1361_v11, %v1285_v49  ;;  %v837_v42 = vld [vmem:[#allocation5 + $0x1318] sm:$0xff] }
 0x22f   :  { %1954 = vmatpush2.msra.mxu1 %v896_v51  ;;  %1882 = vmatprep.subr.mxu0 %v477_v53  ;;  %v1363_v10 = vpop.f32.mrf.mxu1  ;;  %v1125_v51 = vadd.f32 %v5707_v21, %v1001_v40  ;;  %v825_v52 = vld [vmem:[#allocation5 + $0x12b8] sm:$0xff]  ;;  %v812_v21 = vld [vmem:[#allocation5 + $0x1250] sm:$0xff] }
 0x230   :  { %1955 = vmatprep.subr.mxu1 %v885_v54  ;;  %1883 = vmatpush2.msra.mxu0 %v476_v56  ;;  %v5774_v14 = vadd.f32 %v1363_v10, %v1287_v25  ;;  %v824_v54 = vld [vmem:[#allocation5 + $0x12b0] sm:$0xff] }
 0x231   :  { %1956 = vmatpush2.msra.mxu1 %v884_v57  ;;  %1884 = vmatprep.subr.mxu0 %v465_v43  ;;  %v813_v57 = vld [vmem:[#allocation5 + $0x1258] sm:$0xff] }
 0x232   :  { %1957 = vmatprep.subr.mxu1 %v873_v61  ;;  %1885 = vmatpush2.msra.mxu0 %v464_v3  ;;  %v1432_v5 = vpop.f32.mrf.mxu0  ;;  %v1202_v61 = vadd.f32 %v5709_v26, %v1125_v51  ;;  %v5501_v3 = vmov 0.0  }
 0x233   :  { %1958 = vmatpush2.msra.mxu1 %v872_v8  ;;  %v1509_v29 = vpop.f32.mrf.mxu1  ;;  %1886 = vmatprep.subr.mxu0 %v453_v2  ;;  %v1433_v49 = vadd.f32 %v1432_v5, %v1017_v38 }
 0x234   :  { %1959 = vmatprep.subr.mxu1 %v861_v13  ;;  %1744 = vmatprep.mubr.f32.mxu0 %v5743_v59  ;;  %v1434_v39 = vpop.f32.mrf.mxu0 }
 0x235   :  { %1887 = vmatpush2.msra.mxu0 %v452_v20  ;;  %1960 = vmatpush2.msra.mxu1 %v860_v28  ;;  %v1435_v9 = vadd.f32 %v1434_v39, %v1021_v1  ;;  %v1511_v45 = vpop.f32.mrf.mxu1  ;;  %v1510_v58 = vadd.f32 %v1509_v29, %v1433_v49  ;;  %v995_v28 = vld [vmem:[#allocation7 + $0x8] sm:$0xf] }
 0x236   :  { %1745 = vmatmul.mubr.f32.gmra.mxu0 %v5746_v4  ;;  %1888 = vmatprep.subr.mxu0 %v441_v30  ;;  %v1033_v30 = vrot.slane %v995_v28, %v5778_v19 }
 0x237   :  { %1961 = vmatprep.subr.mxu1 %v849_v31  ;;  %1889 = vmatpush2.msra.mxu0 %v440_v35  ;;  %v5788_v24 = vadd.f32 %v1511_v45, %v1435_v9  ;;  %v1438_v48 = vpop.f32.mrf.mxu0 }
 0x238   :  { %1962 = vmatpush2.msra.mxu1 %v848_v36  ;;  %1890 = vmatprep.subr.mxu0 %v429_v0  ;;  %v1515_v50 = vpop.f32.mrf.mxu1  ;;  %v1439_v11 = vadd.f32 %v1438_v48, %v1017_v38 }
 0x239   :  { %1963 = vmatprep.subr.mxu1 %v837_v42  ;;  %1821 = vmatprep.mubr.f32.mxu1 %v5751_v15  ;;  %v1440_v53 = vpop.f32.mrf.mxu0 }
 0x23a   :  { %1891 = vmatpush2.msra.mxu0 %v428_v44  ;;  %1892 = vmatprep.mubr.f32.mxu0 %v5754_v16  ;;  %v1441_v25 = vadd.f32 %v1440_v53, %v1021_v1  ;;  %v1517_v56 = vpop.f32.mrf.mxu1  ;;  %v1131_v16 = vadd.f32 %v5718_v32, %v1001_v40 }
 0x23b   :  { %1964 = vmatpush2.msra.mxu1 %v836_v47  ;;  %1893 = vmatmul.mubr.f32.vlgmr.msra.gmra.mxu0 %v5760_v63  ;;  %v1516_v63 = vadd.f32 %v1515_v50, %v1439_v11 }
 0x23c   :  { %1822 = vmatmul.mubr.f32.gmra.mxu1 %v5757_v23  ;;  %1965 = vmatprep.subr.mxu1 %v825_v52  ;;  %v5796_v43 = vadd.f32 %v1517_v56, %v1441_v25  ;;  %v1208_v26 = vadd.f32 %v5727_v41, %v1131_v16  ;;  %v1024_v41 = vsub.s32 6, %v5696_v55  ;;  %v1041_v52 = vrot.slane %v995_v28, %v5721_v33 }
 0x23d   :  { %1898 = vmatprep.mubr.f32.mxu0 %v5743_v59  ;;  %1966 = vmatpush2.msra.mxu1 %v824_v54  ;;  %v1982_v59 = vmul.f32 0.088388346, %v1202_v61  ;;  %v1045_v56 = vrot.slane %v995_v28, %v5724_v6 }
 0x23e   :  { %1969 = vmatprep.mubr.f32.mxu1 %v5763_v34  ;;  %1967 = vmatprep.subr.mxu1 %v813_v57  ;;  %v1986_v32 = vmul.f32 0.088388346, %v1208_v26 }
 0x23f   :  { %4916 = vmatprep.subr.mxu0 %v5501_v3  ;;  %1968 = vmatpush2.msra.mxu1 %v812_v21 }
 0x240   :  { %1899 = vmatmul.mubr.f32.gmra.mxu0 %v5746_v4  ;;  %1970 = vmatmul.mubr.f32.vlgmr.msra.gmra.mxu1 %v5766_v37  ;;  %v1028_v4 = vsub.s32 7, %v5696_v55 }
 0x241   :  { %4917 = vmatpush3.xpose.msra.mxu0 %v1510_v58  ;;  %1975 = vmatprep.mubr.f32.mxu1 %v5751_v15  ;;  %v1025_v15 = vrot.slane %v5780_v22, %v1024_v41 }
 0x242   :  { %4918 = vmatprep.mubr.msk.f32.mxu0 %vm5502_vm0, %v5501_v3  ;;  %4921 = vmatprep.subr.mxu1 %v5501_v3  ;;  %v1029_v34 = vrot.slane %v5780_v22, %v1028_v4  ;;  %v1037_v22 = vrot.slane %v995_v28, %v5699_v7 }
 0x243   :  { %4926 = vmatprep.subr.mxu0 %v5501_v3  ;;  %4922 = vmatpush3.xpose.msra.mxu1 %v1516_v63 }
 0x244   :  { %4919 = vmatmul.mubr.f32.vlgmr.msra.gmra.mxu0 %v1982_v59  ;;  %1976 = vmatmul.mubr.f32.gmra.mxu1 %v5757_v23 }
 0x245   :  { %4931 = vmatprep.subr.mxu1 %v5501_v3  ;;  %4923 = vmatprep.mubr.msk.f32.mxu1 %vm5502_vm0, %v5501_v3 }
 0x246   :  { %4928 = vmatprep.mubr.msk.f32.mxu0 %vm5502_vm0, %v5501_v3 }
 0x248   :  { %4924 = vmatmul.mubr.f32.vlgmr.msra.gmra.mxu1 %v1986_v32 }
 0x249   :  { %4933 = vmatprep.mubr.msk.f32.mxu1 %vm5502_vm0, %v5501_v3 }
 0x275   :  { %v1586_v23 = vpop.f32.mrf.mxu0 }
 0x276   :  { %v1587_v37 = vadd.f32 %v1586_v23, %v1025_v15 }
 0x277   :  { %v1588_v8 = vpop.f32.mrf.mxu0 }
 0x278   :  { %v1589_v10 = vadd.f32 %v1588_v8, %v1029_v34 }
 0x27a   :  { %v1663_v2 = vpop.f32.mrf.mxu1 }
 0x27b   :  { %v5822_v13 = vadd.f32 %v1663_v2, %v1587_v37 }
 0x27c   :  { %v1665_v17 = vpop.f32.mrf.mxu1 }
 0x27d   :  { %v5824_v20 = vadd.f32 %v1665_v17, %v1589_v10 }
 0x2b3   :  { %v1592_v1 = vpop.f32.mrf.mxu0 }
 0x2b4   :  { %v1593_v29 = vadd.f32 %v1592_v1, %v1025_v15 }
 0x2b5   :  { %v1594_v5 = vpop.f32.mrf.mxu0 }
 0x2b6   :  { %v1595_v31 = vadd.f32 %v1594_v5, %v1029_v34 }
 0x2b8   :  { %v1669_v35 = vpop.f32.mrf.mxu1 }
 0x2b9   :  { %v1740_v36 = vpop.f32.mrf.mxu0  ;;  %v5828_v38 = vadd.f32 %v1669_v35, %v1593_v29 }
 0x2ba   :  { %v1671_v39 = vpop.f32.mrf.mxu1  ;;  %v1741_v40 = vadd.f32 %v1740_v36, %v1033_v30 }
 0x2bb   :  { %v1742_v0 = vpop.f32.mrf.mxu0  ;;  %v5830_v42 = vadd.f32 %v1671_v39, %v1595_v31 }
 0x2bc   :  { %v1743_v9 = vadd.f32 %v1742_v0, %v1037_v22 }
 0x2be   :  { %v1817_v44 = vpop.f32.mrf.mxu1 }
 0x2bf   :  { %v1818_v45 = vadd.f32 %v1817_v44, %v1741_v40 }
 0x2c0   :  { %v1819_v47 = vpop.f32.mrf.mxu1 }
 0x2c1   :  { %v5832_v48 = vadd.f32 %v1819_v47, %v1743_v9  ;;  %4927 = vmatpush3.msra.mxu0 %v1818_v45 }
 0x2c2   :  { %4936 = vmatprep.subr.mxu0 %v5501_v3 }
 0x2f6   :  { %v1746_v49 = vpop.f32.mrf.mxu0 }
 0x2f7   :  { %v1747_v51 = vadd.f32 %v1746_v49, %v1033_v30 }
 0x2f8   :  { %v1748_v50 = vpop.f32.mrf.mxu0 }
 0x2f9   :  { %v1749_v53 = vadd.f32 %v1748_v50, %v1037_v22 }
 0x2fb   :  { %v1894_v25 = vpop.f32.mrf.mxu0 }
 0x2fc   :  { %v1823_v54 = vpop.f32.mrf.mxu1  ;;  %v1895_v11 = vadd.f32 %v1894_v25, %v1041_v52 }
 0x2fd   :  { %v1824_v57 = vadd.f32 %v1823_v54, %v1747_v51  ;;  %v1896_v21 = vpop.f32.mrf.mxu0 }
 0x2fe   :  { %v1825_v58 = vpop.f32.mrf.mxu1  ;;  %v1897_v16 = vadd.f32 %v1896_v21, %v1045_v56 }
 0x2ff   :  { %v1826_v61 = vadd.f32 %v1825_v58, %v1749_v53  ;;  %4932 = vmatpush3.msra.mxu1 %v1824_v57 }
 0x300   :  { %v1900_v63 = vpop.f32.mrf.mxu0  ;;  %4941 = vmatprep.subr.mxu1 %v5501_v3  ;;  %v1971_v59 = vpop.f32.mrf.mxu1 }
 0x301   :  { %v1901_v26 = vadd.f32 %v1900_v63, %v1041_v52  ;;  %v5838_v32 = vadd.f32 %v1971_v59, %v1895_v11  ;;  %v1983_v52 = vmul.f32 0.088388346, %v5712_v60 }
 0x302   :  { %v1902_v41 = vpop.f32.mrf.mxu0  ;;  %v1973_v4 = vpop.f32.mrf.mxu1 }
 0x303   :  { %v1903_v15 = vadd.f32 %v1902_v41, %v1045_v56  ;;  %v5840_v23 = vadd.f32 %v1973_v4, %v1897_v16 }
 0x304   :  { %v2056_v34 = vpop.f32.mrf.mxu0  ;;  %v1977_v37 = vpop.f32.mrf.mxu1 }
 0x305   :  { %v2131_v8 = vsel %vm2130_vm1, %v2056_v34, -inf  ;;  %v5843_v10 = vadd.f32 %v1977_v37, %v1901_v26  ;;  %v2732_v37 = vld [vmem:[#allocation8 + $0x3e8] sm:$0xff] }
 0x306   :  { %2132 = vmax.xlane.f32.xlu0 %v2131_v8  ;;  %v4920_v2 = vpop.f32.mrf.mxu0  ;;  %v1979_v17 = vpop.f32.mrf.mxu1  ;;  %v2734_v8 = vld [vmem:[#allocation8 + $0x3f8] sm:$0xff] }
 0x307   :  { %v5845_v1 = vadd.f32 %v1979_v17, %v1903_v15 }
 0x308   :  { %v2126_v28 = vpop.f32.mrf.mxu1 }
 0x309   :  { %v2134_v5 = vsel %vm2130_vm1, %v2126_v28, -inf }
 0x30a   :  { %v4925_v29 = vpop.f32.mrf.mxu1  ;;  %2135 = vmax.xlane.f32.xlu0 %v2134_v5 }
 0x30b   :  { %v2731_v29 = vld [vmem:[#allocation8 + $0x3e0] sm:$0xff] }
 0x38f   :  { %v2133_v30 = vpop.xlane.xlu0 %2132 }
 0x390   :  { %v2137_v31 = vsub.f32 %v2056_v34, %v2133_v30  ;;  %v2728_v30 = vld [vmem:[#allocation8 + $0x3c8] sm:$0xff] }
 0x392   :  { %v2139_v35 = vmul.f32 1.442695, %v2137_v31  ;;  %v2727_v31 = vld [vmem:[#allocation8 + $0x3c0] sm:$0xff] }
 0x393   :  { %v2136_v36 = vpop.xlane.xlu0 %2135 }
 0x394   :  { %5093 = vpow2.f32 %v2139_v35  ;;  %v2138_v22 = vsub.f32 %v2126_v28, %v2136_v36  ;;  %v2724_v35 = vld [vmem:[#allocation8 + $0x3a8] sm:$0xff] }
 0x396   :  { %v2141_v39 = vmul.f32 1.442695, %v2138_v22  ;;  %v2723_v22 = vld [vmem:[#allocation8 + $0x3a0] sm:$0xff] }
 0x398   :  { %5095 = vpow2.f32 %v2141_v39 }
 0x3a1   :  { %v5094_v40 = vpop.eup %5093 }
 0x3a2   :  { %v2143_v0 = vsel %vm2130_vm1, %v5094_v40, 0.0 }
 0x3a3   :  { %2144 = vadd.xlane.f32.xlu1 %v2143_v0  ;;  %v2720_v0 = vld [vmem:[#allocation8 + $0x388] sm:$0xff] }
 0x3a5   :  { %v5096_v9 = vpop.eup %5095 }
 0x3a6   :  { %v2146_v44 = vsel %vm2130_vm1, %v5096_v9, 0.0 }
 0x3a7   :  { %2147 = vadd.xlane.f32.xlu1 %v2146_v44  ;;  %v2719_v44 = vld [vmem:[#allocation8 + $0x380] sm:$0xff] }
 0x42c   :  { %v2145_v45 = vpop.xlane.xlu1 %2144 }
 0x42d   :  { %5097 = vrcp.f32 %v2145_v45  ;;  %v2729_v45 = vld [vmem:[#allocation8 + $0x3d0] sm:$0xff] }
 0x430   :  { %v2148_v47 = vpop.xlane.xlu1 %2147 }
 0x431   :  { %5099 = vrcp.f32 %v2148_v47  ;;  %v2716_v47 = vld [vmem:[#allocation8 + $0x368] sm:$0xff] }
 0x43a   :  { %v5098_v49 = vpop.eup %5097 }
 0x43b   :  { %v2151_v50 = vmul.f32 %v5098_v49, %v5094_v40  ;;  %v2733_v40 = vld [vmem:[#allocation8 + $0x3f0] sm:$0xff]  ;;  %v2726_v49 = vld [vmem:[#allocation8 + $0x3b8] sm:$0xff] }
 0x43d   :  { %4929 = vmatmul.mubr.msk.f32.vlgmr.msra.gmra.mxu0 %vm2130_vm1, %v2151_v50  ;;  %v2715_v50 = vld [vmem:[#allocation8 + $0x360] sm:$0xff] }
 0x43e   :  { %4937 = vmatpush3.xpose.msra.mxu0 %v5788_v24  ;;  %4938 = vmatprep.mubr.msk.f32.mxu0 %vm5502_vm0, %v5501_v3  ;;  %v5100_v51 = vpop.eup %5099  ;;  %v1987_v24 = vmul.f32 0.088388346, %v5733_v18 }
 0x43f   :  { %4946 = vmatprep.subr.mxu0 %v5501_v3  ;;  %v2152_v53 = vmul.f32 %v5100_v51, %v5096_v9  ;;  %v2730_v9 = vld [vmem:[#allocation8 + $0x3d8] sm:$0xff]  ;;  %v2725_v51 = vld [vmem:[#allocation8 + $0x3b0] sm:$0xff] }
 0x441   :  { %4939 = vmatmul.mubr.f32.vlgmr.msra.gmra.mxu0 %v1983_v52  ;;  %4934 = vmatmul.mubr.msk.f32.vlgmr.msra.gmra.mxu1 %vm2130_vm1, %v2152_v53  ;;  %v2712_v52 = vld [vmem:[#allocation8 + $0x348] sm:$0xff]  ;;  %v2722_v53 = vld [vmem:[#allocation8 + $0x398] sm:$0xff] }
 0x442   :  { %4947 = vmatpush3.msra.mxu0 %v5832_v48  ;;  %4942 = vmatpush3.xpose.msra.mxu1 %v5796_v43 }
 0x443   :  { %4943 = vmatprep.mubr.msk.f32.mxu1 %vm5502_vm0, %v5501_v3  ;;  %4951 = vmatprep.subr.mxu1 %v5501_v3 }
 0x444   :  { %4948 = vmatprep.mubr.msk.f32.mxu0 %vm5502_vm0, %v5501_v3  ;;  %2735 = vmatprep.subr.mxu0 %v2732_v37  ;;  %v2702_v37 = vld [vmem:[#allocation8 + $0x2f8] sm:$0xff] }
 0x445   :  { %4944 = vmatmul.mubr.f32.vlgmr.msra.gmra.mxu1 %v1987_v24  ;;  %v2711_v24 = vld [vmem:[#allocation8 + $0x340] sm:$0xff] }
 0x446   :  { %4952 = vmatpush3.msra.mxu1 %v1826_v61  ;;  %4953 = vmatprep.mubr.msk.f32.mxu1 %vm5502_vm0, %v5501_v3 }
 0x447   :  { %2812 = vmatprep.subr.mxu1 %v2734_v8  ;;  %v2691_v8 = vld [vmem:[#allocation8 + $0x2a0] sm:$0xff] }
 0x4fd   :  { %v5867_v60 = vpop.f32.mrf.mxu0 }
 0x4ff   :  { %v4930_v48 = vpop.f32.mrf.mxu0 }
 0x500   :  { %v2721_v48 = vld [vmem:[#allocation8 + $0x390] sm:$0xff] }
 0x501   :  { %v2429_v54 = vpop.f32.mrf.mxu0  ;;  %v5869_v43 = vpop.f32.mrf.mxu1 }
 0x502   :  { %v2503_v25 = vsel %vm2130_vm1, %v2429_v54, -inf }
 0x503   :  { %2504 = vmax.xlane.f32.xlu0 %v2503_v25  ;;  %v4940_v18 = vpop.f32.mrf.mxu0  ;;  %v4935_v56 = vpop.f32.mrf.mxu1  ;;  %v2718_v25 = vld [vmem:[#allocation8 + $0x378] sm:$0xff] }
 0x504   :  { %v2707_v18 = vld [vmem:[#allocation8 + $0x320] sm:$0xff]  ;;  %v2717_v56 = vld [vmem:[#allocation8 + $0x370] sm:$0xff] }
 0x505   :  { %v2499_v57 = vpop.f32.mrf.mxu1 }
 0x506   :  { %v2506_v11 = vsel %vm2130_vm1, %v2499_v57, -inf }
 0x507   :  { %2507 = vmax.xlane.f32.xlu1 %v2506_v11  ;;  %v4945_v58 = vpop.f32.mrf.mxu1  ;;  %v2714_v11 = vld [vmem:[#allocation8 + $0x358] sm:$0xff] }
 0x508   :  { %v2703_v58 = vld [vmem:[#allocation8 + $0x300] sm:$0xff] }
 0x58c   :  { %v2505_v21 = vpop.xlane.xlu0 %2504 }
 0x58d   :  { %v2509_v61 = vsub.f32 %v2429_v54, %v2505_v21  ;;  %v2708_v54 = vld [vmem:[#allocation8 + $0x328] sm:$0xff]  ;;  %v2713_v21 = vld [vmem:[#allocation8 + $0x350] sm:$0xff] }
 0x58f   :  { %v2511_v16 = vmul.f32 1.442695, %v2509_v61  ;;  %v2700_v61 = vld [vmem:[#allocation8 + $0x2e8] sm:$0xff] }
 0x590   :  { %v2508_v63 = vpop.xlane.xlu1 %2507 }
 0x591   :  { %5101 = vpow2.f32 %v2511_v16  ;;  %v2510_v59 = vsub.f32 %v2499_v57, %v2508_v63  ;;  %v2704_v57 = vld [vmem:[#allocation8 + $0x308] sm:$0xff]  ;;  %v2710_v16 = vld [vmem:[#allocation8 + $0x338] sm:$0xff]  ;;  %v2699_v63 = vld [vmem:[#allocation8 + $0x2e0] sm:$0xff] }
 0x593   :  { %v2513_v26 = vmul.f32 1.442695, %v2510_v59  ;;  %v2709_v59 = vld [vmem:[#allocation8 + $0x330] sm:$0xff] }
 0x595   :  { %5103 = vpow2.f32 %v2513_v26  ;;  %v2696_v26 = vld [vmem:[#allocation8 + $0x2c8] sm:$0xff] }
 0x59e   :  { %v5102_v41 = vpop.eup %5101 }
 0x59f   :  { %v2515_v4 = vsel %vm2130_vm1, %v5102_v41, 0.0 }
 0x5a0   :  { %2516 = vadd.xlane.f32.xlu0 %v2515_v4  ;;  %v2695_v4 = vld [vmem:[#allocation8 + $0x2c0] sm:$0xff] }
 0x5a2   :  { %v5104_v15 = vpop.eup %5103 }
 0x5a3   :  { %v2518_v34 = vsel %vm2130_vm1, %v5104_v15, 0.0 }
 0x5a4   :  { %2519 = vadd.xlane.f32.xlu1 %v2518_v34  ;;  %v2692_v34 = vld [vmem:[#allocation8 + $0x2a8] sm:$0xff] }
 0x629   :  { %v2517_v2 = vpop.xlane.xlu0 %2516 }
 0x62a   :  { %5105 = vrcp.f32 %v2517_v2  ;;  %v2701_v2 = vld [vmem:[#allocation8 + $0x2f0] sm:$0xff] }
 0x62d   :  { %v2520_v17 = vpop.xlane.xlu1 %2519 }
 0x62e   :  { %5107 = vrcp.f32 %v2520_v17  ;;  %v2688_v17 = vld [vmem:[#allocation8 + $0x288] sm:$0xff] }
 0x637   :  { %v5106_v28 = vpop.eup %5105 }
 0x638   :  { %v2523_v5 = vmul.f32 %v5106_v28, %v5102_v41  ;;  %v2706_v41 = vld [vmem:[#allocation8 + $0x318] sm:$0xff] }
 0x639   :  { %v2698_v28 = vld [vmem:[#allocation8 + $0x2d8] sm:$0xff] }
 0x63a   :  { %4949 = vmatmul.mubr.msk.f32.vlgmr.msra.gmra.mxu0 %vm2130_vm1, %v2523_v5  ;;  %v2687_v5 = vld [vmem:[#allocation8 + $0x280] sm:$0xff] }
 0x63b   :  { %2736 = vmatpush1.msra.mxu0 %v2731_v29  ;;  %2799 = vmatprep.mubr.f32.mxu0 %v5501_v3  ;;  %v5108_v36 = vpop.eup %5107  ;;  %v2697_v29 = vld [vmem:[#allocation8 + $0x2d0] sm:$0xff] }
 0x63c   :  { %2737 = vmatprep.subr.mxu0 %v2728_v30  ;;  %v2524_v39 = vmul.f32 %v5108_v36, %v5104_v15  ;;  %v2705_v15 = vld [vmem:[#allocation8 + $0x310] sm:$0xff]  ;;  %v2684_v30 = vld [vmem:[#allocation8 + $0x268] sm:$0xff] }
 0x63d   :  { %2738 = vmatpush1.msra.mxu0 %v2727_v31  ;;  %v2694_v31 = vld [vmem:[#allocation8 + $0x2b8] sm:$0xff]  ;;  %v2693_v36 = vld [vmem:[#allocation8 + $0x2b0] sm:$0xff] }
 0x63e   :  { %2739 = vmatprep.subr.mxu0 %v2724_v35  ;;  %4954 = vmatmul.mubr.msk.f32.vlgmr.msra.gmra.mxu1 %vm2130_vm1, %v2524_v39  ;;  %v2683_v35 = vld [vmem:[#allocation8 + $0x260] sm:$0xff]  ;;  %v2690_v39 = vld [vmem:[#allocation8 + $0x298] sm:$0xff] }
 0x63f   :  { %2740 = vmatpush1.msra.mxu0 %v2723_v22  ;;  %2813 = vmatpush1.msra.mxu1 %v2733_v40  ;;  %v2680_v22 = vld [vmem:[#allocation8 + $0x248] sm:$0xff]  ;;  %v2679_v40 = vld [vmem:[#allocation8 + $0x240] sm:$0xff] }
 0x640   :  { %2741 = vmatprep.subr.mxu0 %v2720_v0  ;;  %2814 = vmatprep.subr.mxu1 %v2730_v9  ;;  %v2689_v0 = vld [vmem:[#allocation8 + $0x290] sm:$0xff]  ;;  %v2676_v9 = vld [vmem:[#allocation8 + $0x228] sm:$0xff] }
 0x641   :  { %2742 = vmatpush1.msra.mxu0 %v2719_v44  ;;  %2815 = vmatpush1.msra.mxu1 %v2729_v45  ;;  %v2686_v44 = vld [vmem:[#allocation8 + $0x278] sm:$0xff]  ;;  %v2675_v45 = vld [vmem:[#allocation8 + $0x220] sm:$0xff] }
 0x642   :  { %2743 = vmatprep.subr.mxu0 %v2716_v47  ;;  %2816 = vmatprep.subr.mxu1 %v2726_v49  ;;  %v2685_v47 = vld [vmem:[#allocation8 + $0x270] sm:$0xff]  ;;  %v2672_v49 = vld [vmem:[#allocation8 + $0x208] sm:$0xff] }
 0x643   :  { %2744 = vmatpush1.msra.mxu0 %v2715_v50  ;;  %2817 = vmatpush1.msra.mxu1 %v2725_v51  ;;  %v2682_v50 = vld [vmem:[#allocation8 + $0x258] sm:$0xff]  ;;  %v2671_v51 = vld [vmem:[#allocation8 + $0x200] sm:$0xff] }
 0x644   :  { %2745 = vmatprep.subr.mxu0 %v2712_v52  ;;  %2818 = vmatprep.subr.mxu1 %v2722_v53  ;;  %v2681_v52 = vld [vmem:[#allocation8 + $0x250] sm:$0xff]  ;;  %v2678_v53 = vld [vmem:[#allocation8 + $0x238] sm:$0xff] }
 0x645   :  { %2746 = vmatpush1.msra.mxu0 %v2711_v24  ;;  %2819 = vmatpush1.msra.mxu1 %v2721_v48  ;;  %v2677_v24 = vld [vmem:[#allocation8 + $0x230] sm:$0xff]  ;;  %v2674_v48 = vld [vmem:[#allocation8 + $0x218] sm:$0xff] }
 0x646   :  { %2747 = vmatprep.subr.mxu0 %v2708_v54  ;;  %2820 = vmatprep.subr.mxu1 %v2718_v25  ;;  %v2673_v54 = vld [vmem:[#allocation8 + $0x210] sm:$0xff]  ;;  %v2360_v25 = vld [vmem:[#allocation8 + $0x1e8] sm:$0xff] }
 0x647   :  { %2748 = vmatpush1.msra.mxu0 %v2707_v18  ;;  %2821 = vmatpush1.msra.mxu1 %v2717_v56  ;;  %v2362_v18 = vld [vmem:[#allocation8 + $0x1f8] sm:$0xff]  ;;  %v2359_v56 = vld [vmem:[#allocation8 + $0x1e0] sm:$0xff] }
 0x648   :  { %2749 = vmatprep.subr.mxu0 %v2704_v57  ;;  %2822 = vmatprep.subr.mxu1 %v2714_v11  ;;  %v2361_v57 = vld [vmem:[#allocation8 + $0x1f0] sm:$0xff] }
 0x649   :  { %2750 = vmatpush1.msra.mxu0 %v2703_v58  ;;  %2823 = vmatpush1.msra.mxu1 %v2713_v21  ;;  %v2356_v58 = vld [vmem:[#allocation8 + $0x1c8] sm:$0xff]  ;;  %v2358_v21 = vld [vmem:[#allocation8 + $0x1d8] sm:$0xff] }
 0x64a   :  { %2751 = vmatprep.subr.mxu0 %v2700_v61  ;;  %2824 = vmatprep.subr.mxu1 %v2710_v16  ;;  %v2355_v61 = vld [vmem:[#allocation8 + $0x1c0] sm:$0xff]  ;;  %v2357_v16 = vld [vmem:[#allocation8 + $0x1d0] sm:$0xff] }
 0x64b   :  { %2752 = vmatpush1.msra.mxu0 %v2699_v63  ;;  %2825 = vmatpush1.msra.mxu1 %v2709_v59  ;;  %v2352_v59 = vld [vmem:[#allocation8 + $0x1a8] sm:$0xff] }
 0x64c   :  { %2753 = vmatprep.subr.mxu0 %v2696_v26  ;;  %2826 = vmatprep.subr.mxu1 %v2706_v41  ;;  %v2354_v26 = vld [vmem:[#allocation8 + $0x1b8] sm:$0xff] }
 0x64d   :  { %2754 = vmatpush1.msra.mxu0 %v2695_v4  ;;  %2827 = vmatpush1.msra.mxu1 %v2705_v15  ;;  %v2351_v4 = vld [vmem:[#allocation8 + $0x1a0] sm:$0xff]  ;;  %v2353_v15 = vld [vmem:[#allocation8 + $0x1b0] sm:$0xff] }
 0x64e   :  { %2755 = vmatprep.subr.mxu0 %v2692_v34  ;;  %2828 = vmatprep.subr.mxu1 %v2702_v37  ;;  %v2348_v34 = vld [vmem:[#allocation8 + $0x188] sm:$0xff]  ;;  %v2350_v37 = vld [vmem:[#allocation8 + $0x198] sm:$0xff] }
 0x64f   :  { %2756 = vmatpush1.msra.mxu0 %v2691_v8  ;;  %2829 = vmatpush1.msra.mxu1 %v2701_v2  ;;  %v2347_v2 = vld [vmem:[#allocation8 + $0x180] sm:$0xff] }
 0x650   :  { %2757 = vmatprep.subr.mxu0 %v2688_v17  ;;  %2830 = vmatprep.subr.mxu1 %v2698_v28  ;;  %v2349_v17 = vld [vmem:[#allocation8 + $0x190] sm:$0xff]  ;;  %v2344_v28 = vld [vmem:[#allocation8 + $0x168] sm:$0xff] }
 0x651   :  { %2758 = vmatpush1.msra.mxu0 %v2687_v5  ;;  %2831 = vmatpush1.msra.mxu1 %v2697_v29  ;;  %v2346_v5 = vld [vmem:[#allocation8 + $0x178] sm:$0xff]  ;;  %v2343_v29 = vld [vmem:[#allocation8 + $0x160] sm:$0xff] }
 0x652   :  { %2759 = vmatprep.subr.mxu0 %v2684_v30  ;;  %2832 = vmatprep.subr.mxu1 %v2694_v31  ;;  %v2345_v30 = vld [vmem:[#allocation8 + $0x170] sm:$0xff]  ;;  %v2340_v31 = vld [vmem:[#allocation8 + $0x148] sm:$0xff] }
 0x653   :  { %2760 = vmatpush1.msra.mxu0 %v2683_v35  ;;  %2833 = vmatpush1.msra.mxu1 %v2693_v36  ;;  %v2342_v35 = vld [vmem:[#allocation8 + $0x158] sm:$0xff]  ;;  %v2339_v36 = vld [vmem:[#allocation8 + $0x140] sm:$0xff] }
 0x654   :  { %2761 = vmatprep.subr.mxu0 %v2680_v22  ;;  %2834 = vmatprep.subr.mxu1 %v2690_v39  ;;  %v2341_v22 = vld [vmem:[#allocation8 + $0x150] sm:$0xff]  ;;  %v2336_v39 = vld [vmem:[#allocation8 + $0x128] sm:$0xff] }
 0x655   :  { %2762 = vmatpush1.msra.mxu0 %v2679_v40  ;;  %2835 = vmatpush1.msra.mxu1 %v2689_v0  ;;  %v2338_v40 = vld [vmem:[#allocation8 + $0x138] sm:$0xff]  ;;  %v2335_v0 = vld [vmem:[#allocation8 + $0x120] sm:$0xff] }
 0x656   :  { %2763 = vmatprep.subr.mxu0 %v2676_v9  ;;  %2836 = vmatprep.subr.mxu1 %v2686_v44  ;;  %v2337_v9 = vld [vmem:[#allocation8 + $0x130] sm:$0xff]  ;;  %v2332_v44 = vld [vmem:[#allocation8 + $0x108] sm:$0xff] }
 0x657   :  { %2764 = vmatpush1.msra.mxu0 %v2675_v45  ;;  %2837 = vmatpush1.msra.mxu1 %v2685_v47  ;;  %v2334_v45 = vld [vmem:[#allocation8 + $0x118] sm:$0xff]  ;;  %v2331_v47 = vld [vmem:[#allocation8 + $0x100] sm:$0xff] }
 0x658   :  { %2765 = vmatprep.subr.mxu0 %v2672_v49  ;;  %2838 = vmatprep.subr.mxu1 %v2682_v50  ;;  %v2333_v49 = vld [vmem:[#allocation8 + $0x110] sm:$0xff]  ;;  %v2328_v50 = vld [vmem:[#allocation8 + $0xe8] sm:$0xff] }
 0x659   :  { %2766 = vmatpush1.msra.mxu0 %v2671_v51  ;;  %2839 = vmatpush1.msra.mxu1 %v2681_v52  ;;  %v2330_v51 = vld [vmem:[#allocation8 + $0xf8] sm:$0xff]  ;;  %v2327_v52 = vld [vmem:[#allocation8 + $0xe0] sm:$0xff] }
 0x65a   :  { %2876 = vmatprep.mubr.f32.mxu1 %v5501_v3  ;;  %2840 = vmatprep.subr.mxu1 %v2678_v53  ;;  %v2329_v53 = vld [vmem:[#allocation8 + $0xf0] sm:$0xff] }
 0x65b   :  { %2841 = vmatpush1.msra.mxu1 %v2677_v24  ;;  %2889 = vmatprep.subr.mxu0 %v2360_v25  ;;  %v2324_v24 = vld [vmem:[#allocation8 + $0xc8] sm:$0xff]  ;;  %v2325_v25 = vld [vmem:[#allocation8 + $0xd0] sm:$0xff] }
 0x65c   :  { %2842 = vmatprep.subr.mxu1 %v2674_v48  ;;  %v2326_v48 = vld [vmem:[#allocation8 + $0xd8] sm:$0xff] }
 0x65d   :  { %2843 = vmatpush1.msra.mxu1 %v2673_v54  ;;  %v2323_v54 = vld [vmem:[#allocation8 + $0xc0] sm:$0xff] }
 0x65e   :  { %2966 = vmatprep.subr.mxu1 %v2362_v18  ;;  %v2320_v18 = vld [vmem:[#allocation8 + $0xa8] sm:$0xff] }
 0x6fa   :  { %v2594_v11 = vpop.f32.mrf.mxu0 }
 0x6fb   :  { %2800 = vmatmul.mubr.f32.vlgmr.msra.gmra.mxu0 %v2594_v11  ;;  %2877 = vmatmul.mubr.f32.vlgmr.msra.gmra.mxu1 %v2594_v11  ;;  %v2321_v11 = vld [vmem:[#allocation8 + $0xb0] sm:$0xff] }
 0x6fc   :  { %2890 = vmatpush1.msra.mxu0 %v2359_v56  ;;  %2967 = vmatpush1.msra.mxu1 %v2361_v57  ;;  %v4950_v63 = vpop.f32.mrf.mxu0  ;;  %v2322_v56 = vld [vmem:[#allocation8 + $0xb8] sm:$0xff]  ;;  %v2319_v57 = vld [vmem:[#allocation8 + $0xa0] sm:$0xff] }
 0x6fd   :  { %2891 = vmatprep.subr.mxu0 %v2356_v58  ;;  %2968 = vmatprep.subr.mxu1 %v2358_v21  ;;  %v2316_v58 = vld [vmem:[#allocation8 + $0x88] sm:$0xff]  ;;  %v2318_v21 = vld [vmem:[#allocation8 + $0x98] sm:$0xff] }
 0x6fe   :  { %2892 = vmatpush1.msra.mxu0 %v2355_v61  ;;  %2969 = vmatpush1.msra.mxu1 %v2357_v16  ;;  %v2667_v41 = vpop.f32.mrf.mxu1  ;;  %v2315_v61 = vld [vmem:[#allocation8 + $0x80] sm:$0xff]  ;;  %v2317_v16 = vld [vmem:[#allocation8 + $0x90] sm:$0xff]  ;;  %v2312_v63 = vld [vmem:[#allocation8 + $0x68] sm:$0xff] }
 0x6ff   :  { %2805 = vmatprep.mubr.f32.mxu0 %v5501_v3  ;;  %2882 = vmatprep.mubr.f32.mxu1 %v5501_v3 }
 0x700   :  { %2893 = vmatprep.subr.mxu0 %v2352_v59  ;;  %2970 = vmatprep.subr.mxu1 %v2354_v26  ;;  %v4955_v8 = vpop.f32.mrf.mxu1  ;;  %v2314_v59 = vld [vmem:[#allocation8 + $0x78] sm:$0xff]  ;;  %v2311_v26 = vld [vmem:[#allocation8 + $0x60] sm:$0xff] }
 0x701   :  { %2806 = vmatmul.mubr.f32.gmra.mxu0 %v2667_v41  ;;  %2883 = vmatmul.mubr.f32.gmra.mxu1 %v2667_v41  ;;  %v2313_v41 = vld [vmem:[#allocation8 + $0x70] sm:$0xff]  ;;  %v2304_v8 = vld [vmem:[#allocation8 + $0x28] sm:$0xff] }
 0x702   :  { %2894 = vmatpush1.msra.mxu0 %v2351_v4  ;;  %2971 = vmatpush1.msra.mxu1 %v2353_v15  ;;  %v2308_v4 = vld [vmem:[#allocation8 + $0x48] sm:$0xff]  ;;  %v2310_v15 = vld [vmem:[#allocation8 + $0x58] sm:$0xff] }
 0x703   :  { %2895 = vmatprep.subr.mxu0 %v2348_v34  ;;  %2972 = vmatprep.subr.mxu1 %v2350_v37  ;;  %v2307_v34 = vld [vmem:[#allocation8 + $0x40] sm:$0xff]  ;;  %v2309_v37 = vld [vmem:[#allocation8 + $0x50] sm:$0xff] }
 0x704   :  { %2896 = vmatpush1.msra.mxu0 %v2347_v2  ;;  %2973 = vmatpush1.msra.mxu1 %v2349_v17  ;;  %v2306_v2 = vld [vmem:[#allocation8 + $0x38] sm:$0xff]  ;;  %v2303_v17 = vld [vmem:[#allocation8 + $0x20] sm:$0xff] }
 0x705   :  { %2897 = vmatprep.subr.mxu0 %v2344_v28  ;;  %2974 = vmatprep.subr.mxu1 %v2346_v5  ;;  %v2305_v28 = vld [vmem:[#allocation8 + $0x30] sm:$0xff]  ;;  %v2300_v5 = vld [vmem:[#allocation8 + $0x8] sm:$0xff] }
 0x706   :  { %2898 = vmatpush1.msra.mxu0 %v2343_v29  ;;  %2975 = vmatpush1.msra.mxu1 %v2345_v30  ;;  %v2302_v29 = vld [vmem:[#allocation8 + $0x18] sm:$0xff]  ;;  %v2299_v30 = vld [vmem:[#allocation8] sm:$0xff] }
 0x707   :  { %2899 = vmatprep.subr.mxu0 %v2340_v31  ;;  %2976 = vmatprep.subr.mxu1 %v2342_v35  ;;  %v2301_v31 = vld [vmem:[#allocation8 + $0x10] sm:$0xff] }
 0x708   :  { %2900 = vmatpush1.msra.mxu0 %v2339_v36  ;;  %2977 = vmatpush1.msra.mxu1 %v2341_v22 }
 0x709   :  { %2901 = vmatprep.subr.mxu0 %v2336_v39  ;;  %2978 = vmatprep.subr.mxu1 %v2338_v40 }
 0x70a   :  { %2902 = vmatpush1.msra.mxu0 %v2335_v0  ;;  %2979 = vmatpush1.msra.mxu1 %v2337_v9 }
 0x70b   :  { %2903 = vmatprep.subr.mxu0 %v2332_v44  ;;  %2980 = vmatprep.subr.mxu1 %v2334_v45 }
 0x70c   :  { %2904 = vmatpush1.msra.mxu0 %v2331_v47  ;;  %2981 = vmatpush1.msra.mxu1 %v2333_v49 }
 0x70d   :  { %2905 = vmatprep.subr.mxu0 %v2328_v50  ;;  %2982 = vmatprep.subr.mxu1 %v2330_v51 }
 0x70e   :  { %2906 = vmatpush1.msra.mxu0 %v2327_v52  ;;  %2983 = vmatpush1.msra.mxu1 %v2329_v53 }
 0x70f   :  { %2907 = vmatprep.subr.mxu0 %v2324_v24  ;;  %2984 = vmatprep.subr.mxu1 %v2326_v48 }
 0x710   :  { %2908 = vmatpush1.msra.mxu0 %v2323_v54  ;;  %2985 = vmatpush1.msra.mxu1 %v2325_v25 }
 0x711   :  { %2909 = vmatprep.subr.mxu0 %v2320_v18  ;;  %2986 = vmatprep.subr.mxu1 %v2322_v56 }
 0x712   :  { %2910 = vmatpush1.msra.mxu0 %v2319_v57  ;;  %2987 = vmatpush1.msra.mxu1 %v2321_v11 }
 0x713   :  { %2911 = vmatprep.subr.mxu0 %v2316_v58  ;;  %2988 = vmatprep.subr.mxu1 %v2318_v21 }
 0x714   :  { %2912 = vmatpush1.msra.mxu0 %v2315_v61  ;;  %2989 = vmatpush1.msra.mxu1 %v2317_v16 }
 0x715   :  { %2913 = vmatprep.subr.mxu0 %v2312_v63  ;;  %2990 = vmatprep.subr.mxu1 %v2314_v59 }
 0x716   :  { %2914 = vmatpush1.msra.mxu0 %v2311_v26  ;;  %2991 = vmatpush1.msra.mxu1 %v2313_v41 }
 0x717   :  { %2915 = vmatprep.subr.mxu0 %v2308_v4  ;;  %2992 = vmatprep.subr.mxu1 %v2310_v15 }
 0x718   :  { %2916 = vmatpush1.msra.mxu0 %v2307_v34  ;;  %2993 = vmatpush1.msra.mxu1 %v2309_v37  ;;  %v3412_v37 = vld [vmem:[#allocation8 + $0x5e8] sm:$0xff] }
 0x719   :  { %2917 = vmatprep.subr.mxu0 %v2304_v8  ;;  %2994 = vmatprep.subr.mxu1 %v2306_v2  ;;  %v3414_v8 = vld [vmem:[#allocation8 + $0x5f8] sm:$0xff] }
 0x71a   :  { %2918 = vmatpush1.msra.mxu0 %v2303_v17  ;;  %2995 = vmatpush1.msra.mxu1 %v2305_v28 }
 0x71b   :  { %2919 = vmatprep.subr.mxu0 %v2300_v5  ;;  %2996 = vmatprep.subr.mxu1 %v2302_v29 }
 0x71c   :  { %2920 = vmatpush1.msra.mxu0 %v2299_v30  ;;  %2953 = vmatprep.mubr.f32.mxu0 %v5501_v3  ;;  %v3413_v30 = vld [vmem:[#allocation8 + $0x5f0] sm:$0xff] }
 0x71d   :  { %2997 = vmatpush1.msra.mxu1 %v2301_v31  ;;  %3030 = vmatprep.mubr.f32.mxu1 %v5501_v3 }
 0x71e   :  { %2954 = vmatmul.mubr.f32.vlgmr.msra.gmra.mxu0 %v5867_v60  ;;  %3031 = vmatmul.mubr.f32.vlgmr.msra.gmra.mxu1 %v5867_v60  ;;  %v1984_v60 = vmul.f32 0.088388346, %v5740_v27 }
 0x71f   :  { %4956 = vmatprep.subr.mxu0 %v5501_v3  ;;  %4961 = vmatprep.subr.mxu1 %v5501_v3 }
 0x720   :  { %4957 = vmatpush3.xpose.msra.mxu0 %v5822_v13  ;;  %4962 = vmatpush3.xpose.msra.mxu1 %v5828_v38  ;;  %v1988_v13 = vmul.f32 0.088388346, %v5772_v62 }
 0x721   :  { %2959 = vmatprep.mubr.f32.mxu0 %v5501_v3  ;;  %3036 = vmatprep.mubr.f32.mxu1 %v5501_v3 }
 0x722   :  { %2960 = vmatmul.mubr.f32.gmra.mxu0 %v5869_v43  ;;  %3037 = vmatmul.mubr.f32.gmra.mxu1 %v5869_v43 }
 0x723   :  { %4958 = vmatprep.mubr.msk.f32.mxu0 %vm5502_vm0, %v5501_v3  ;;  %4963 = vmatprep.mubr.msk.f32.mxu1 %vm5502_vm0, %v5501_v3 }
 0x724   :  { %4966 = vmatprep.subr.mxu0 %v5501_v3  ;;  %4971 = vmatprep.subr.mxu1 %v5501_v3 }
 0x726   :  { %4959 = vmatmul.mubr.f32.vlgmr.msra.gmra.mxu0 %v1984_v60  ;;  %4964 = vmatmul.mubr.f32.vlgmr.msra.gmra.mxu1 %v1988_v13  ;;  %v3411_v60 = vld [vmem:[#allocation8 + $0x5e0] sm:$0xff]  ;;  %v3410_v13 = vld [vmem:[#allocation8 + $0x5d8] sm:$0xff] }
 0x727   :  { %4967 = vmatpush3.msra.mxu0 %v5838_v32  ;;  %4972 = vmatpush3.msra.mxu1 %v5843_v10 }
 0x728   :  { %4968 = vmatprep.mubr.msk.f32.mxu0 %vm5502_vm0, %v5501_v3  ;;  %4973 = vmatprep.mubr.msk.f32.mxu1 %vm5502_vm0, %v5501_v3 }
 0x729   :  { %3415 = vmatprep.subr.mxu0 %v3412_v37  ;;  %3492 = vmatprep.subr.mxu1 %v3414_v8  ;;  %v3376_v37 = vld [vmem:[#allocation8 + $0x4c8] sm:$0xff]  ;;  %v3377_v8 = vld [vmem:[#allocation8 + $0x4d0] sm:$0xff] }
 0x7bb   :  { %v2801_v38 = vpop.f32.mrf.mxu0  ;;  %v2878_v27 = vpop.f32.mrf.mxu1 }
 0x7bd   :  { %v2803_v43 = vpop.f32.mrf.mxu0  ;;  %v2880_v62 = vpop.f32.mrf.mxu1 }
 0x7c1   :  { %v2807_v35 = vpop.f32.mrf.mxu0  ;;  %v2884_v36 = vpop.f32.mrf.mxu1 }
 0x7c3   :  { %v2809_v22 = vpop.f32.mrf.mxu0  ;;  %v2886_v39 = vpop.f32.mrf.mxu1 }
 0x7de   :  { %v2955_v40 = vpop.f32.mrf.mxu0  ;;  %v3032_v0 = vpop.f32.mrf.mxu1 }
 0x7df   :  { %v5907_v9 = vadd.f32 %v2955_v40, %v2801_v38  ;;  %v5909_v32 = vadd.f32 %v3032_v0, %v2878_v27  ;;  %v3408_v38 = vld [vmem:[#allocation8 + $0x5c8] sm:$0xff]  ;;  %v3409_v27 = vld [vmem:[#allocation8 + $0x5d0] sm:$0xff] }
 0x7e0   :  { %v2957_v10 = vpop.f32.mrf.mxu0  ;;  %v3034_v44 = vpop.f32.mrf.mxu1  ;;  %v3400_v40 = vld [vmem:[#allocation8 + $0x588] sm:$0xff]  ;;  %v3401_v0 = vld [vmem:[#allocation8 + $0x590] sm:$0xff] }
 0x7e1   :  { %v5911_v45 = vadd.f32 %v2957_v10, %v2803_v43  ;;  %v5913_v47 = vadd.f32 %v3034_v44, %v2880_v62  ;;  %v3407_v43 = vld [vmem:[#allocation8 + $0x5c0] sm:$0xff]  ;;  %v3406_v62 = vld [vmem:[#allocation8 + $0x5b8] sm:$0xff] }
 0x7e2   :  { %v2961_v49 = vpop.f32.mrf.mxu0  ;;  %v3038_v50 = vpop.f32.mrf.mxu1  ;;  %v3399_v10 = vld [vmem:[#allocation8 + $0x580] sm:$0xff]  ;;  %v3398_v44 = vld [vmem:[#allocation8 + $0x578] sm:$0xff] }
 0x7e3   :  { %v5915_v51 = vadd.f32 %v2961_v49, %v2807_v35  ;;  %v5917_v52 = vadd.f32 %v3038_v50, %v2884_v36  ;;  %v3404_v35 = vld [vmem:[#allocation8 + $0x5a8] sm:$0xff]  ;;  %v3405_v36 = vld [vmem:[#allocation8 + $0x5b0] sm:$0xff] }
 0x7e4   :  { %v2963_v53 = vpop.f32.mrf.mxu0  ;;  %v3040_v24 = vpop.f32.mrf.mxu1  ;;  %v3396_v49 = vld [vmem:[#allocation8 + $0x568] sm:$0xff]  ;;  %v3397_v50 = vld [vmem:[#allocation8 + $0x570] sm:$0xff] }
 0x7e5   :  { %v5919_v48 = vadd.f32 %v2963_v53, %v2809_v22  ;;  %v5921_v54 = vadd.f32 %v3040_v24, %v2886_v39  ;;  %v3403_v22 = vld [vmem:[#allocation8 + $0x5a0] sm:$0xff]  ;;  %v3402_v39 = vld [vmem:[#allocation8 + $0x598] sm:$0xff] }
 0x7e6   :  { %v3109_v25 = vpop.f32.mrf.mxu0  ;;  %v3179_v18 = vpop.f32.mrf.mxu1  ;;  %v3395_v53 = vld [vmem:[#allocation8 + $0x560] sm:$0xff]  ;;  %v3394_v24 = vld [vmem:[#allocation8 + $0x558] sm:$0xff] }
 0x7e7   :  { %v3186_v56 = vsel %vm2130_vm1, %v3179_v18, -inf  ;;  %v3183_v57 = vsel %vm2130_vm1, %v3109_v25, -inf }
 0x7e8   :  { %3187 = vmax.xlane.f32.xlu1 %v3186_v56  ;;  %v4965_v11 = vpop.f32.mrf.mxu1  ;;  %3184 = vmax.xlane.f32.xlu0 %v3183_v57  ;;  %v4960_v58 = vpop.f32.mrf.mxu0  ;;  %v3391_v56 = vld [vmem:[#allocation8 + $0x540] sm:$0xff]  ;;  %v3390_v57 = vld [vmem:[#allocation8 + $0x538] sm:$0xff] }
 0x7e9   :  { %v3388_v11 = vld [vmem:[#allocation8 + $0x528] sm:$0xff]  ;;  %v3389_v58 = vld [vmem:[#allocation8 + $0x530] sm:$0xff] }
 0x871   :  { %v3188_v21 = vpop.xlane.xlu1 %3187  ;;  %v3185_v61 = vpop.xlane.xlu0 %3184 }
 0x872   :  { %v3190_v16 = vsub.f32 %v3179_v18, %v3188_v21  ;;  %v3189_v63 = vsub.f32 %v3109_v25, %v3185_v61  ;;  %v3392_v25 = vld [vmem:[#allocation8 + $0x548] sm:$0xff]  ;;  %v3393_v18 = vld [vmem:[#allocation8 + $0x550] sm:$0xff]  ;;  %v3387_v21 = vld [vmem:[#allocation8 + $0x520] sm:$0xff] }
 0x873   :  { %v3386_v61 = vld [vmem:[#allocation8 + $0x518] sm:$0xff] }
 0x874   :  { %v3193_v59 = vmul.f32 1.442695, %v3190_v16  ;;  %v3191_v26 = vmul.f32 1.442695, %v3189_v63  ;;  %v3384_v16 = vld [vmem:[#allocation8 + $0x508] sm:$0xff]  ;;  %v3385_v63 = vld [vmem:[#allocation8 + $0x510] sm:$0xff] }
 0x876   :  { %5109 = vpow2.f32 %v3193_v59  ;;  %v3383_v59 = vld [vmem:[#allocation8 + $0x500] sm:$0xff] }
 0x877   :  { %5111 = vpow2.f32 %v3191_v26  ;;  %v3382_v26 = vld [vmem:[#allocation8 + $0x4f8] sm:$0xff] }
 0x883   :  { %v5110_v41 = vpop.eup %5109 }
 0x884   :  { %v5112_v4 = vpop.eup %5111  ;;  %v3198_v15 = vsel %vm2130_vm1, %v5110_v41, 0.0 }
 0x885   :  { %3199 = vadd.xlane.f32.xlu1 %v3198_v15  ;;  %v3195_v34 = vsel %vm2130_vm1, %v5112_v4, 0.0  ;;  %v3379_v15 = vld [vmem:[#allocation8 + $0x4e0] sm:$0xff] }
 0x886   :  { %3196 = vadd.xlane.f32.xlu0 %v3195_v34  ;;  %v3378_v34 = vld [vmem:[#allocation8 + $0x4d8] sm:$0xff] }
 0x90e   :  { %v3200_v2 = vpop.xlane.xlu1 %3199 }
 0x90f   :  { %5113 = vrcp.f32 %v3200_v2  ;;  %v3197_v17 = vpop.xlane.xlu0 %3196  ;;  %v3375_v2 = vld [vmem:[#allocation8 + $0x4c0] sm:$0xff] }
 0x910   :  { %5115 = vrcp.f32 %v3197_v17  ;;  %v3374_v17 = vld [vmem:[#allocation8 + $0x4b8] sm:$0xff] }
 0x91c   :  { %v5114_v28 = vpop.eup %5113 }
 0x91d   :  { %v5116_v5 = vpop.eup %5115  ;;  %v3204_v29 = vmul.f32 %v5114_v28, %v5110_v41  ;;  %v3380_v41 = vld [vmem:[#allocation8 + $0x4e8] sm:$0xff] }
 0x91e   :  { %v3203_v31 = vmul.f32 %v5116_v5, %v5112_v4  ;;  %v3381_v4 = vld [vmem:[#allocation8 + $0x4f0] sm:$0xff]  ;;  %v3372_v28 = vld [vmem:[#allocation8 + $0x4a8] sm:$0xff] }
 0x91f   :  { %4974 = vmatmul.mubr.msk.f32.vlgmr.msra.gmra.mxu1 %vm2130_vm1, %v3204_v29  ;;  %v3373_v5 = vld [vmem:[#allocation8 + $0x4b0] sm:$0xff]  ;;  %v3371_v29 = vld [vmem:[#allocation8 + $0x4a0] sm:$0xff] }
 0x920   :  { %4969 = vmatmul.mubr.msk.f32.vlgmr.msra.gmra.mxu0 %vm2130_vm1, %v3203_v31  ;;  %3493 = vmatpush1.msra.mxu1 %v3413_v30  ;;  %v3370_v30 = vld [vmem:[#allocation8 + $0x498] sm:$0xff]  ;;  %v3368_v31 = vld [vmem:[#allocation8 + $0x488] sm:$0xff] }
 0x921   :  { %3416 = vmatpush1.msra.mxu0 %v3411_v60  ;;  %3494 = vmatprep.subr.mxu1 %v3410_v13  ;;  %v3369_v60 = vld [vmem:[#allocation8 + $0x490] sm:$0xff]  ;;  %v3367_v13 = vld [vmem:[#allocation8 + $0x480] sm:$0xff] }
 0x922   :  { %3417 = vmatprep.subr.mxu0 %v3408_v38  ;;  %3495 = vmatpush1.msra.mxu1 %v3409_v27  ;;  %v3366_v38 = vld [vmem:[#allocation8 + $0x478] sm:$0xff]  ;;  %v3364_v27 = vld [vmem:[#allocation8 + $0x468] sm:$0xff] }
 0x923   :  { %3418 = vmatpush1.msra.mxu0 %v3407_v43  ;;  %3496 = vmatprep.subr.mxu1 %v3406_v62  ;;  %v3365_v43 = vld [vmem:[#allocation8 + $0x470] sm:$0xff]  ;;  %v3363_v62 = vld [vmem:[#allocation8 + $0x460] sm:$0xff] }
 0x924   :  { %3419 = vmatprep.subr.mxu0 %v3404_v35  ;;  %3497 = vmatpush1.msra.mxu1 %v3405_v36  ;;  %v3362_v35 = vld [vmem:[#allocation8 + $0x458] sm:$0xff]  ;;  %v3360_v36 = vld [vmem:[#allocation8 + $0x448] sm:$0xff] }
 0x925   :  { %3420 = vmatpush1.msra.mxu0 %v3403_v22  ;;  %3498 = vmatprep.subr.mxu1 %v3402_v39  ;;  %v3361_v22 = vld [vmem:[#allocation8 + $0x450] sm:$0xff]  ;;  %v3359_v39 = vld [vmem:[#allocation8 + $0x440] sm:$0xff] }
 0x926   :  { %3421 = vmatprep.subr.mxu0 %v3400_v40  ;;  %3499 = vmatpush1.msra.mxu1 %v3401_v0  ;;  %v3358_v40 = vld [vmem:[#allocation8 + $0x438] sm:$0xff]  ;;  %v3356_v0 = vld [vmem:[#allocation8 + $0x428] sm:$0xff] }
 0x927   :  { %3422 = vmatpush1.msra.mxu0 %v3399_v10  ;;  %3500 = vmatprep.subr.mxu1 %v3398_v44  ;;  %v3357_v10 = vld [vmem:[#allocation8 + $0x430] sm:$0xff]  ;;  %v3355_v44 = vld [vmem:[#allocation8 + $0x420] sm:$0xff] }
 0x928   :  { %3423 = vmatprep.subr.mxu0 %v3396_v49  ;;  %3501 = vmatpush1.msra.mxu1 %v3397_v50  ;;  %v3354_v49 = vld [vmem:[#allocation8 + $0x418] sm:$0xff]  ;;  %v3352_v50 = vld [vmem:[#allocation8 + $0x408] sm:$0xff] }
 0x929   :  { %3424 = vmatpush1.msra.mxu0 %v3395_v53  ;;  %3502 = vmatprep.subr.mxu1 %v3394_v24  ;;  %v3353_v53 = vld [vmem:[#allocation8 + $0x410] sm:$0xff]  ;;  %v3351_v24 = vld [vmem:[#allocation8 + $0x400] sm:$0xff] }
 0x92a   :  { %3425 = vmatprep.subr.mxu0 %v3392_v25  ;;  %3503 = vmatpush1.msra.mxu1 %v3393_v18 }
 0x92b   :  { %3426 = vmatpush1.msra.mxu0 %v3391_v56  ;;  %3504 = vmatprep.subr.mxu1 %v3390_v57 }
 0x92c   :  { %3427 = vmatprep.subr.mxu0 %v3388_v11  ;;  %3505 = vmatpush1.msra.mxu1 %v3389_v58 }
 0x92d   :  { %3428 = vmatpush1.msra.mxu0 %v3387_v21  ;;  %3506 = vmatprep.subr.mxu1 %v3386_v61 }
 0x92e   :  { %3429 = vmatprep.subr.mxu0 %v3384_v16  ;;  %3507 = vmatpush1.msra.mxu1 %v3385_v63 }
 0x92f   :  { %3430 = vmatpush1.msra.mxu0 %v3383_v59  ;;  %3508 = vmatprep.subr.mxu1 %v3382_v26 }
 0x930   :  { %3431 = vmatprep.subr.mxu0 %v3380_v41  ;;  %3509 = vmatpush1.msra.mxu1 %v3381_v4 }
 0x931   :  { %3432 = vmatpush1.msra.mxu0 %v3379_v15  ;;  %3510 = vmatprep.subr.mxu1 %v3378_v34 }
 0x932   :  { %3433 = vmatprep.subr.mxu0 %v3376_v37  ;;  %3511 = vmatpush1.msra.mxu1 %v3377_v8 }
 0x933   :  { %3434 = vmatpush1.msra.mxu0 %v3375_v2  ;;  %3512 = vmatprep.subr.mxu1 %v3374_v17 }
 0x934   :  { %3435 = vmatprep.subr.mxu0 %v3372_v28  ;;  %3513 = vmatpush1.msra.mxu1 %v3373_v5 }
 0x935   :  { %3436 = vmatpush1.msra.mxu0 %v3371_v29  ;;  %3514 = vmatprep.subr.mxu1 %v3370_v30 }
 0x936   :  { %3437 = vmatprep.subr.mxu0 %v3368_v31  ;;  %3515 = vmatpush1.msra.mxu1 %v3369_v60  ;;  %v3946_v31 = vld [vmem:[#allocation8 + $0x7e8] sm:$0xff]  ;;  %v3948_v60 = vld [vmem:[#allocation8 + $0x7f8] sm:$0xff] }
 0x937   :  { %3438 = vmatpush1.msra.mxu0 %v3367_v13  ;;  %3516 = vmatprep.subr.mxu1 %v3366_v38 }
 0x938   :  { %3439 = vmatprep.subr.mxu0 %v3364_v27  ;;  %3517 = vmatpush1.msra.mxu1 %v3365_v43 }
 0x939   :  { %3440 = vmatpush1.msra.mxu0 %v3363_v62  ;;  %3518 = vmatprep.subr.mxu1 %v3362_v35  ;;  %v3947_v35 = vld [vmem:[#allocation8 + $0x7f0] sm:$0xff] }
 0x93a   :  { %3441 = vmatprep.subr.mxu0 %v3360_v36  ;;  %3519 = vmatpush1.msra.mxu1 %v3361_v22  ;;  %v3945_v22 = vld [vmem:[#allocation8 + $0x7e0] sm:$0xff] }
 0x93b   :  { %3442 = vmatpush1.msra.mxu0 %v3359_v39  ;;  %3520 = vmatprep.subr.mxu1 %v3358_v40  ;;  %v3944_v39 = vld [vmem:[#allocation8 + $0x7d8] sm:$0xff]  ;;  %v3942_v40 = vld [vmem:[#allocation8 + $0x7c8] sm:$0xff] }
 0x93c   :  { %3443 = vmatprep.subr.mxu0 %v3356_v0  ;;  %3521 = vmatpush1.msra.mxu1 %v3357_v10  ;;  %v3943_v0 = vld [vmem:[#allocation8 + $0x7d0] sm:$0xff]  ;;  %v3941_v10 = vld [vmem:[#allocation8 + $0x7c0] sm:$0xff] }
 0x93d   :  { %3444 = vmatpush1.msra.mxu0 %v3355_v44  ;;  %3522 = vmatprep.subr.mxu1 %v3354_v49  ;;  %v3940_v44 = vld [vmem:[#allocation8 + $0x7b8] sm:$0xff]  ;;  %v3938_v49 = vld [vmem:[#allocation8 + $0x7a8] sm:$0xff] }
 0x93e   :  { %3445 = vmatprep.subr.mxu0 %v3352_v50  ;;  %3523 = vmatpush1.msra.mxu1 %v3353_v53  ;;  %v3939_v50 = vld [vmem:[#allocation8 + $0x7b0] sm:$0xff]  ;;  %v3937_v53 = vld [vmem:[#allocation8 + $0x7a0] sm:$0xff] }
 0x93f   :  { %3446 = vmatpush1.msra.mxu0 %v3351_v24  ;;  %3479 = vmatprep.mubr.f32.mxu0 %v5501_v3  ;;  %v3936_v24 = vld [vmem:[#allocation8 + $0x798] sm:$0xff] }
 0x940   :  { %3556 = vmatprep.mubr.f32.mxu1 %v5501_v3  ;;  %4976 = vmatprep.subr.mxu0 %v5501_v3 }
 0x941   :  { %4981 = vmatprep.subr.mxu1 %v5501_v3 }
 0x9df   :  { %v3347_v25 = vpop.f32.mrf.mxu1 }
 0x9e0   :  { %v3274_v18 = vpop.f32.mrf.mxu0 }
 0x9e1   :  { %3480 = vmatmul.mubr.f32.vlgmr.msra.gmra.mxu0 %v3274_v18  ;;  %3557 = vmatmul.mubr.f32.vlgmr.msra.gmra.mxu1 %v3274_v18  ;;  %v4975_v56 = vpop.f32.mrf.mxu1  ;;  %v3935_v18 = vld [vmem:[#allocation8 + $0x790] sm:$0xff] }
 0x9e2   :  { %4977 = vmatpush3.xpose.msra.mxu0 %v5824_v20  ;;  %4982 = vmatpush3.xpose.msra.mxu1 %v5830_v42  ;;  %v4970_v57 = vpop.f32.mrf.mxu0  ;;  %v1985_v20 = vmul.f32 0.088388346, %v5749_v12  ;;  %v1989_v42 = vmul.f32 0.088388346, %v5774_v14  ;;  %v3933_v56 = vld [vmem:[#allocation8 + $0x780] sm:$0xff] }
 0x9e3   :  { %3485 = vmatprep.mubr.f32.mxu0 %v5501_v3  ;;  %3562 = vmatprep.mubr.f32.mxu1 %v5501_v3  ;;  %v3932_v57 = vld [vmem:[#allocation8 + $0x778] sm:$0xff] }
 0x9e4   :  { %4986 = vmatprep.subr.mxu0 %v5501_v3  ;;  %4991 = vmatprep.subr.mxu1 %v5501_v3 }
 0x9e5   :  { %3486 = vmatmul.mubr.f32.gmra.mxu0 %v3347_v25  ;;  %3563 = vmatmul.mubr.f32.gmra.mxu1 %v3347_v25  ;;  %v3934_v25 = vld [vmem:[#allocation8 + $0x788] sm:$0xff] }
 0x9e6   :  { %4978 = vmatprep.mubr.msk.f32.mxu0 %vm5502_vm0, %v5501_v3  ;;  %4983 = vmatprep.mubr.msk.f32.mxu1 %vm5502_vm0, %v5501_v3 }
 0x9e9   :  { %4979 = vmatmul.mubr.f32.vlgmr.msra.gmra.mxu0 %v1985_v20  ;;  %4984 = vmatmul.mubr.f32.vlgmr.msra.gmra.mxu1 %v1989_v42  ;;  %v3930_v20 = vld [vmem:[#allocation8 + $0x768] sm:$0xff]  ;;  %v3931_v42 = vld [vmem:[#allocation8 + $0x770] sm:$0xff] }
 0x9ea   :  { %4987 = vmatpush3.msra.mxu0 %v5840_v23  ;;  %4992 = vmatpush3.msra.mxu1 %v5845_v1 }
 0x9eb   :  { %4988 = vmatprep.mubr.msk.f32.mxu0 %vm5502_vm0, %v5501_v3  ;;  %4993 = vmatprep.mubr.msk.f32.mxu1 %vm5502_vm0, %v5501_v3 }
 0x9ec   :  { %3949 = vmatprep.subr.mxu0 %v3946_v31  ;;  %4026 = vmatprep.subr.mxu1 %v3948_v60  ;;  %v3905_v31 = vld [vmem:[#allocation8 + $0x6a0] sm:$0xff]  ;;  %v3904_v60 = vld [vmem:[#allocation8 + $0x698] sm:$0xff] }
 0xaa1   :  { %v3481_v11 = vpop.f32.mrf.mxu0  ;;  %v3558_v58 = vpop.f32.mrf.mxu1 }
 0xaa2   :  { %v5952_v21 = vadd.f32 %v3481_v11, %v5907_v9  ;;  %v5955_v12 = vadd.f32 %v3558_v58, %v5909_v32  ;;  %v3929_v11 = vld [vmem:[#allocation8 + $0x760] sm:$0xff]  ;;  %v3928_v58 = vld [vmem:[#allocation8 + $0x758] sm:$0xff] }
 0xaa3   :  { %v3483_v14 = vpop.f32.mrf.mxu0  ;;  %v3560_v61 = vpop.f32.mrf.mxu1 }
 0xaa4   :  { %v5958_v23 = vadd.f32 %v3483_v14, %v5911_v45  ;;  %v5961_v1 = vadd.f32 %v3560_v61, %v5913_v47  ;;  %v3926_v14 = vld [vmem:[#allocation8 + $0x748] sm:$0xff]  ;;  %v3927_v61 = vld [vmem:[#allocation8 + $0x750] sm:$0xff] }
 0xaa5   :  { %v3487_v16 = vpop.f32.mrf.mxu0  ;;  %v3564_v63 = vpop.f32.mrf.mxu1 }
 0xaa6   :  { %v5964_v59 = vadd.f32 %v3487_v16, %v5915_v51  ;;  %v5967_v26 = vadd.f32 %v3564_v63, %v5917_v52  ;;  %v3925_v16 = vld [vmem:[#allocation8 + $0x740] sm:$0xff]  ;;  %v3924_v63 = vld [vmem:[#allocation8 + $0x738] sm:$0xff] }
 0xaa7   :  { %v3489_v9 = vpop.f32.mrf.mxu0  ;;  %v3566_v41 = vpop.f32.mrf.mxu1 }
 0xaa8   :  { %v5970_v32 = vadd.f32 %v3489_v9, %v5919_v48  ;;  %v5973_v4 = vadd.f32 %v3566_v41, %v5921_v54  ;;  %v3922_v9 = vld [vmem:[#allocation8 + $0x728] sm:$0xff]  ;;  %v3923_v41 = vld [vmem:[#allocation8 + $0x730] sm:$0xff] }
 0xaa9   :  { %v3643_v45 = vpop.f32.mrf.mxu0  ;;  %v3713_v15 = vpop.f32.mrf.mxu1 }
 0xaaa   :  { %v3720_v47 = vsel %vm2130_vm1, %v3713_v15, -inf  ;;  %v3717_v34 = vsel %vm2130_vm1, %v3643_v45, -inf }
 0xaab   :  { %3721 = vmax.xlane.f32.xlu1 %v3720_v47  ;;  %v4985_v51 = vpop.f32.mrf.mxu1  ;;  %3718 = vmax.xlane.f32.xlu0 %v3717_v34  ;;  %v4980_v37 = vpop.f32.mrf.mxu0  ;;  %v3918_v47 = vld [vmem:[#allocation8 + $0x708] sm:$0xff]  ;;  %v3919_v34 = vld [vmem:[#allocation8 + $0x710] sm:$0xff] }
 0xaac   :  { %v3917_v51 = vld [vmem:[#allocation8 + $0x700] sm:$0xff]  ;;  %v3916_v37 = vld [vmem:[#allocation8 + $0x6f8] sm:$0xff] }
 0xb34   :  { %v3722_v52 = vpop.xlane.xlu1 %3721  ;;  %v3719_v8 = vpop.xlane.xlu0 %3718 }
 0xb35   :  { %v3724_v2 = vsub.f32 %v3713_v15, %v3722_v52  ;;  %v3723_v17 = vsub.f32 %v3643_v45, %v3719_v8  ;;  %v3921_v45 = vld [vmem:[#allocation8 + $0x720] sm:$0xff]  ;;  %v3920_v15 = vld [vmem:[#allocation8 + $0x718] sm:$0xff]  ;;  %v3914_v52 = vld [vmem:[#allocation8 + $0x6e8] sm:$0xff] }
 0xb36   :  { %v3915_v8 = vld [vmem:[#allocation8 + $0x6f0] sm:$0xff] }
 0xb37   :  { %v3727_v28 = vmul.f32 1.442695, %v3724_v2  ;;  %v3725_v48 = vmul.f32 1.442695, %v3723_v17  ;;  %v3913_v2 = vld [vmem:[#allocation8 + $0x6e0] sm:$0xff]  ;;  %v3912_v17 = vld [vmem:[#allocation8 + $0x6d8] sm:$0xff] }
 0xb39   :  { %5117 = vpow2.f32 %v3727_v28  ;;  %v3910_v28 = vld [vmem:[#allocation8 + $0x6c8] sm:$0xff] }
 0xb3a   :  { %5119 = vpow2.f32 %v3725_v48  ;;  %v3911_v48 = vld [vmem:[#allocation8 + $0x6d0] sm:$0xff] }
 0xb46   :  { %v5118_v54 = vpop.eup %5117 }
 0xb47   :  { %v5120_v5 = vpop.eup %5119  ;;  %v3732_v29 = vsel %vm2130_vm1, %v5118_v54, 0.0 }
 0xb48   :  { %3733 = vadd.xlane.f32.xlu1 %v3732_v29  ;;  %v3729_v30 = vsel %vm2130_vm1, %v5120_v5, 0.0  ;;  %v3906_v29 = vld [vmem:[#allocation8 + $0x6a8] sm:$0xff] }
 0xb49   :  { %3730 = vadd.xlane.f32.xlu0 %v3729_v30  ;;  %v3907_v30 = vld [vmem:[#allocation8 + $0x6b0] sm:$0xff] }
 0xbd1   :  { %v3734_v13 = vpop.xlane.xlu1 %3733 }
 0xbd2   :  { %5121 = vrcp.f32 %v3734_v13  ;;  %v3731_v38 = vpop.xlane.xlu0 %3730  ;;  %v3902_v13 = vld [vmem:[#allocation8 + $0x688] sm:$0xff] }
 0xbd3   :  { %5123 = vrcp.f32 %v3731_v38  ;;  %v3903_v38 = vld [vmem:[#allocation8 + $0x690] sm:$0xff] }
 0xbdf   :  { %v5122_v27 = vpop.eup %5121 }
 0xbe0   :  { %v5124_v43 = vpop.eup %5123  ;;  %v3738_v62 = vmul.f32 %v5122_v27, %v5118_v54  ;;  %v3909_v54 = vld [vmem:[#allocation8 + $0x6c0] sm:$0xff] }
 0xbe1   :  { %v3737_v36 = vmul.f32 %v5124_v43, %v5120_v5  ;;  %v3908_v5 = vld [vmem:[#allocation8 + $0x6b8] sm:$0xff]  ;;  %v3901_v27 = vld [vmem:[#allocation8 + $0x680] sm:$0xff] }
 0xbe2   :  { %4994 = vmatmul.mubr.msk.f32.vlgmr.msra.gmra.mxu1 %vm2130_vm1, %v3738_v62  ;;  %v3900_v43 = vld [vmem:[#allocation8 + $0x678] sm:$0xff]  ;;  %v3898_v62 = vld [vmem:[#allocation8 + $0x668] sm:$0xff] }
 0xbe3   :  { %4989 = vmatmul.mubr.msk.f32.vlgmr.msra.gmra.mxu0 %vm2130_vm1, %v3737_v36  ;;  %4027 = vmatpush1.msra.mxu1 %v3947_v35  ;;  %v3899_v35 = vld [vmem:[#allocation8 + $0x670] sm:$0xff]  ;;  %v3897_v36 = vld [vmem:[#allocation8 + $0x660] sm:$0xff] }
 0xbe4   :  { %3950 = vmatpush1.msra.mxu0 %v3945_v22  ;;  %4028 = vmatprep.subr.mxu1 %v3944_v39  ;;  %v3896_v22 = vld [vmem:[#allocation8 + $0x658] sm:$0xff]  ;;  %v3894_v39 = vld [vmem:[#allocation8 + $0x648] sm:$0xff] }
 0xbe5   :  { %3951 = vmatprep.subr.mxu0 %v3942_v40  ;;  %4029 = vmatpush1.msra.mxu1 %v3943_v0  ;;  %v3895_v40 = vld [vmem:[#allocation8 + $0x650] sm:$0xff]  ;;  %v3893_v0 = vld [vmem:[#allocation8 + $0x640] sm:$0xff] }
 0xbe6   :  { %3952 = vmatpush1.msra.mxu0 %v3941_v10  ;;  %4030 = vmatprep.subr.mxu1 %v3940_v44  ;;  %v3892_v10 = vld [vmem:[#allocation8 + $0x638] sm:$0xff]  ;;  %v3890_v44 = vld [vmem:[#allocation8 + $0x628] sm:$0xff] }
 0xbe7   :  { %3953 = vmatprep.subr.mxu0 %v3938_v49  ;;  %4031 = vmatpush1.msra.mxu1 %v3939_v50  ;;  %v3891_v49 = vld [vmem:[#allocation8 + $0x630] sm:$0xff]  ;;  %v3889_v50 = vld [vmem:[#allocation8 + $0x620] sm:$0xff] }
 0xbe8   :  { %3954 = vmatpush1.msra.mxu0 %v3937_v53  ;;  %4032 = vmatprep.subr.mxu1 %v3936_v24  ;;  %v3888_v53 = vld [vmem:[#allocation8 + $0x618] sm:$0xff]  ;;  %v3886_v24 = vld [vmem:[#allocation8 + $0x608] sm:$0xff] }
 0xbe9   :  { %3955 = vmatprep.subr.mxu0 %v3934_v25  ;;  %4033 = vmatpush1.msra.mxu1 %v3935_v18  ;;  %v3885_v25 = vld [vmem:[#allocation8 + $0x600] sm:$0xff]  ;;  %v3887_v18 = vld [vmem:[#allocation8 + $0x610] sm:$0xff] }
 0xbea   :  { %3956 = vmatpush1.msra.mxu0 %v3933_v56  ;;  %4034 = vmatprep.subr.mxu1 %v3932_v57  ;;  %v4172_v56 = vld [vmem:[#allocation11 + $0xf8] sm:$0xff] }
 0xbeb   :  { %3957 = vmatprep.subr.mxu0 %v3930_v20  ;;  %4035 = vmatpush1.msra.mxu1 %v3931_v42  ;;  %v4204_v57 = vld [vmem:[#allocation11 + $0x1f8] sm:$0xff] }
 0xbec   :  { %3958 = vmatpush1.msra.mxu0 %v3929_v11  ;;  %4036 = vmatprep.subr.mxu1 %v3928_v58  ;;  %v4156_v11 = vld [vmem:[#allocation11 + $0x78] sm:$0xff] }
 0xbed   :  { %3959 = vmatprep.subr.mxu0 %v3926_v14  ;;  %4037 = vmatpush1.msra.mxu1 %v3927_v61  ;;  %v4188_v58 = vld [vmem:[#allocation11 + $0x178] sm:$0xff]  ;;  %v4171_v61 = vld [vmem:[#allocation11 + $0xf0] sm:$0xff] }
 0xbee   :  { %3960 = vmatpush1.msra.mxu0 %v3925_v16  ;;  %4038 = vmatprep.subr.mxu1 %v3924_v63  ;;  %v4203_v16 = vld [vmem:[#allocation11 + $0x1f0] sm:$0xff] }
 0xbef   :  { %3961 = vmatprep.subr.mxu0 %v3922_v9  ;;  %4039 = vmatpush1.msra.mxu1 %v3923_v41  ;;  %v4155_v9 = vld [vmem:[#allocation11 + $0x70] sm:$0xff] }
 0xbf0   :  { %3962 = vmatpush1.msra.mxu0 %v3921_v45  ;;  %4040 = vmatprep.subr.mxu1 %v3920_v15  ;;  %v4187_v41 = vld [vmem:[#allocation11 + $0x170] sm:$0xff]  ;;  %v4170_v45 = vld [vmem:[#allocation11 + $0xe8] sm:$0xff] }
 0xbf1   :  { %3963 = vmatprep.subr.mxu0 %v3918_v47  ;;  %4041 = vmatpush1.msra.mxu1 %v3919_v34  ;;  %v4202_v15 = vld [vmem:[#allocation11 + $0x1e8] sm:$0xff] }
 0xbf2   :  { %3964 = vmatpush1.msra.mxu0 %v3917_v51  ;;  %4042 = vmatprep.subr.mxu1 %v3916_v37  ;;  %v4154_v47 = vld [vmem:[#allocation11 + $0x68] sm:$0xff]  ;;  %v4169_v51 = vld [vmem:[#allocation11 + $0xe0] sm:$0xff] }
 0xbf3   :  { %3965 = vmatprep.subr.mxu0 %v3914_v52  ;;  %4043 = vmatpush1.msra.mxu1 %v3915_v8  ;;  %v4186_v34 = vld [vmem:[#allocation11 + $0x168] sm:$0xff]  ;;  %v4201_v37 = vld [vmem:[#allocation11 + $0x1e0] sm:$0xff] }
 0xbf4   :  { %3966 = vmatpush1.msra.mxu0 %v3913_v2  ;;  %4044 = vmatprep.subr.mxu1 %v3912_v17  ;;  %v4153_v52 = vld [vmem:[#allocation11 + $0x60] sm:$0xff]  ;;  %v4168_v2 = vld [vmem:[#allocation11 + $0xd8] sm:$0xff] }
 0xbf5   :  { %3967 = vmatprep.subr.mxu0 %v3910_v28  ;;  %4045 = vmatpush1.msra.mxu1 %v3911_v48  ;;  %v4185_v8 = vld [vmem:[#allocation11 + $0x160] sm:$0xff]  ;;  %v4200_v17 = vld [vmem:[#allocation11 + $0x1d8] sm:$0xff] }
 0xbf6   :  { %3968 = vmatpush1.msra.mxu0 %v3909_v54  ;;  %4046 = vmatprep.subr.mxu1 %v3908_v5  ;;  %v4152_v28 = vld [vmem:[#allocation11 + $0x58] sm:$0xff]  ;;  %v4167_v54 = vld [vmem:[#allocation11 + $0xd0] sm:$0xff] }
 0xbf7   :  { %3969 = vmatprep.subr.mxu0 %v3906_v29  ;;  %4047 = vmatpush1.msra.mxu1 %v3907_v30  ;;  %v4184_v48 = vld [vmem:[#allocation11 + $0x158] sm:$0xff]  ;;  %v4199_v5 = vld [vmem:[#allocation11 + $0x1d0] sm:$0xff] }
 0xbf8   :  { %3970 = vmatpush1.msra.mxu0 %v3905_v31  ;;  %4048 = vmatprep.subr.mxu1 %v3904_v60  ;;  %v4151_v29 = vld [vmem:[#allocation11 + $0x50] sm:$0xff]  ;;  %v4166_v31 = vld [vmem:[#allocation11 + $0xc8] sm:$0xff] }
 0xbf9   :  { %3971 = vmatprep.subr.mxu0 %v3902_v13  ;;  %4049 = vmatpush1.msra.mxu1 %v3903_v38  ;;  %v4183_v30 = vld [vmem:[#allocation11 + $0x150] sm:$0xff]  ;;  %v4198_v60 = vld [vmem:[#allocation11 + $0x1c8] sm:$0xff] }
 0xbfa   :  { %3972 = vmatpush1.msra.mxu0 %v3901_v27  ;;  %4050 = vmatprep.subr.mxu1 %v3900_v43  ;;  %v4150_v13 = vld [vmem:[#allocation11 + $0x48] sm:$0xff]  ;;  %v4165_v27 = vld [vmem:[#allocation11 + $0xc0] sm:$0xff] }
 0xbfb   :  { %3973 = vmatprep.subr.mxu0 %v3898_v62  ;;  %4051 = vmatpush1.msra.mxu1 %v3899_v35  ;;  %v4182_v38 = vld [vmem:[#allocation11 + $0x148] sm:$0xff]  ;;  %v4197_v43 = vld [vmem:[#allocation11 + $0x1c0] sm:$0xff] }
 0xbfc   :  { %3974 = vmatpush1.msra.mxu0 %v3897_v36  ;;  %4052 = vmatprep.subr.mxu1 %v3896_v22  ;;  %v4149_v62 = vld [vmem:[#allocation11 + $0x40] sm:$0xff]  ;;  %v4164_v36 = vld [vmem:[#allocation11 + $0xb8] sm:$0xff] }
 0xbfd   :  { %3975 = vmatprep.subr.mxu0 %v3894_v39  ;;  %4053 = vmatpush1.msra.mxu1 %v3895_v40  ;;  %v4181_v35 = vld [vmem:[#allocation11 + $0x140] sm:$0xff]  ;;  %v4196_v22 = vld [vmem:[#allocation11 + $0x1b8] sm:$0xff] }
 0xbfe   :  { %3976 = vmatpush1.msra.mxu0 %v3893_v0  ;;  %4054 = vmatprep.subr.mxu1 %v3892_v10  ;;  %v4148_v39 = vld [vmem:[#allocation11 + $0x38] sm:$0xff]  ;;  %v4163_v0 = vld [vmem:[#allocation11 + $0xb0] sm:$0xff] }
 0xbff   :  { %3977 = vmatprep.subr.mxu0 %v3890_v44  ;;  %4055 = vmatpush1.msra.mxu1 %v3891_v49  ;;  %v4180_v40 = vld [vmem:[#allocation11 + $0x138] sm:$0xff]  ;;  %v4195_v10 = vld [vmem:[#allocation11 + $0x1b0] sm:$0xff] }
 0xc00   :  { %3978 = vmatpush1.msra.mxu0 %v3889_v50  ;;  %4056 = vmatprep.subr.mxu1 %v3888_v53  ;;  %v4147_v44 = vld [vmem:[#allocation11 + $0x30] sm:$0xff]  ;;  %v4162_v50 = vld [vmem:[#allocation11 + $0xa8] sm:$0xff] }
 0xc01   :  { %3979 = vmatprep.subr.mxu0 %v3886_v24  ;;  %4013 = vmatprep.mubr.f32.mxu0 %v5501_v3  ;;  %v4179_v49 = vld [vmem:[#allocation11 + $0x130] sm:$0xff]  ;;  %v4194_v53 = vld [vmem:[#allocation11 + $0x1a8] sm:$0xff] }
 0xc02   :  { %4090 = vmatprep.mubr.f32.mxu1 %v5501_v3  ;;  %3980 = vmatpush1.msra.mxu0 %v3885_v25  ;;  %v4146_v24 = vld [vmem:[#allocation11 + $0x28] sm:$0xff] }
 0xc03   :  { %4057 = vmatpush1.msra.mxu1 %v3887_v18  ;;  %4805 = vmatprep.subr.mxu0 %v4172_v56  ;;  %v4178_v25 = vld [vmem:[#allocation11 + $0x128] sm:$0xff]  ;;  %v4161_v18 = vld [vmem:[#allocation11 + $0xa0] sm:$0xff] }
 0xc04   :  { %4843 = vmatprep.subr.mxu1 %v4204_v57  ;;  %v4193_v56 = vld [vmem:[#allocation11 + $0x1a0] sm:$0xff] }
 0xc05   :  { %v4145_v57 = vld [vmem:[#allocation11 + $0x20] sm:$0xff] }
 0xca2   :  { %v3881_v20 = vpop.f32.mrf.mxu1 }
 0xca3   :  { %v3808_v42 = vpop.f32.mrf.mxu0 }
 0xca4   :  { %4014 = vmatmul.mubr.f32.vlgmr.msra.gmra.mxu0 %v3808_v42  ;;  %4091 = vmatmul.mubr.f32.vlgmr.msra.gmra.mxu1 %v3808_v42  ;;  %v4995_v14 = vpop.f32.mrf.mxu1  ;;  %v4160_v42 = vld [vmem:[#allocation11 + $0x98] sm:$0xff] }
 0xca5   :  { %v4990_v63 = vpop.f32.mrf.mxu0  ;;  %4019 = vmatprep.mubr.f32.mxu0 %v5501_v3  ;;  %4096 = vmatprep.mubr.f32.mxu1 %v5501_v3  ;;  %v4176_v14 = vld [vmem:[#allocation11 + $0x118] sm:$0xff] }
 0xca6   :  { %4806 = vmatpush3.msra.mxu0 %v4156_v11  ;;  %4844 = vmatpush3.msra.mxu1 %v4188_v58  ;;  %v4192_v11 = vld [vmem:[#allocation11 + $0x198] sm:$0xff]  ;;  %v4143_v63 = vld [vmem:[#allocation11 + $0x10] sm:$0xff] }
 0xca7   :  { %4807 = vmatprep.subr.mxu0 %v4171_v61  ;;  %4845 = vmatprep.subr.mxu1 %v4203_v16  ;;  %v4144_v58 = vld [vmem:[#allocation11 + $0x18] sm:$0xff]  ;;  %v4159_v61 = vld [vmem:[#allocation11 + $0x90] sm:$0xff] }
 0xca8   :  { %4020 = vmatmul.mubr.f32.gmra.mxu0 %v3881_v20  ;;  %4097 = vmatmul.mubr.f32.gmra.mxu1 %v3881_v20  ;;  %v4177_v20 = vld [vmem:[#allocation11 + $0x120] sm:$0xff]  ;;  %v4191_v16 = vld [vmem:[#allocation11 + $0x190] sm:$0xff] }
 0xca9   :  { %4808 = vmatpush3.msra.mxu0 %v4155_v9  ;;  %4846 = vmatpush3.msra.mxu1 %v4187_v41  ;;  %v4175_v9 = vld [vmem:[#allocation11 + $0x110] sm:$0xff]  ;;  %v4158_v41 = vld [vmem:[#allocation11 + $0x88] sm:$0xff] }
 0xcaa   :  { %4809 = vmatprep.subr.mxu0 %v4170_v45  ;;  %4847 = vmatprep.subr.mxu1 %v4202_v15  ;;  %v4190_v45 = vld [vmem:[#allocation11 + $0x188] sm:$0xff] }
 0xcab   :  { %4810 = vmatpush3.msra.mxu0 %v4154_v47  ;;  %4848 = vmatpush3.msra.mxu1 %v4186_v34  ;;  %v4142_v15 = vld [vmem:[#allocation11 + $0x8] sm:$0xff]  ;;  %v4157_v34 = vld [vmem:[#allocation11 + $0x80] sm:$0xff] }
 0xcac   :  { %4811 = vmatprep.subr.mxu0 %v4169_v51  ;;  %4849 = vmatprep.subr.mxu1 %v4201_v37  ;;  %v4174_v47 = vld [vmem:[#allocation11 + $0x108] sm:$0xff]  ;;  %v4189_v51 = vld [vmem:[#allocation11 + $0x180] sm:$0xff] }
 0xcad   :  { %4812 = vmatpush3.msra.mxu0 %v4153_v52  ;;  %4850 = vmatpush3.msra.mxu1 %v4185_v8  ;;  %v4141_v37 = vld [vmem:[#allocation11] sm:$0xff] }
 0xcae   :  { %4813 = vmatprep.subr.mxu0 %v4168_v2  ;;  %4851 = vmatprep.subr.mxu1 %v4200_v17  ;;  %v4173_v52 = vld [vmem:[#allocation11 + $0x100] sm:$0xff]  ;;  %v4111_v2 = vld [vmem:[#allocation10] sm:$0xf] }
 0xcaf   :  { %4814 = vmatpush3.msra.mxu0 %v4152_v28  ;;  %4852 = vmatpush3.msra.mxu1 %v4184_v48  ;;  %v4377_v8 = vld [vmem:[#allocation14 + $0x78] sm:$0xff]  ;;  %v4120_v48 = vrot.slane %v4111_v2, %v5699_v7 }
 0xcb0   :  { %4815 = vmatprep.subr.mxu0 %v4167_v54  ;;  %4853 = vmatprep.subr.mxu1 %v4199_v5  ;;  %v4128_v54 = vrot.slane %v4111_v2, %v5724_v6 }
 0xcb1   :  { %4816 = vmatpush3.msra.mxu0 %v4151_v29  ;;  %4854 = vmatpush3.msra.mxu1 %v4183_v30  ;;  %v4116_v29 = vrot.slane %v4111_v2, %v5778_v19 }
 0xcb2   :  { %4817 = vmatprep.subr.mxu0 %v4166_v31  ;;  %4855 = vmatprep.subr.mxu1 %v4198_v60 }
 0xcb3   :  { %4818 = vmatpush3.msra.mxu0 %v4150_v13  ;;  %4856 = vmatpush3.msra.mxu1 %v4182_v38  ;;  %v4124_v13 = vrot.slane %v4111_v2, %v5721_v33 }
 0xcb4   :  { %4819 = vmatprep.subr.mxu0 %v4165_v27  ;;  %4857 = vmatprep.subr.mxu1 %v4197_v43 }
 0xcb5   :  { %4820 = vmatpush3.msra.mxu0 %v4149_v62  ;;  %4858 = vmatpush3.msra.mxu1 %v4181_v35 }
 0xcb6   :  { %4821 = vmatprep.subr.mxu0 %v4164_v36  ;;  %4859 = vmatprep.subr.mxu1 %v4196_v22 }
 0xcb7   :  { %4822 = vmatpush3.msra.mxu0 %v4148_v39  ;;  %4860 = vmatpush3.msra.mxu1 %v4180_v40 }
 0xcb8   :  { %4823 = vmatprep.subr.mxu0 %v4163_v0  ;;  %4861 = vmatprep.subr.mxu1 %v4195_v10 }
 0xcb9   :  { %4824 = vmatpush3.msra.mxu0 %v4147_v44  ;;  %4862 = vmatpush3.msra.mxu1 %v4179_v49  ;;  %v4375_v49 = vld [vmem:[#allocation14 + $0x68] sm:$0xff] }
 0xcba   :  { %4825 = vmatprep.subr.mxu0 %v4162_v50  ;;  %4863 = vmatprep.subr.mxu1 %v4194_v53  ;;  %v4371_v50 = vld [vmem:[#allocation14 + $0x48] sm:$0xff]  ;;  %v4370_v53 = vld [vmem:[#allocation14 + $0x40] sm:$0xff] }
 0xcbb   :  { %4826 = vmatpush3.msra.mxu0 %v4146_v24  ;;  %4864 = vmatpush3.msra.mxu1 %v4178_v25  ;;  %v4369_v24 = vld [vmem:[#allocation14 + $0x38] sm:$0xff]  ;;  %v4368_v25 = vld [vmem:[#allocation14 + $0x30] sm:$0xff] }
 0xcbc   :  { %4827 = vmatprep.subr.mxu0 %v4161_v18  ;;  %4865 = vmatprep.subr.mxu1 %v4193_v56  ;;  %v4367_v18 = vld [vmem:[#allocation14 + $0x28] sm:$0xff]  ;;  %v4366_v56 = vld [vmem:[#allocation14 + $0x20] sm:$0xff] }
 0xcbd   :  { %4828 = vmatpush3.msra.mxu0 %v4145_v57  ;;  %4866 = vmatpush3.msra.mxu1 %v4177_v20  ;;  %v4365_v57 = vld [vmem:[#allocation14 + $0x18] sm:$0xff]  ;;  %v4364_v20 = vld [vmem:[#allocation14 + $0x10] sm:$0xff] }
 0xcbe   :  { %4829 = vmatprep.subr.mxu0 %v4160_v42  ;;  %4867 = vmatprep.subr.mxu1 %v4192_v11  ;;  %v4363_v42 = vld [vmem:[#allocation14 + $0x8] sm:$0xff]  ;;  %v4362_v11 = vld [vmem:[#allocation14] sm:$0xff] }
 0xcbf   :  { %4830 = vmatpush3.msra.mxu0 %v4144_v58  ;;  %4868 = vmatpush3.msra.mxu1 %v4176_v14 }
 0xcc0   :  { %4831 = vmatprep.subr.mxu0 %v4159_v61  ;;  %4869 = vmatprep.subr.mxu1 %v4191_v16  ;;  %v4767_v61 = vld [vmem:[#allocation13] ss:$0 sm:$0xff] }
 0xcc1   :  { %4832 = vmatpush3.msra.mxu0 %v4143_v63  ;;  %4870 = vmatpush3.msra.mxu1 %v4175_v9 }
 0xcc2   :  { %4833 = vmatprep.subr.mxu0 %v4158_v41  ;;  %4871 = vmatprep.subr.mxu1 %v4190_v45 }
 0xcc3   :  { %4834 = vmatpush3.msra.mxu0 %v4142_v15  ;;  %4872 = vmatpush3.msra.mxu1 %v4174_v47 }
 0xcc4   :  { %4835 = vmatprep.subr.mxu0 %v4157_v34  ;;  %4873 = vmatprep.subr.mxu1 %v4189_v51 }
 0xcc5   :  { %4836 = vmatpush3.msra.mxu0 %v4141_v37  ;;  %4874 = vmatpush3.msra.mxu1 %v4173_v52 }
 0xcc6   :  { %5031 = vmatprep.subr.mxu1 %v5501_v3  ;;  %4996 = vmatprep.subr.mxu0 %v4377_v8 }
 0xd64   :  { %v4015_v17 = vpop.f32.mrf.mxu0  ;;  %v4092_v28 = vpop.f32.mrf.mxu1 }
 0xd65   :  { %v4103_v5 = vadd.f32 %v4015_v17, %v5952_v21  ;;  %v4105_v60 = vadd.f32 %v4092_v28, %v5955_v12  ;;  %v4768_v28 = vld [vmem:[#allocation16] ss:$0 sm:$0xff] }
 0xd66   :  { %v4017_v30 = vpop.f32.mrf.mxu0  ;;  %v4094_v31 = vpop.f32.mrf.mxu1 }
 0xd67   :  { %v4104_v38 = vadd.f32 %v4017_v30, %v5958_v23  ;;  %v4106_v27 = vadd.f32 %v4094_v31, %v5961_v1  ;;  %v4133_v22 = vadd.f32 %v4116_v29, %v4103_v5  ;;  %v4135_v40 = vadd.f32 %v4124_v13, %v4105_v60  ;;  %v4376_v23 = vld [vmem:[#allocation14 + $0x70] sm:$0xff] }
 0xd68   :  { %v4021_v43 = vpop.f32.mrf.mxu0  ;;  %v4098_v62 = vpop.f32.mrf.mxu1 }
 0xd69   :  { %v4134_v35 = vadd.f32 %v4120_v48, %v4104_v38  ;;  %v4136_v36 = vadd.f32 %v4128_v54, %v4106_v27  ;;  %v4107_v6 = vadd.f32 %v4021_v43, %v5964_v59  ;;  %v4109_v0 = vadd.f32 %v4098_v62, %v5967_v26  ;;  %v4374_v26 = vld [vmem:[#allocation14 + $0x60] sm:$0xff] }
 0xd6a   :  { %v4023_v21 = vpop.f32.mrf.mxu0  ;;  %v4100_v39 = vpop.f32.mrf.mxu1  ;;  %v4478_v27 = vand.u32 127, %v998_v46 }
 0xd6b   :  { %v4108_v12 = vadd.f32 %v4023_v21, %v5970_v32  ;;  %v4110_v33 = vadd.f32 %v4100_v39, %v5973_v4  ;;  %4276 = vmatprep.mubr.f32.mxu0 %v4134_v35  ;;  %4351 = vmatprep.mubr.f32.mxu1 %v4136_v36  ;;  %v4137_v44 = vadd.f32 %v4116_v29, %v4107_v6  ;;  %v4373_v32 = vld [vmem:[#allocation14 + $0x58] sm:$0xff]  ;;  %v4372_v4 = vld [vmem:[#allocation14 + $0x50] sm:$0xff]  ;;  %v4769_v29 = vld [vmem:[#allocation17] ss:$0 sm:$0xff]  ;;  %v5503_v39 = vmov 0  }
 0xd6c   :  { %4277 = vmatmul.mubr.f32.vlgmr.msra.gmra.mxu0 %v4133_v22  ;;  %4352 = vmatmul.mubr.f32.vlgmr.msra.gmra.mxu1 %v4135_v40  ;;  %v4139_v59 = vadd.f32 %v4124_v13, %v4109_v0  ;;  %v6008_v43 = vsub.s32 %v4478_v27, %v5696_v55 }
 0xd6d   :  { %v4138_v1 = vadd.f32 %v4120_v48, %v4108_v12  ;;  %v4140_v10 = vadd.f32 %v4128_v54, %v4110_v33  ;;  %4997 = vmatpush3.msra.mxu0 %v4377_v8  ;;  %5092 = vset.pattern.permute.xlu0 %v5503_v39 }
 0xd6e   :  { %4998 = vmatprep.subr.mxu0 %v4376_v23  ;;  %5091 = vset.pattern.permute.xlu1 %v5503_v39 }
 0xd6f   :  { %4281 = vmatprep.mubr.f32.mxu0 %v4138_v1  ;;  %4356 = vmatprep.mubr.f32.mxu1 %v4140_v10 }
 0xd70   :  { %4282 = vmatmul.mubr.f32.gmra.mxu0 %v4137_v44  ;;  %4357 = vmatmul.mubr.f32.gmra.mxu1 %v4139_v59 }
 0xd71   :  { %4999 = vmatpush3.msra.mxu0 %v4376_v23  ;;  %5063 = vmatprep.mubr.msk.f32.mxu1 %vm5502_vm0, %v5501_v3 }
 0xd72   :  { %5000 = vmatprep.subr.mxu0 %v4375_v49 }
 0xd73   :  { %5001 = vmatpush3.msra.mxu0 %v4375_v49 }
 0xd74   :  { %5002 = vmatprep.subr.mxu0 %v4374_v26 }
 0xd75   :  { %5003 = vmatpush3.msra.mxu0 %v4374_v26 }
 0xd76   :  { %5004 = vmatprep.subr.mxu0 %v4373_v32 }
 0xd77   :  { %5005 = vmatpush3.msra.mxu0 %v4373_v32 }
 0xd78   :  { %5006 = vmatprep.subr.mxu0 %v4372_v4 }
 0xd79   :  { %5007 = vmatpush3.msra.mxu0 %v4372_v4 }
 0xd7a   :  { %5008 = vmatprep.subr.mxu0 %v4371_v50 }
 0xd7b   :  { %5009 = vmatpush3.msra.mxu0 %v4371_v50  ;;  %v4586_v50 = vld [vmem:[%s6121_s14] sm:$0x3] }
 0xd7c   :  { %5010 = vmatprep.subr.mxu0 %v4370_v53 }
 0xd7d   :  { %5011 = vmatpush3.msra.mxu0 %v4370_v53  ;;  %v4585_v53 = vld [vmem:[%s6117_s10 + $0x78] sm:$0xff] }
 0xd7e   :  { %5012 = vmatprep.subr.mxu0 %v4369_v24  ;;  %5032 = vmatpush3.msra.mxu1 %v4585_v53 }
 0xd7f   :  { %5013 = vmatpush3.msra.mxu0 %v4369_v24  ;;  %v4584_v24 = vld [vmem:[%s6117_s10 + $0x70] sm:$0xff]  ;;  %5033 = vmatprep.subr.mxu1 %v5501_v3 }
 0xd80   :  { %5014 = vmatprep.subr.mxu0 %v4368_v25  ;;  %5034 = vmatpush3.msra.mxu1 %v4584_v24 }
 0xd81   :  { %5015 = vmatpush3.msra.mxu0 %v4368_v25  ;;  %v4583_v25 = vld [vmem:[%s6117_s10 + $0x68] sm:$0xff]  ;;  %5035 = vmatprep.subr.mxu1 %v5501_v3 }
 0xd82   :  { %5016 = vmatprep.subr.mxu0 %v4367_v18  ;;  %5036 = vmatpush3.msra.mxu1 %v4583_v25 }
 0xd83   :  { %5017 = vmatpush3.msra.mxu0 %v4367_v18  ;;  %v4582_v18 = vld [vmem:[%s6117_s10 + $0x60] sm:$0xff]  ;;  %5037 = vmatprep.subr.mxu1 %v5501_v3 }
 0xd84   :  { %5018 = vmatprep.subr.mxu0 %v4366_v56  ;;  %5038 = vmatpush3.msra.mxu1 %v4582_v18 }
 0xd85   :  { %5019 = vmatpush3.msra.mxu0 %v4366_v56  ;;  %v4581_v56 = vld [vmem:[%s6117_s10 + $0x58] sm:$0xff]  ;;  %5039 = vmatprep.subr.mxu1 %v5501_v3 }
 0xd86   :  { %5020 = vmatprep.subr.mxu0 %v4365_v57  ;;  %5040 = vmatpush3.msra.mxu1 %v4581_v56 }
 0xd87   :  { %5021 = vmatpush3.msra.mxu0 %v4365_v57  ;;  %v4580_v57 = vld [vmem:[%s6117_s10 + $0x50] sm:$0xff]  ;;  %5041 = vmatprep.subr.mxu1 %v5501_v3 }
 0xd88   :  { %5022 = vmatprep.subr.mxu0 %v4364_v20  ;;  %5042 = vmatpush3.msra.mxu1 %v4580_v57 }
 0xd89   :  { %5023 = vmatpush3.msra.mxu0 %v4364_v20  ;;  %5043 = vmatprep.subr.mxu1 %v5501_v3 }
 0xd8a   :  { %5024 = vmatprep.subr.mxu0 %v4363_v42 }
 0xd8b   :  { %5025 = vmatpush3.msra.mxu0 %v4363_v42 }
 0xd8c   :  { %5026 = vmatprep.subr.mxu0 %v4362_v11 }
 0xd8d   :  { %5027 = vmatpush3.msra.mxu0 %v4362_v11  ;;  %v4579_v11 = vld [vmem:[%s6117_s10 + $0x48] sm:$0xff] }
 0xd8e   :  { %5044 = vmatpush3.msra.mxu1 %v4579_v11 }
 0xd8f   :  { %5045 = vmatprep.subr.mxu1 %v5501_v3 }
 0xe2c   :  { %v4837_v58 = vpop.f32.mrf.mxu0  ;;  %v4875_v14 = vpop.f32.mrf.mxu1 }
 0xe2e   :  { %v4838_v16 = vpop.f32.mrf.mxu0  ;;  %v4876_v9 = vpop.f32.mrf.mxu1 }
 0xe2f   :  { %v4839_v63 = vadd.f32 %v4838_v16, %v4837_v58  ;;  %v4877_v15 = vadd.f32 %v4876_v9, %v4875_v14  ;;  %v4578_v14 = vld [vmem:[%s6117_s10 + $0x40] sm:$0xff] }
 0xe30   :  { %v4840_v41 = vpop.f32.mrf.mxu0  ;;  %v4878_v47 = vpop.f32.mrf.mxu1  ;;  %5046 = vmatpush3.msra.mxu1 %v4578_v14 }
 0xe31   :  { %v4279_v45 = vadd.f32 %v4839_v63, %v4767_v61  ;;  %5047 = vmatprep.subr.mxu1 %v5501_v3  ;;  %v4577_v63 = vld [vmem:[%s6117_s10 + $0x38] sm:$0xff] }
 0xe32   :  { %v4841_v34 = vpop.f32.mrf.mxu0  ;;  %v4879_v52 = vpop.f32.mrf.mxu1  ;;  %5048 = vmatpush3.msra.mxu1 %v4577_v63 }
 0xe33   :  { %v6000_v51 = vadd.f32 %v4877_v15, %v4279_v45  ;;  %v4842_v37 = vadd.f32 %v4841_v34, %v4840_v41  ;;  %v4880_v2 = vadd.f32 %v4879_v52, %v4878_v47  ;;  %5049 = vmatprep.subr.mxu1 %v5501_v3  ;;  %v4674_v41 = vld [vmem:[%s6122_s15] sm:$0x3]  ;;  %v4573_v15 = vld [vmem:[%s6117_s10 + $0x18] sm:$0xff]  ;;  %v4572_v47 = vld [vmem:[%s6117_s10 + $0x10] sm:$0xff] }
 0xe34   :  { %v4574_v45 = vld [vmem:[%s6117_s10 + $0x20] sm:$0xff]  ;;  %v4571_v34 = vld [vmem:[%s6117_s10 + $0x8] sm:$0xff] }
 0xe35   :  { %v4284_v8 = vadd.f32 %v4842_v37, %v4767_v61  ;;  %5028 = vmatprep.mubr.f32.mxu0 %v6000_v51  ;;  %v4570_v37 = vld [vmem:[%s6117_s10] sm:$0xff] }
 0xe37   :  { %v6003_v17 = vadd.f32 %v4880_v2, %v4284_v8 }
 0xe39   :  { %5029 = vmatmul.mubr.f32.vlgmr.msra.gmra.mxu0 %v6003_v17 }
 0xef9   :  { %v5030_v48 = vpop.f32.mrf.mxu0 }
 0xefa   :  { %v4457_v54 = vadd.f32 %v5030_v48, %v4768_v28 }
 0xefb   :  { %v4451_v5 = vpop.f32.mrf.mxu0 }
 0xefc   :  { %v4461_v30 = vmax.f32 %v4457_v54, 0.0  ;;  %v4452_v31 = vadd.f32 %v4768_v28, %v4451_v5 }
 0xefe   :  { %v4460_v60 = vmax.f32 %v4452_v31, 0.0  ;;  %v4470_v13 = vmul.f32 %v4769_v29, %v4461_v30 }
 0xf00   :  { %4473 = vadd.xlane.f32.xlu1 %v4470_v13  ;;  %v4469_v38 = vmul.f32 %v4769_v29, %v4460_v60 }
 0xf02   :  { %4471 = vadd.xlane.f32.xlu0 %v4469_v38 }
 0xf89   :  { %v4474_v62 = vpop.xlane.xlu1 %4473 }
 0xf8a   :  { %v4486_v36 = vrot.slane %v4474_v62, %v6008_v43 }
 0xf8b   :  { %v4472_v35 = vpop.xlane.xlu0 %4471 }
 0xf8c   :  { %v4482_v22 = vrot.slane %v4472_v35, %v6008_v43 }
 0xf8e   :  { %v4488_v6 = vsel %vm4487_vm2, %v4486_v36, %v4482_v22 }
 0xf8f   :  { %v4491_v21 = vsel %vm4490_vm3, %v4488_v6, -inf }
 0xf90   :  { %4492 = vmax.xlane.f32.xlu0 %v4491_v21 }
0x1019   :  { %v4493_v46 = vpop.xlane.xlu0 %4492 }
0x101a   :  { %v4498_v55 = vrot.slane %v4493_v46, %v5778_v19  ;;  %v4502_v40 = vrot.slane %v4493_v46, %v5699_v7 }
0x101c   :  { %v4505_v0 = vsub.f32 %v4472_v35, %v4498_v55  ;;  %v4506_v12 = vsub.f32 %v4474_v62, %v4502_v40 }
0x101e   :  { %v4507_v33 = vmul.f32 1.442695, %v4505_v0  ;;  %v4509_v23 = vmul.f32 1.442695, %v4506_v12 }
0x1020   :  { %5125 = vpow2.f32 %v4507_v33 }
0x1021   :  { %5127 = vpow2.f32 %v4509_v23 }
0x102d   :  { %v5126_v1 = vpop.eup %5125 }
0x102e   :  { %v5128_v10 = vpop.eup %5127  ;;  %4514 = vperm.xlu1 %5091, %v5126_v1  }
0x102f   :  { %4517 = vperm.xlu0 %5092, %v5128_v10  }
0x10a9   :  { %v4515_v44 = vpop.permute.xlu1 %4514 }
0x10aa   :  { %v4518_v59 = vpop.permute.xlu0 %4517  ;;  %v4522_v49 = vrot.slane %v4515_v44, %v6008_v43 }
0x10ab   :  { %v4526_v26 = vrot.slane %v4518_v59, %v6008_v43 }
0x10ad   :  { %v4527_v32 = vsel %vm4487_vm2, %v4526_v26, %v4522_v49 }
0x10ae   :  { %v4529_v4 = vsel %vm4490_vm3, %v4527_v32, 0.0 }
0x10af   :  { %4530 = vadd.xlane.f32.xlu1 %v4529_v4 }
0x10c0   :  { %4590 = vperm.xlu1 %5091, %v4586_v50  }
0x1138   :  { %v4531_v20 = vpop.xlane.xlu1 %4530 }
0x1139   :  { %5129 = vrcp.f32 %v4531_v20 }
0x1146   :  { %v5130_v42 = vpop.eup %5129 }
0x1147   :  { %v4537_v58 = vrot.slane %v5130_v42, %v5778_v19  ;;  %v4541_v16 = vrot.slane %v5130_v42, %v5699_v7  ;;  %v4576_v19 = vld [vmem:[%s6117_s10 + $0x30] sm:$0xff]  ;;  %v4575_v7 = vld [vmem:[%s6117_s10 + $0x28] sm:$0xff]  ;;  %s5504_s10 = smov [#allocation24]  }
0x1148   :  { %5050 = vmatpush3.msra.mxu1 %v4576_v19  ;;  %s4727_s24 = sshll.u32 %s5504_s10, 4  ;;  %s4728_s24 = int_to_ptr.vmem [resolvable:$true] %s4727_s24 }
0x1149   :  { %v4544_v61 = vmul.f32 %v5126_v1, %v4537_v58  ;;  %v4545_v9 = vmul.f32 %v5128_v10, %v4541_v16  ;;  %5051 = vmatprep.subr.mxu1 %v5501_v3  ;;  %s5404_s22 = scalar_lea.vmem %s4728_s24, 32  ;;  %p5409_p10 = scmp.lt.s32.totalorder %s4728_s24, %s4728_s24 }
0x114a   :  { %5052 = vmatpush3.msra.mxu1 %v4575_v7  ;;  %p5405_p9 = scmp.ne.s32.totalorder %s4728_s24, %s5404_s22  ;;  %p5410_p11 = scmp.lt.s32.totalorder %s5404_s22, %s5404_s22 }
0x114b   :  { %4548 = vperm.xlu0 %5092, %v4544_v61   ;;  %5053 = vmatprep.subr.mxu1 %v5501_v3 }
0x114c   :  { %5054 = vmatpush3.msra.mxu1 %v4574_v45  ;;  %p5411_p12 = por %p5410_p11, %p5409_p10 }
0x114d   :  { %5055 = vmatprep.subr.mxu1 %v5501_v3 }
0x114e   :  { %5056 = vmatpush3.msra.mxu1 %v4573_v15  ;;  %p5412_p13 = pnand %p5411_p12, %p5405_p9 }
0x114f   :  { %4553 = vperm.xlu0 %5092, %v4545_v9   ;;  %5057 = vmatprep.subr.mxu1 %v5501_v3 }
0x1150   :  { %5058 = vmatpush3.msra.mxu1 %v4572_v47 }
0x1151   :  { %5059 = vmatprep.subr.mxu1 %v5501_v3 }
0x1152   :  { %5060 = vmatpush3.msra.mxu1 %v4571_v34 }
0x1153   :  { %4678 = vperm.xlu0 %5092, %v4674_v41   ;;  %5061 = vmatprep.subr.mxu1 %v5501_v3 }
0x1154   :  { %5062 = vmatpush3.msra.mxu1 %v4570_v37 }
0x11c6   :  { %v4549_v52 = vpop.permute.xlu0 %4548 }
0x11c7   :  { %v4556_v8 = vmul.f32 %v4549_v52, %v6000_v51  ;;  %v4703_v54 = vrot.slane %v4549_v52, %v6008_v43 }
0x11c9   :  { %v4558_v2 = vrot.slane %v4556_v8, 4 }
0x11ca   :  { %v4554_v28 = vpop.permute.xlu0 %4553 }
0x11cb   :  { %v4559_v48 = vadd.f32 %v4558_v2, %v4556_v8  ;;  %v4557_v5 = vmul.f32 %v4554_v28, %v6003_v17  ;;  %v4707_v29 = vrot.slane %v4554_v28, %v6008_v43 }
0x11cd   :  { %v4560_v30 = vrot.slane %v4559_v48, 2  ;;  %v4564_v31 = vrot.slane %v4557_v5, 4  ;;  %v4708_v60 = vsel %vm4487_vm2, %v4707_v29, %v4703_v54 }
0x11ce   :  { %4710 = vst.msk [vmem:[#allocation26] sm:$0x3] %vm4490_vm3, %v4708_v60 }
0x11cf   :  { %v4561_v3 = vadd.f32 %v4560_v30, %v4559_v48  ;;  %v4565_v13 = vadd.f32 %v4564_v31, %v4557_v5 }
0x11d1   :  { %v4566_v38 = vrot.slane %v4565_v13, 2  ;;  %v4562_v27 = vrot.slane %v4561_v3, 1 }
0x11d3   :  { %v4567_v51 = vadd.f32 %v4566_v38, %v4565_v13  ;;  %v4563_v35 = vadd.f32 %v4562_v27, %v4561_v3 }
0x11d5   :  { %v4568_v62 = vrot.slane %v4567_v51, 1 }
0x11d7   :  { %v4569_v36 = vadd.f32 %v4568_v62, %v4567_v51 }
0x11d9   :  { %v4602_v22 = vsel %vm4487_vm2, %v4569_v36, %v4563_v35 }
0x11da   :  { %5064 = vmatmul.mubr.f32.vlgmr.msra.gmra.mxu1 %v4602_v22  ;;  %4699 = vst [vmem:[#allocation24] sm:$0x3] %v4602_v22 }
0x11db   :  { %5415 = shalt.err (!%p5412_p13)
}
0x11dc   :  { %4730 = dma.vmem_to_hbm [thread:$0]  %s4728_s24, 32, %s6124_s17, [#allocation25]  }
0x11dd   :  { %s5505_s29 = smov [#allocation26]  }
0x11de   :  { %s4737_s5 = sshll.u32 %s5505_s29, 4  ;;  %s4738_s5 = int_to_ptr.vmem [resolvable:$true] %s4737_s5 }
0x11df   :  { %s5424_s12 = scalar_lea.vmem %s4738_s5, 32  ;;  %p5429_p1 = scmp.lt.s32.totalorder %s4738_s5, %s4738_s5 }
0x11e0   :  { %p5425_p0 = scmp.ne.s32.totalorder %s4738_s5, %s5424_s12  ;;  %p5430_p2 = scmp.lt.s32.totalorder %s5424_s12, %s5424_s12 }
0x11e2   :  { %p5431_p3 = por %p5430_p2, %p5429_p1 }
0x11e4   :  { %p5432_p4 = pnand %p5431_p3, %p5425_p0 }
0x11e6   :  { %5435 = shalt.err (!%p5432_p4)
}
0x11e7   :  { %4740 = dma.vmem_to_hbm [thread:$0]  %s4738_s5, 32, %s6125_s18, [#allocation25]   ;;  %v4770_v17 = vld [vmem:[#allocation19] ss:$0 sm:$0xff]  ;;  %v4591_v43 = vpop.permute.xlu1 %4590  ;;  %v4771_v6 = vld [vmem:[#allocation20] ss:$0 sm:$0xff]  ;;  %v4679_v21 = vpop.permute.xlu0 %4678 }
0x11e8   :  { %v4599_v39 = vmul.f32 %v4770_v17, %v4591_v43  ;;  %v4687_v55 = vmul.f32 %v4771_v6, %v4679_v21  ;;  %v4772_v0 = vld [vmem:[#allocation22] ss:$0 sm:$0xff]  ;;  %s5506_s17 = smov [#allocation23]   ;;  %vm4697_vm4 = vcmask 74752  }
0x11e9   :  { %s4717_s19 = sshll.u32 %s5506_s17, 4  ;;  %s4718_s19 = int_to_ptr.vmem [resolvable:$true] %s4717_s19 }
0x11ea   :  { %s5444_s6 = scalar_lea.vmem %s4718_s19, 32  ;;  %p5449_p6 = scmp.lt.s32.totalorder %s4718_s19, %s4718_s19 }
0x11eb   :  { %p5445_p5 = scmp.ne.s32.totalorder %s4718_s19, %s5444_s6  ;;  %p5450_p7 = scmp.lt.s32.totalorder %s5444_s6, %s5444_s6 }
0x11ed   :  { %p5451_p8 = por %p5450_p7, %p5449_p6 }
0x11ef   :  { %p5452_p9 = pnand %p5451_p8, %p5445_p5 }
0x129a   :  { %v4670_v46 = vpop.f32.mrf.mxu1 }
0x129b   :  { %v4671_v40 = vadd.f32 %v4670_v46, %v4599_v39 }
0x129c   :  { %v5065_v12 = vpop.f32.mrf.mxu1 }
0x129d   :  { %v4688_v33 = vadd.f32 %v4687_v55, %v4671_v40 }
0x129f   :  { %v4696_v23 = vadd.f32 %v4772_v0, %v4688_v33 }
0x12a1   :  { %4698 = vst.msk [vmem:[#allocation23] sm:$0x3] %vm4697_vm4, %v4696_v23 }
0x12a2   :  { %5455 = shalt.err (!%p5452_p9)
}
0x12a3   :  { %4720 = dma.vmem_to_hbm [thread:$0]  %s4718_s19, 32, %s6123_s16, [#allocation4]  }
0x12a4   :  { %5478 = dma.done.wait [#allocation4], 32  }
0x12a5   :  { %5479 = vsyncadd [#allocation4], 4294967264 }
0x12a6   :  { %5480 = dma.done.wait [#allocation25], 64  }
0x12a7   :  { %5481 = vsyncadd [#allocation25], 4294967232 }
0x12a8   :  { %4750 = vsyncpa [#allocation3], 1 }
0x12a9   :  { %4751 = vsyncpa [#allocation6], 1 }
0x12aa   :  { %4752 = vsyncpa [#allocation9], 1 }
0x12ab   :  { %4753 = vsyncpa [#allocation12], 1 }
0x12ac   :  { %4754 = vsyncpa [#allocation15], 1 }
0x12ad   :  { %4755 = vsyncpa [#allocation18], 1 }
0x12ae   :  { %4756 = vsyncpa [#allocation21], 1 }
0x12af   :  { %4757 = vsyncpa [#allocation4], 1 }
0x12b0   :  { %4758 = vsyncpa [#allocation25], 1 }

</bundles_post_ra>
